<compile_context>
chip_gen: v6e
topology: v6e:2x2x1
jax: 0.10.0
libtpu: 0.0.40
codegen_flags: <defaults>
</compile_context>

<pallas_src>
import jax
import jax.numpy as jnp
from jax.experimental import pallas as pl
from jax.experimental.pallas import tpu as pltpu


_CIN1 = 8  # conv1 input channels zero-padded 3 -> 8 for sublane-aligned concats


# ---------------------------------------------------------------------------
# Fused whole-network kernel (one batch image per grid step)
# ---------------------------------------------------------------------------
def _leaky_relu(x):
    # torch.nn.functional.leaky_relu default negative_slope = 0.01
    return jnp.where(x >= 0, x, 0.01 * x)


def _make_fused_kernel(H, W):
    HW = H * W

    def _shift(x, s):
        # Cyclic shift along the flat HW (lane) axis: result[:, i] = x[:, (i+s) % HW].
        # Lowers to two static lane slices + a concat (same XLU path as pltpu.roll).
        return jnp.roll(x, -s, axis=1)

    def kernel(x_ref, wcol_ref, w1_ref, b1_ref, w2_ref, b2_ref,
               w3_ref, b3_ref, w4_ref, b4_ref, o_ref):
        # ---- boundary masks: built once, shared by all four layers ---------
        hw_idx = jax.lax.broadcasted_iota(jnp.int32, (1, HW), 1)  # flat pixel id
        w_idx = wcol_ref[...]                                     # w = hw % W (prefetched)
        row_ok = {dh: (hw_idx >= -dh * W) if dh < 0 else (hw_idx < (H - dh) * W)
                  for dh in (-2, -1, 1, 2)}
        col_ok = {dw: (w_idx >= -dw) if dw < 0 else (w_idx < W - dw)
                  for dw in (-2, -1, 1, 2)}

        def conv_same(a, w_ref, b_ref, r):
            # a: (Cin, HW) f32  ->  (Cout, HW) f32, "same"-padded (2r+1)^2 conv.
            # Build the im2col slab with shift-based taps (no padded scratch):
            # row shifts first, then column shifts of the row slab.
            rows = []
            for dh in range(-r, r + 1):
                part = a if dh == 0 else jnp.where(row_ok[dh], _shift(a, dh * W), 0.0)
                rows.append(part)
            row_slab = jnp.concatenate(rows, axis=0)          # ((2r+1)*Cin, HW)
            cols = []
            for dw in range(-r, r + 1):
                part = (row_slab if dw == 0
                        else jnp.where(col_ok[dw], _shift(row_slab, dw), 0.0))
                cols.append(part)
            slab = jnp.concatenate(cols, axis=0)              # ((2r+1)^2*Cin, HW)
            # ONE MXU matmul per layer: (Cout, K) x (K, HW), bf16 in / f32 acc.
            acc = jnp.dot(w_ref[...], slab.astype(jnp.bfloat16),
                          preferred_element_type=jnp.float32)
            return acc + b_ref[...]                           # (Cout, 1) bias

        x = x_ref[0]                                          # (8, HW) f32
        a = _leaky_relu(conv_same(x, w1_ref, b1_ref, 2))      # (64, HW)
        a = _leaky_relu(conv_same(a, w2_ref, b2_ref, 1))      # (64, HW)
        a = _leaky_relu(conv_same(a, w3_ref, b3_ref, 1))      # (32, HW)
        y = conv_same(a, w4_ref, b4_ref, 1)                   # (12, HW)
        # Lane-dense store: last dim is HW (multiple of 128) -> unmasked vst.
        o_ref[0] = jax.nn.sigmoid(y)

    return kernel


# ---------------------------------------------------------------------------
# Parameters (deterministic synthetic init, HWIO layout)
# ---------------------------------------------------------------------------
def init_params(key):
    # HWIO layouts; real PyTorch weights are OIHW (Cout, Cin, KH, KW) and would
    # need w.transpose(2, 3, 1, 0) before use here.
    shapes = [
        (5, 5, 3, 64),    # conv1
        (3, 3, 64, 64),   # conv2
        (3, 3, 64, 32),   # conv3
        (3, 3, 32, 12),   # conv4  (upscale_factor**2 * 3 = 12 output channels)
    ]
    params = []
    for i, s in enumerate(shapes):
        wk, bk = jax.random.split(jax.random.fold_in(key, i))
        fan_in = s[0] * s[1] * s[2]
        w = jax.random.normal(wk, s, jnp.float32) / jnp.sqrt(fan_in)
        b = jax.random.normal(bk, (s[3],), jnp.float32) * 0.01
        params.append((w, b))
    return params


def _to_matmul_weight(w_hwio):
    """HWIO (KH, KW, Cin, Cout) -> (Cout, KW*KH*Cin) bf16.

    Flattening order matches the in-kernel slab: k = kw*(KH*Cin) + kh*Cin + ci.
    """
    kh, kw, ci, co = w_hwio.shape
    return jnp.transpose(w_hwio, (3, 1, 0, 2)).reshape(co, kw * kh * ci).astype(jnp.bfloat16)


# ---------------------------------------------------------------------------
# Full forward pass
# ---------------------------------------------------------------------------
def _net_forward_impl(x_nchw, params):
    """x_nchw: (N, 3, H, W) f32 -> (N, 3, 2H, 2W) f32 (NCHW, like torch)."""
    (w1, b1), (w2, b2), (w3, b3), (w4, b4) = params
    N, C, H, W = x_nchw.shape
    assert C == 3
    assert H >= 8 and W >= 8 and (H * W) % 128 == 0, "keep the HW lane dim 128-aligned"
    HW = H * W

    # Flat channel-major input (free reshape from NCHW); pad 3 -> 8 channels so
    # the in-kernel slab concats are 8-sublane aligned (padded channels have
    # zero weights, so they contribute nothing).
    x_flat = jnp.pad(x_nchw.reshape(N, C, HW), ((0, 0), (0, _CIN1 - C), (0, 0)))

    w1m = _to_matmul_weight(jnp.pad(w1, ((0, 0), (0, 0), (0, _CIN1 - C), (0, 0))))  # (64, 200)
    w2m = _to_matmul_weight(w2)                                                     # (64, 576)
    w3m = _to_matmul_weight(w3)                                                     # (32, 576)
    w4m = _to_matmul_weight(w4)                                                     # (12, 288)
    b1m, b2m, b3m, b4m = (b.reshape(-1, 1) for b in (b1, b2, b3, b4))

    # Per-pixel column coordinate (w = hw % W), used by the kernel's boundary
    # masks (avoids in-kernel vector div/mod).
    wcol = (jnp.arange(HW, dtype=jnp.int32) % W).reshape(1, HW)

    def _full(shape):
        return pl.BlockSpec(shape, lambda n: (0,) * len(shape))

    out = pl.pallas_call(
        _make_fused_kernel(H, W),
        out_shape=jax.ShapeDtypeStruct((N, 12, HW), jnp.float32),
        grid=(N,),
        in_specs=[
            pl.BlockSpec((1, _CIN1, HW), lambda n: (n, 0, 0)),  # input image
            _full((1, HW)),                                     # column index
            _full(w1m.shape), _full(b1m.shape),                 # conv1 w, b
            _full(w2m.shape), _full(b2m.shape),                 # conv2 w, b
            _full(w3m.shape), _full(b3m.shape),                 # conv3 w, b
            _full(w4m.shape), _full(b4m.shape),                 # conv4 w, b
        ],
        out_specs=pl.BlockSpec((1, 12, HW), lambda n: (n, 0, 0)),
        compiler_params=pltpu.CompilerParams(
            dimension_semantics=("parallel",)),
    )(x_flat, wcol, w1m, b1m, w2m, b2m, w3m, b3m, w4m, b4m)

    # pixel_shuffle(2) from the (N, 12, HW) layout directly into NCHW:
    #   out[n, c, 2h+i, 2w+j] = y[n, c*4 + i*2 + j, h*W + w]
    # (sigmoid was applied in-kernel; it commutes with this pure permutation)
    y = out.reshape(N, 3, 2, 2, H, W)
    y = jnp.transpose(y, (0, 1, 4, 2, 5, 3))                    # (N, C, H, r, W, r)
    return y.reshape(N, 3, 2 * H, 2 * W)


net_forward = jax.jit(_net_forward_impl)


# ---------------------------------------------------------------------------
# Pure-JAX f32 reference (matches the torch module's math)
# ---------------------------------------------------------------------------
def _reference_forward(x_nchw, params):
    (w1, b1), (w2, b2), (w3, b3), (w4, b4) = params

    def conv(x, w, b):
        y = jax.lax.conv_general_dilated(
            x, w, window_strides=(1, 1), padding="SAME",
            dimension_numbers=("NCHW", "HWIO", "NCHW"))
        return y + b.reshape(1, -1, 1, 1)

    a = jax.nn.leaky_relu(conv(x_nchw, w1, b1))
    a = jax.nn.leaky_relu(conv(a, w2, b2))
    a = jax.nn.leaky_relu(conv(a, w3, b3))
    y = conv(a, w4, b4)
    N, _, H, W = x_nchw.shape
    y = y.reshape(N, 3, 2, 2, H, W).transpose(0, 1, 4, 2, 5, 3).reshape(N, 3, 2 * H, 2 * W)
    return jax.nn.sigmoid(y)


if __name__ == "__main__":
    key = jax.random.PRNGKey(0)
    pkey, xkey = jax.random.split(key)
    params = init_params(pkey)

    # Small input consistent with the module: batch=2, 3 channels, 16x16 spatial.
    x = jax.random.normal(xkey, (2, 3, 16, 16), jnp.float32)

    out = jax.block_until_ready(net_forward(x, params))
    assert out.shape == (2, 3, 32, 32), out.shape
    assert bool(jnp.all(jnp.isfinite(out)))
    assert bool(jnp.all((out >= 0.0) & (out <= 1.0)))           # sigmoid range

    # Validate against a pure-f32 reference (kernel uses bf16 MXU inputs with
    # f32 accumulation, so allow a small tolerance).
    ref = jax.block_until_ready(jax.jit(_reference_forward)(x, params))
    max_err = float(jnp.max(jnp.abs(out - ref)))
    assert max_err < 5e-2, f"max|out - ref| = {max_err}"

    print("KERNEL_OK")
</pallas_src>

<mosaic_0001>
module attributes {stable_mosaic.version = 11 : i64} {
  func.func @kernel(%arg0: i32, %arg1: memref<1x8x256xf32, #tpu.memory_space<vmem>>, %arg2: memref<1x256xi32, #tpu.memory_space<vmem>>, %arg3: memref<64x200xbf16, #tpu.memory_space<vmem>>, %arg4: memref<64x1xf32, #tpu.memory_space<vmem>>, %arg5: memref<64x576xbf16, #tpu.memory_space<vmem>>, %arg6: memref<64x1xf32, #tpu.memory_space<vmem>>, %arg7: memref<32x576xbf16, #tpu.memory_space<vmem>>, %arg8: memref<32x1xf32, #tpu.memory_space<vmem>>, %arg9: memref<12x288xbf16, #tpu.memory_space<vmem>>, %arg10: memref<12x1xf32, #tpu.memory_space<vmem>>, %arg11: memref<1x12x256xf32, #tpu.memory_space<vmem>>) attributes {dimension_semantics = [#tpu.dimension_semantics<parallel>], iteration_bounds = array<i64: 2>, scalar_prefetch = 0 : i64, scratch_operands = 0 : i64, tpu.core_type = #tpu.core_type<tc>, window_params = [{transform_indices = @transform_0, window_bounds = array<i64: 1, 8, 256>}, {pipeline_mode = #tpu.pipeline_mode<synchronous>, transform_indices = @transform_1, window_bounds = array<i64: 1, 256>}, {pipeline_mode = #tpu.pipeline_mode<synchronous>, transform_indices = @transform_2, window_bounds = array<i64: 64, 200>}, {pipeline_mode = #tpu.pipeline_mode<synchronous>, transform_indices = @transform_3, window_bounds = array<i64: 64, 1>}, {pipeline_mode = #tpu.pipeline_mode<synchronous>, transform_indices = @transform_4, window_bounds = array<i64: 64, 576>}, {pipeline_mode = #tpu.pipeline_mode<synchronous>, transform_indices = @transform_5, window_bounds = array<i64: 64, 1>}, {pipeline_mode = #tpu.pipeline_mode<synchronous>, transform_indices = @transform_6, window_bounds = array<i64: 32, 576>}, {pipeline_mode = #tpu.pipeline_mode<synchronous>, transform_indices = @transform_7, window_bounds = array<i64: 32, 1>}, {pipeline_mode = #tpu.pipeline_mode<synchronous>, transform_indices = @transform_8, window_bounds = array<i64: 12, 288>}, {pipeline_mode = #tpu.pipeline_mode<synchronous>, transform_indices = @transform_9, window_bounds = array<i64: 12, 1>}, {transform_indices = @transform_10, window_bounds = array<i64: 1, 12, 256>}]} {
    %0 = tpu.iota {dimensions = array<i32: 1>} : vector<1x256xi32>
    %c0 = arith.constant 0 : index
    %c0_0 = arith.constant 0 : index
    %1 = vector.load %arg2[%c0, %c0_0] : memref<1x256xi32, #tpu.memory_space<vmem>>, vector<1x256xi32>
    %c32_i32 = arith.constant 32 : i32
    %2 = vector.broadcast %c32_i32 : i32 to vector<1x256xi32>
    %3 = arith.cmpi sge, %0, %2 : vector<1x256xi32>
    %c16_i32 = arith.constant 16 : i32
    %4 = vector.broadcast %c16_i32 : i32 to vector<1x256xi32>
    %5 = arith.cmpi sge, %0, %4 : vector<1x256xi32>
    %c240_i32 = arith.constant 240 : i32
    %6 = vector.broadcast %c240_i32 : i32 to vector<1x256xi32>
    %7 = arith.cmpi slt, %0, %6 : vector<1x256xi32>
    %c224_i32 = arith.constant 224 : i32
    %8 = vector.broadcast %c224_i32 : i32 to vector<1x256xi32>
    %9 = arith.cmpi slt, %0, %8 : vector<1x256xi32>
    %c2_i32 = arith.constant 2 : i32
    %10 = vector.broadcast %c2_i32 : i32 to vector<1x256xi32>
    %11 = arith.cmpi sge, %1, %10 : vector<1x256xi32>
    %c1_i32 = arith.constant 1 : i32
    %12 = vector.broadcast %c1_i32 : i32 to vector<1x256xi32>
    %13 = arith.cmpi sge, %1, %12 : vector<1x256xi32>
    %c15_i32 = arith.constant 15 : i32
    %14 = vector.broadcast %c15_i32 : i32 to vector<1x256xi32>
    %15 = arith.cmpi slt, %1, %14 : vector<1x256xi32>
    %c14_i32 = arith.constant 14 : i32
    %16 = vector.broadcast %c14_i32 : i32 to vector<1x256xi32>
    %17 = arith.cmpi slt, %1, %16 : vector<1x256xi32>
    %c0_1 = arith.constant 0 : index
    %c0_2 = arith.constant 0 : index
    %c0_3 = arith.constant 0 : index
    %18 = vector.load %arg1[%c0_1, %c0_2, %c0_3] : memref<1x8x256xf32, #tpu.memory_space<vmem>>, vector<1x8x256xf32>
    %19 = vector.shape_cast %18 : vector<1x8x256xf32> to vector<8x256xf32>
    %20 = vector.extract_strided_slice %19 {offsets = [0, 224], sizes = [8, 32], strides = [1, 1]} : vector<8x256xf32> to vector<8x32xf32>
    %21 = vector.extract_strided_slice %19 {offsets = [0, 0], sizes = [8, 224], strides = [1, 1]} : vector<8x256xf32> to vector<8x224xf32>
    %22 = tpu.concatenate %20, %21 in 1 : vector<8x32xf32>, vector<8x224xf32> -> vector<8x256xf32>
    %cst = arith.constant 0.000000e+00 : f32
    %23 = vector.shape_cast %3 : vector<1x256xi1> to vector<1x256xi1>
    %24 = vector.broadcast %23 : vector<1x256xi1> to vector<8x256xi1>
    %25 = vector.broadcast %cst : f32 to vector<8x256xf32>
    %26 = arith.select %24, %22, %25 : vector<8x256xi1>, vector<8x256xf32>
    %27 = vector.extract_strided_slice %19 {offsets = [0, 240], sizes = [8, 16], strides = [1, 1]} : vector<8x256xf32> to vector<8x16xf32>
    %28 = vector.extract_strided_slice %19 {offsets = [0, 0], sizes = [8, 240], strides = [1, 1]} : vector<8x256xf32> to vector<8x240xf32>
    %29 = tpu.concatenate %27, %28 in 1 : vector<8x16xf32>, vector<8x240xf32> -> vector<8x256xf32>
    %cst_4 = arith.constant 0.000000e+00 : f32
    %30 = vector.shape_cast %5 : vector<1x256xi1> to vector<1x256xi1>
    %31 = vector.broadcast %30 : vector<1x256xi1> to vector<8x256xi1>
    %32 = vector.broadcast %cst_4 : f32 to vector<8x256xf32>
    %33 = arith.select %31, %29, %32 : vector<8x256xi1>, vector<8x256xf32>
    %34 = vector.extract_strided_slice %19 {offsets = [0, 16], sizes = [8, 240], strides = [1, 1]} : vector<8x256xf32> to vector<8x240xf32>
    %35 = vector.extract_strided_slice %19 {offsets = [0, 0], sizes = [8, 16], strides = [1, 1]} : vector<8x256xf32> to vector<8x16xf32>
    %36 = tpu.concatenate %34, %35 in 1 : vector<8x240xf32>, vector<8x16xf32> -> vector<8x256xf32>
    %cst_5 = arith.constant 0.000000e+00 : f32
    %37 = vector.shape_cast %7 : vector<1x256xi1> to vector<1x256xi1>
    %38 = vector.broadcast %37 : vector<1x256xi1> to vector<8x256xi1>
    %39 = vector.broadcast %cst_5 : f32 to vector<8x256xf32>
    %40 = arith.select %38, %36, %39 : vector<8x256xi1>, vector<8x256xf32>
    %41 = vector.extract_strided_slice %19 {offsets = [0, 32], sizes = [8, 224], strides = [1, 1]} : vector<8x256xf32> to vector<8x224xf32>
    %42 = vector.extract_strided_slice %19 {offsets = [0, 0], sizes = [8, 32], strides = [1, 1]} : vector<8x256xf32> to vector<8x32xf32>
    %43 = tpu.concatenate %41, %42 in 1 : vector<8x224xf32>, vector<8x32xf32> -> vector<8x256xf32>
    %cst_6 = arith.constant 0.000000e+00 : f32
    %44 = vector.shape_cast %9 : vector<1x256xi1> to vector<1x256xi1>
    %45 = vector.broadcast %44 : vector<1x256xi1> to vector<8x256xi1>
    %46 = vector.broadcast %cst_6 : f32 to vector<8x256xf32>
    %47 = arith.select %45, %43, %46 : vector<8x256xi1>, vector<8x256xf32>
    %48 = tpu.concatenate %26, %33, %19, %40, %47 in 0 : vector<8x256xf32>, vector<8x256xf32>, vector<8x256xf32>, vector<8x256xf32>, vector<8x256xf32> -> vector<40x256xf32>
    %49 = vector.extract_strided_slice %48 {offsets = [0, 254], sizes = [40, 2], strides = [1, 1]} : vector<40x256xf32> to vector<40x2xf32>
    %50 = vector.extract_strided_slice %48 {offsets = [0, 0], sizes = [40, 254], strides = [1, 1]} : vector<40x256xf32> to vector<40x254xf32>
    %51 = tpu.concatenate %49, %50 in 1 : vector<40x2xf32>, vector<40x254xf32> -> vector<40x256xf32>
    %cst_7 = arith.constant 0.000000e+00 : f32
    %52 = vector.shape_cast %11 : vector<1x256xi1> to vector<1x256xi1>
    %53 = vector.broadcast %52 : vector<1x256xi1> to vector<40x256xi1>
    %54 = vector.broadcast %cst_7 : f32 to vector<40x256xf32>
    %55 = arith.select %53, %51, %54 : vector<40x256xi1>, vector<40x256xf32>
    %56 = vector.extract_strided_slice %48 {offsets = [0, 255], sizes = [40, 1], strides = [1, 1]} : vector<40x256xf32> to vector<40x1xf32>
    %57 = vector.extract_strided_slice %48 {offsets = [0, 0], sizes = [40, 255], strides = [1, 1]} : vector<40x256xf32> to vector<40x255xf32>
    %58 = tpu.concatenate %56, %57 in 1 : vector<40x1xf32>, vector<40x255xf32> -> vector<40x256xf32>
    %cst_8 = arith.constant 0.000000e+00 : f32
    %59 = vector.shape_cast %13 : vector<1x256xi1> to vector<1x256xi1>
    %60 = vector.broadcast %59 : vector<1x256xi1> to vector<40x256xi1>
    %61 = vector.broadcast %cst_8 : f32 to vector<40x256xf32>
    %62 = arith.select %60, %58, %61 : vector<40x256xi1>, vector<40x256xf32>
    %63 = vector.extract_strided_slice %48 {offsets = [0, 1], sizes = [40, 255], strides = [1, 1]} : vector<40x256xf32> to vector<40x255xf32>
    %64 = vector.extract_strided_slice %48 {offsets = [0, 0], sizes = [40, 1], strides = [1, 1]} : vector<40x256xf32> to vector<40x1xf32>
    %65 = tpu.concatenate %63, %64 in 1 : vector<40x255xf32>, vector<40x1xf32> -> vector<40x256xf32>
    %cst_9 = arith.constant 0.000000e+00 : f32
    %66 = vector.shape_cast %15 : vector<1x256xi1> to vector<1x256xi1>
    %67 = vector.broadcast %66 : vector<1x256xi1> to vector<40x256xi1>
    %68 = vector.broadcast %cst_9 : f32 to vector<40x256xf32>
    %69 = arith.select %67, %65, %68 : vector<40x256xi1>, vector<40x256xf32>
    %70 = vector.extract_strided_slice %48 {offsets = [0, 2], sizes = [40, 254], strides = [1, 1]} : vector<40x256xf32> to vector<40x254xf32>
    %71 = vector.extract_strided_slice %48 {offsets = [0, 0], sizes = [40, 2], strides = [1, 1]} : vector<40x256xf32> to vector<40x2xf32>
    %72 = tpu.concatenate %70, %71 in 1 : vector<40x254xf32>, vector<40x2xf32> -> vector<40x256xf32>
    %cst_10 = arith.constant 0.000000e+00 : f32
    %73 = vector.shape_cast %17 : vector<1x256xi1> to vector<1x256xi1>
    %74 = vector.broadcast %73 : vector<1x256xi1> to vector<40x256xi1>
    %75 = vector.broadcast %cst_10 : f32 to vector<40x256xf32>
    %76 = arith.select %74, %72, %75 : vector<40x256xi1>, vector<40x256xf32>
    %77 = tpu.concatenate %55, %62, %48, %69, %76 in 0 : vector<40x256xf32>, vector<40x256xf32>, vector<40x256xf32>, vector<40x256xf32>, vector<40x256xf32> -> vector<200x256xf32>
    %c0_11 = arith.constant 0 : index
    %c0_12 = arith.constant 0 : index
    %78 = vector.load %arg3[%c0_11, %c0_12] : memref<64x200xbf16, #tpu.memory_space<vmem>>, vector<64x200xbf16>
    %79 = arith.truncf %77 : vector<200x256xf32> to vector<200x256xbf16>
    %cst_13 = arith.constant dense<0.000000e+00> : vector<64x256xf32>
    %80 = tpu.matmul %78, %79, %cst_13 {dimension_numbers = #tpu.dot_dimension_numbers<[1], [0], [0], [1], [0, 0, 1, 1], [], []>} : vector<64x200xbf16>, vector<200x256xbf16>, vector<64x256xf32> -> vector<64x256xf32>
    %c0_14 = arith.constant 0 : index
    %c0_15 = arith.constant 0 : index
    %81 = vector.load %arg4[%c0_14, %c0_15] : memref<64x1xf32, #tpu.memory_space<vmem>>, vector<64x1xf32>
    %82 = vector.broadcast %81 : vector<64x1xf32> to vector<64x256xf32>
    %83 = arith.addf %80, %82 : vector<64x256xf32>
    %cst_16 = arith.constant 0.000000e+00 : f32
    %84 = vector.broadcast %cst_16 : f32 to vector<64x256xf32>
    %85 = arith.cmpf oge, %83, %84 : vector<64x256xf32>
    %cst_17 = arith.constant 0.00999999977 : f32
    %86 = vector.broadcast %cst_17 : f32 to vector<64x256xf32>
    %87 = arith.mulf %86, %83 : vector<64x256xf32>
    %88 = arith.select %85, %83, %87 : vector<64x256xi1>, vector<64x256xf32>
    %89 = vector.extract_strided_slice %88 {offsets = [0, 240], sizes = [64, 16], strides = [1, 1]} : vector<64x256xf32> to vector<64x16xf32>
    %90 = vector.extract_strided_slice %88 {offsets = [0, 0], sizes = [64, 240], strides = [1, 1]} : vector<64x256xf32> to vector<64x240xf32>
    %91 = tpu.concatenate %89, %90 in 1 : vector<64x16xf32>, vector<64x240xf32> -> vector<64x256xf32>
    %cst_18 = arith.constant 0.000000e+00 : f32
    %92 = vector.shape_cast %5 : vector<1x256xi1> to vector<1x256xi1>
    %93 = vector.broadcast %92 : vector<1x256xi1> to vector<64x256xi1>
    %94 = vector.broadcast %cst_18 : f32 to vector<64x256xf32>
    %95 = arith.select %93, %91, %94 : vector<64x256xi1>, vector<64x256xf32>
    %96 = vector.extract_strided_slice %88 {offsets = [0, 16], sizes = [64, 240], strides = [1, 1]} : vector<64x256xf32> to vector<64x240xf32>
    %97 = vector.extract_strided_slice %88 {offsets = [0, 0], sizes = [64, 16], strides = [1, 1]} : vector<64x256xf32> to vector<64x16xf32>
    %98 = tpu.concatenate %96, %97 in 1 : vector<64x240xf32>, vector<64x16xf32> -> vector<64x256xf32>
    %cst_19 = arith.constant 0.000000e+00 : f32
    %99 = vector.shape_cast %7 : vector<1x256xi1> to vector<1x256xi1>
    %100 = vector.broadcast %99 : vector<1x256xi1> to vector<64x256xi1>
    %101 = vector.broadcast %cst_19 : f32 to vector<64x256xf32>
    %102 = arith.select %100, %98, %101 : vector<64x256xi1>, vector<64x256xf32>
    %103 = tpu.concatenate %95, %88, %102 in 0 : vector<64x256xf32>, vector<64x256xf32>, vector<64x256xf32> -> vector<192x256xf32>
    %104 = vector.extract_strided_slice %103 {offsets = [0, 255], sizes = [192, 1], strides = [1, 1]} : vector<192x256xf32> to vector<192x1xf32>
    %105 = vector.extract_strided_slice %103 {offsets = [0, 0], sizes = [192, 255], strides = [1, 1]} : vector<192x256xf32> to vector<192x255xf32>
    %106 = tpu.concatenate %104, %105 in 1 : vector<192x1xf32>, vector<192x255xf32> -> vector<192x256xf32>
    %cst_20 = arith.constant 0.000000e+00 : f32
    %107 = vector.shape_cast %13 : vector<1x256xi1> to vector<1x256xi1>
    %108 = vector.broadcast %107 : vector<1x256xi1> to vector<192x256xi1>
    %109 = vector.broadcast %cst_20 : f32 to vector<192x256xf32>
    %110 = arith.select %108, %106, %109 : vector<192x256xi1>, vector<192x256xf32>
    %111 = vector.extract_strided_slice %103 {offsets = [0, 1], sizes = [192, 255], strides = [1, 1]} : vector<192x256xf32> to vector<192x255xf32>
    %112 = vector.extract_strided_slice %103 {offsets = [0, 0], sizes = [192, 1], strides = [1, 1]} : vector<192x256xf32> to vector<192x1xf32>
    %113 = tpu.concatenate %111, %112 in 1 : vector<192x255xf32>, vector<192x1xf32> -> vector<192x256xf32>
    %cst_21 = arith.constant 0.000000e+00 : f32
    %114 = vector.shape_cast %15 : vector<1x256xi1> to vector<1x256xi1>
    %115 = vector.broadcast %114 : vector<1x256xi1> to vector<192x256xi1>
    %116 = vector.broadcast %cst_21 : f32 to vector<192x256xf32>
    %117 = arith.select %115, %113, %116 : vector<192x256xi1>, vector<192x256xf32>
    %118 = tpu.concatenate %110, %103, %117 in 0 : vector<192x256xf32>, vector<192x256xf32>, vector<192x256xf32> -> vector<576x256xf32>
    %c0_22 = arith.constant 0 : index
    %c0_23 = arith.constant 0 : index
    %119 = vector.load %arg5[%c0_22, %c0_23] : memref<64x576xbf16, #tpu.memory_space<vmem>>, vector<64x576xbf16>
    %120 = arith.truncf %118 : vector<576x256xf32> to vector<576x256xbf16>
    %cst_24 = arith.constant dense<0.000000e+00> : vector<64x256xf32>
    %121 = tpu.matmul %119, %120, %cst_24 {dimension_numbers = #tpu.dot_dimension_numbers<[1], [0], [0], [1], [0, 0, 1, 1], [], []>} : vector<64x576xbf16>, vector<576x256xbf16>, vector<64x256xf32> -> vector<64x256xf32>
    %c0_25 = arith.constant 0 : index
    %c0_26 = arith.constant 0 : index
    %122 = vector.load %arg6[%c0_25, %c0_26] : memref<64x1xf32, #tpu.memory_space<vmem>>, vector<64x1xf32>
    %123 = vector.broadcast %122 : vector<64x1xf32> to vector<64x256xf32>
    %124 = arith.addf %121, %123 : vector<64x256xf32>
    %cst_27 = arith.constant 0.000000e+00 : f32
    %125 = vector.broadcast %cst_27 : f32 to vector<64x256xf32>
    %126 = arith.cmpf oge, %124, %125 : vector<64x256xf32>
    %cst_28 = arith.constant 0.00999999977 : f32
    %127 = vector.broadcast %cst_28 : f32 to vector<64x256xf32>
    %128 = arith.mulf %127, %124 : vector<64x256xf32>
    %129 = arith.select %126, %124, %128 : vector<64x256xi1>, vector<64x256xf32>
    %130 = vector.extract_strided_slice %129 {offsets = [0, 240], sizes = [64, 16], strides = [1, 1]} : vector<64x256xf32> to vector<64x16xf32>
    %131 = vector.extract_strided_slice %129 {offsets = [0, 0], sizes = [64, 240], strides = [1, 1]} : vector<64x256xf32> to vector<64x240xf32>
    %132 = tpu.concatenate %130, %131 in 1 : vector<64x16xf32>, vector<64x240xf32> -> vector<64x256xf32>
    %cst_29 = arith.constant 0.000000e+00 : f32
    %133 = vector.shape_cast %5 : vector<1x256xi1> to vector<1x256xi1>
    %134 = vector.broadcast %133 : vector<1x256xi1> to vector<64x256xi1>
    %135 = vector.broadcast %cst_29 : f32 to vector<64x256xf32>
    %136 = arith.select %134, %132, %135 : vector<64x256xi1>, vector<64x256xf32>
    %137 = vector.extract_strided_slice %129 {offsets = [0, 16], sizes = [64, 240], strides = [1, 1]} : vector<64x256xf32> to vector<64x240xf32>
    %138 = vector.extract_strided_slice %129 {offsets = [0, 0], sizes = [64, 16], strides = [1, 1]} : vector<64x256xf32> to vector<64x16xf32>
    %139 = tpu.concatenate %137, %138 in 1 : vector<64x240xf32>, vector<64x16xf32> -> vector<64x256xf32>
    %cst_30 = arith.constant 0.000000e+00 : f32
    %140 = vector.shape_cast %7 : vector<1x256xi1> to vector<1x256xi1>
    %141 = vector.broadcast %140 : vector<1x256xi1> to vector<64x256xi1>
    %142 = vector.broadcast %cst_30 : f32 to vector<64x256xf32>
    %143 = arith.select %141, %139, %142 : vector<64x256xi1>, vector<64x256xf32>
    %144 = tpu.concatenate %136, %129, %143 in 0 : vector<64x256xf32>, vector<64x256xf32>, vector<64x256xf32> -> vector<192x256xf32>
    %145 = vector.extract_strided_slice %144 {offsets = [0, 255], sizes = [192, 1], strides = [1, 1]} : vector<192x256xf32> to vector<192x1xf32>
    %146 = vector.extract_strided_slice %144 {offsets = [0, 0], sizes = [192, 255], strides = [1, 1]} : vector<192x256xf32> to vector<192x255xf32>
    %147 = tpu.concatenate %145, %146 in 1 : vector<192x1xf32>, vector<192x255xf32> -> vector<192x256xf32>
    %cst_31 = arith.constant 0.000000e+00 : f32
    %148 = vector.shape_cast %13 : vector<1x256xi1> to vector<1x256xi1>
    %149 = vector.broadcast %148 : vector<1x256xi1> to vector<192x256xi1>
    %150 = vector.broadcast %cst_31 : f32 to vector<192x256xf32>
    %151 = arith.select %149, %147, %150 : vector<192x256xi1>, vector<192x256xf32>
    %152 = vector.extract_strided_slice %144 {offsets = [0, 1], sizes = [192, 255], strides = [1, 1]} : vector<192x256xf32> to vector<192x255xf32>
    %153 = vector.extract_strided_slice %144 {offsets = [0, 0], sizes = [192, 1], strides = [1, 1]} : vector<192x256xf32> to vector<192x1xf32>
    %154 = tpu.concatenate %152, %153 in 1 : vector<192x255xf32>, vector<192x1xf32> -> vector<192x256xf32>
    %cst_32 = arith.constant 0.000000e+00 : f32
    %155 = vector.shape_cast %15 : vector<1x256xi1> to vector<1x256xi1>
    %156 = vector.broadcast %155 : vector<1x256xi1> to vector<192x256xi1>
    %157 = vector.broadcast %cst_32 : f32 to vector<192x256xf32>
    %158 = arith.select %156, %154, %157 : vector<192x256xi1>, vector<192x256xf32>
    %159 = tpu.concatenate %151, %144, %158 in 0 : vector<192x256xf32>, vector<192x256xf32>, vector<192x256xf32> -> vector<576x256xf32>
    %c0_33 = arith.constant 0 : index
    %c0_34 = arith.constant 0 : index
    %160 = vector.load %arg7[%c0_33, %c0_34] : memref<32x576xbf16, #tpu.memory_space<vmem>>, vector<32x576xbf16>
    %161 = arith.truncf %159 : vector<576x256xf32> to vector<576x256xbf16>
    %cst_35 = arith.constant dense<0.000000e+00> : vector<32x256xf32>
    %162 = tpu.matmul %160, %161, %cst_35 {dimension_numbers = #tpu.dot_dimension_numbers<[1], [0], [0], [1], [0, 0, 1, 1], [], []>} : vector<32x576xbf16>, vector<576x256xbf16>, vector<32x256xf32> -> vector<32x256xf32>
    %c0_36 = arith.constant 0 : index
    %c0_37 = arith.constant 0 : index
    %163 = vector.load %arg8[%c0_36, %c0_37] : memref<32x1xf32, #tpu.memory_space<vmem>>, vector<32x1xf32>
    %164 = vector.broadcast %163 : vector<32x1xf32> to vector<32x256xf32>
    %165 = arith.addf %162, %164 : vector<32x256xf32>
    %cst_38 = arith.constant 0.000000e+00 : f32
    %166 = vector.broadcast %cst_38 : f32 to vector<32x256xf32>
    %167 = arith.cmpf oge, %165, %166 : vector<32x256xf32>
    %cst_39 = arith.constant 0.00999999977 : f32
    %168 = vector.broadcast %cst_39 : f32 to vector<32x256xf32>
    %169 = arith.mulf %168, %165 : vector<32x256xf32>
    %170 = arith.select %167, %165, %169 : vector<32x256xi1>, vector<32x256xf32>
    %171 = vector.extract_strided_slice %170 {offsets = [0, 240], sizes = [32, 16], strides = [1, 1]} : vector<32x256xf32> to vector<32x16xf32>
    %172 = vector.extract_strided_slice %170 {offsets = [0, 0], sizes = [32, 240], strides = [1, 1]} : vector<32x256xf32> to vector<32x240xf32>
    %173 = tpu.concatenate %171, %172 in 1 : vector<32x16xf32>, vector<32x240xf32> -> vector<32x256xf32>
    %cst_40 = arith.constant 0.000000e+00 : f32
    %174 = vector.shape_cast %5 : vector<1x256xi1> to vector<1x256xi1>
    %175 = vector.broadcast %174 : vector<1x256xi1> to vector<32x256xi1>
    %176 = vector.broadcast %cst_40 : f32 to vector<32x256xf32>
    %177 = arith.select %175, %173, %176 : vector<32x256xi1>, vector<32x256xf32>
    %178 = vector.extract_strided_slice %170 {offsets = [0, 16], sizes = [32, 240], strides = [1, 1]} : vector<32x256xf32> to vector<32x240xf32>
    %179 = vector.extract_strided_slice %170 {offsets = [0, 0], sizes = [32, 16], strides = [1, 1]} : vector<32x256xf32> to vector<32x16xf32>
    %180 = tpu.concatenate %178, %179 in 1 : vector<32x240xf32>, vector<32x16xf32> -> vector<32x256xf32>
    %cst_41 = arith.constant 0.000000e+00 : f32
    %181 = vector.shape_cast %7 : vector<1x256xi1> to vector<1x256xi1>
    %182 = vector.broadcast %181 : vector<1x256xi1> to vector<32x256xi1>
    %183 = vector.broadcast %cst_41 : f32 to vector<32x256xf32>
    %184 = arith.select %182, %180, %183 : vector<32x256xi1>, vector<32x256xf32>
    %185 = tpu.concatenate %177, %170, %184 in 0 : vector<32x256xf32>, vector<32x256xf32>, vector<32x256xf32> -> vector<96x256xf32>
    %186 = vector.extract_strided_slice %185 {offsets = [0, 255], sizes = [96, 1], strides = [1, 1]} : vector<96x256xf32> to vector<96x1xf32>
    %187 = vector.extract_strided_slice %185 {offsets = [0, 0], sizes = [96, 255], strides = [1, 1]} : vector<96x256xf32> to vector<96x255xf32>
    %188 = tpu.concatenate %186, %187 in 1 : vector<96x1xf32>, vector<96x255xf32> -> vector<96x256xf32>
    %cst_42 = arith.constant 0.000000e+00 : f32
    %189 = vector.shape_cast %13 : vector<1x256xi1> to vector<1x256xi1>
    %190 = vector.broadcast %189 : vector<1x256xi1> to vector<96x256xi1>
    %191 = vector.broadcast %cst_42 : f32 to vector<96x256xf32>
    %192 = arith.select %190, %188, %191 : vector<96x256xi1>, vector<96x256xf32>
    %193 = vector.extract_strided_slice %185 {offsets = [0, 1], sizes = [96, 255], strides = [1, 1]} : vector<96x256xf32> to vector<96x255xf32>
    %194 = vector.extract_strided_slice %185 {offsets = [0, 0], sizes = [96, 1], strides = [1, 1]} : vector<96x256xf32> to vector<96x1xf32>
    %195 = tpu.concatenate %193, %194 in 1 : vector<96x255xf32>, vector<96x1xf32> -> vector<96x256xf32>
    %cst_43 = arith.constant 0.000000e+00 : f32
    %196 = vector.shape_cast %15 : vector<1x256xi1> to vector<1x256xi1>
    %197 = vector.broadcast %196 : vector<1x256xi1> to vector<96x256xi1>
    %198 = vector.broadcast %cst_43 : f32 to vector<96x256xf32>
    %199 = arith.select %197, %195, %198 : vector<96x256xi1>, vector<96x256xf32>
    %200 = tpu.concatenate %192, %185, %199 in 0 : vector<96x256xf32>, vector<96x256xf32>, vector<96x256xf32> -> vector<288x256xf32>
    %c0_44 = arith.constant 0 : index
    %c0_45 = arith.constant 0 : index
    %201 = vector.load %arg9[%c0_44, %c0_45] : memref<12x288xbf16, #tpu.memory_space<vmem>>, vector<12x288xbf16>
    %202 = arith.truncf %200 : vector<288x256xf32> to vector<288x256xbf16>
    %cst_46 = arith.constant dense<0.000000e+00> : vector<12x256xf32>
    %203 = tpu.matmul %201, %202, %cst_46 {dimension_numbers = #tpu.dot_dimension_numbers<[1], [0], [0], [1], [0, 0, 1, 1], [], []>} : vector<12x288xbf16>, vector<288x256xbf16>, vector<12x256xf32> -> vector<12x256xf32>
    %c0_47 = arith.constant 0 : index
    %c0_48 = arith.constant 0 : index
    %204 = vector.load %arg10[%c0_47, %c0_48] : memref<12x1xf32, #tpu.memory_space<vmem>>, vector<12x1xf32>
    %205 = vector.broadcast %204 : vector<12x1xf32> to vector<12x256xf32>
    %206 = arith.addf %203, %205 : vector<12x256xf32>
    %207 = arith.negf %206 : vector<12x256xf32>
    %208 = math.exp %207 : vector<12x256xf32>
    %cst_49 = arith.constant 1.000000e+00 : f32
    %209 = vector.broadcast %cst_49 : f32 to vector<12x256xf32>
    %210 = arith.addf %209, %208 : vector<12x256xf32>
    %211 = arith.divf %209, %210 : vector<12x256xf32>
    %c0_50 = arith.constant 0 : index
    %c0_51 = arith.constant 0 : index
    %c0_52 = arith.constant 0 : index
    %212 = vector.load %arg11[%c0_50, %c0_51, %c0_52] : memref<1x12x256xf32, #tpu.memory_space<vmem>>, vector<1x12x256xf32>
    %213 = vector.shape_cast %212 : vector<1x12x256xf32> to vector<12x256xf32>
    %214 = vector.shape_cast %211 : vector<12x256xf32> to vector<1x12x256xf32>
    tpu.vector_store %arg11[%c0_50, %c0_51, %c0_52], %214 {strides = array<i32>} : memref<1x12x256xf32, #tpu.memory_space<vmem>>, vector<1x12x256xf32>,
    return
  }
  func.func @transform_0(%arg0: i32) -> (i32, i32, i32) {
    %c0_i32 = arith.constant 0 : i32
    %c0_i32_0 = arith.constant 0 : i32
    %c0_i32_1 = arith.constant 0 : i32
    return %arg0, %c0_i32, %c0_i32_0 : i32, i32, i32
  }
  func.func @transform_1(%arg0: i32) -> (i32, i32) {
    %c0_i32 = arith.constant 0 : i32
    %c0_i32_0 = arith.constant 0 : i32
    %c0_i32_1 = arith.constant 0 : i32
    return %c0_i32, %c0_i32_0 : i32, i32
  }
  func.func @transform_2(%arg0: i32) -> (i32, i32) {
    %c0_i32 = arith.constant 0 : i32
    %c0_i32_0 = arith.constant 0 : i32
    %c0_i32_1 = arith.constant 0 : i32
    return %c0_i32, %c0_i32_0 : i32, i32
  }
  func.func @transform_3(%arg0: i32) -> (i32, i32) {
    %c0_i32 = arith.constant 0 : i32
    %c0_i32_0 = arith.constant 0 : i32
    %c0_i32_1 = arith.constant 0 : i32
    return %c0_i32, %c0_i32_0 : i32, i32
  }
  func.func @transform_4(%arg0: i32) -> (i32, i32) {
    %c0_i32 = arith.constant 0 : i32
    %c0_i32_0 = arith.constant 0 : i32
    %c0_i32_1 = arith.constant 0 : i32
    return %c0_i32, %c0_i32_0 : i32, i32
  }
  func.func @transform_5(%arg0: i32) -> (i32, i32) {
    %c0_i32 = arith.constant 0 : i32
    %c0_i32_0 = arith.constant 0 : i32
    %c0_i32_1 = arith.constant 0 : i32
    return %c0_i32, %c0_i32_0 : i32, i32
  }
  func.func @transform_6(%arg0: i32) -> (i32, i32) {
    %c0_i32 = arith.constant 0 : i32
    %c0_i32_0 = arith.constant 0 : i32
    %c0_i32_1 = arith.constant 0 : i32
    return %c0_i32, %c0_i32_0 : i32, i32
  }
  func.func @transform_7(%arg0: i32) -> (i32, i32) {
    %c0_i32 = arith.constant 0 : i32
    %c0_i32_0 = arith.constant 0 : i32
    %c0_i32_1 = arith.constant 0 : i32
    return %c0_i32, %c0_i32_0 : i32, i32
  }
  func.func @transform_8(%arg0: i32) -> (i32, i32) {
    %c0_i32 = arith.constant 0 : i32
    %c0_i32_0 = arith.constant 0 : i32
    %c0_i32_1 = arith.constant 0 : i32
    return %c0_i32, %c0_i32_0 : i32, i32
  }
  func.func @transform_9(%arg0: i32) -> (i32, i32) {
    %c0_i32 = arith.constant 0 : i32
    %c0_i32_0 = arith.constant 0 : i32
    %c0_i32_1 = arith.constant 0 : i32
    return %c0_i32, %c0_i32_0 : i32, i32
  }
  func.func @transform_10(%arg0: i32) -> (i32, i32, i32) {
    %c0_i32 = arith.constant 0 : i32
    %c0_i32_0 = arith.constant 0 : i32
    %c0_i32_1 = arith.constant 0 : i32
    return %arg0, %c0_i32, %c0_i32_0 : i32, i32, i32
  }
}

</mosaic_0001>

<bundles_post_ra>
// kernel: _net_forward_impl.1
= control target key start
LH: loop header
LB: loop body
LE: loop exit
PB: predicated region body
PF: predicated region fallthrough
CT: control target
= control target key end

     0   :  { %s5613_s13 = smov 0   ;;  %s8026_s0 = inlined_call_operand.vmem [shape: f32[2,8,256], index: 0, kind: input, shape index: {}]   ;;  %s8027_s1 = inlined_call_operand.vmem [shape: s32[1,256], index: 1, kind: input, shape index: {}]   ;;  %s8028_s2 = inlined_call_operand.vmem [shape: bf16[64,200], index: 2, kind: input, shape index: {}]   ;;  %s8029_s3 = inlined_call_operand.vmem [shape: f32[64,1], index: 3, kind: input, shape index: {}]   ;;  %s8030_s4 = inlined_call_operand.vmem [shape: bf16[64,576], index: 4, kind: input, shape index: {}]   ;;  %s8031_s5 = inlined_call_operand.vmem [shape: f32[64,1], index: 5, kind: input, shape index: {}]   ;;  %s8032_s6 = inlined_call_operand.vmem [shape: bf16[32,576], index: 6, kind: input, shape index: {}]   ;;  %s8033_s7 = inlined_call_operand.vmem [shape: f32[32,1], index: 7, kind: input, shape index: {}]   ;;  %s8034_s8 = inlined_call_operand.vmem [shape: bf16[12,288], index: 8, kind: input, shape index: {}]   ;;  %s8035_s9 = inlined_call_operand.vmem [shape: f32[12,1], index: 9, kind: input, shape index: {}]   ;;  %s8036_s10 = inlined_call_operand.vmem [shape: f32[2,12,256], index: 10, kind: output, shape index: {}]  }
   0x1 LB: > { %s3970_s14 = sadd.s32 4294967295, %s5546_s13   ;;  %p3974_p0 = scmp.ge.s32.totalorder %s5546_s13, 1  ;;  %s5546_s13 = sphi %s5613_s13, %s20_s13  }
   0x2   : > { %p312_p1 = scmp.lt.s32.totalorder %s5546_s13, 3 }
   0x4   : > { %p313_p2 = pnand %p3974_p0, %p312_p1 }
   0x6   : > { %316 = sbr.rel (%p313_p2) target bundleno = 2164 (0x874), region = 60 }
   0xb   : > { %p350_p3 = scmp.lt.s32.totalorder %s3970_s14, 1  ;;  %s5548_s19 = smov 96   ;;  %v361_v4 = vlaneseq  ;;  %v8042_v7 = vmov 0   ;;  %vm433_vm0 = vcmask 785408   ;;  %vm8037_vm1 = vcmask 261120   ;;  %v762_v49 = vld [vmem:[%s8029_s3 + $0x38] sm:$0xff] }
   0xc   : > { %s5549_s20 = smov 32   ;;  %s5550_s21 = smov 16   ;;  %4665 = vset.pattern.permute.xlu1 %v8042_v7  ;;  %4664 = vset.pattern.permute.xlu0 %v8042_v7  ;;  %vm8107_vm3 = vcmask 130048   ;;  %vm8039_vm5 = vcmask 916480   ;;  %v5468_v48 = vld [vmem:[%s8028_s2 + $0x4] ss:$8 sps:$4 sm:$0xff]  }
   0xd   : > { %s8466_s14 = smov (!%p350_p3, %s3970_s14), 1  ;;  %s5551_s22 = smov 112   ;;  %v5642_v5 = vand.u32 127, %v361_v4  ;;  %vm839_vm8 = vcmask 588800   ;;  %v761_v50 = vld [vmem:[%s8029_s3 + $0x30] sm:$0xff]  ;;  %v759_v51 = vld [vmem:[%s8029_s3 + $0x20] sm:$0xff] }
   0xe   : > { %s4524_s15 = sshll.u32 %s8466_s14, 4  ;;  %s5553_s23 = smov 127   ;;  %4054 = vmatprep.mubr.msk.bf16.mxu0 %vm839_vm8, %v5468_v48  ;;  %v760_v52 = vld [vmem:[%s8029_s3 + $0x28] sm:$0xff]  ;;  %v757_v53 = vld [vmem:[%s8029_s3 + $0x10] sm:$0xff]  ;;  %v758_v54 = vld [vmem:[%s8029_s3 + $0x18] sm:$0xff]  ;;  %v501_v58 = vshrl.u32 %v361_v4, 7 }
   0xf   : > { %s354_s18 = scalar_lea.vmem %s8026_s0, %s4524_s15  ;;  %8108 = vst [vmem:[#allocation2_spill] sm:$0xff] %v5642_v5  ;;  %v5645_v6 = vadd.s32 128, %v5642_v5  ;;  %vm365_vm2 = vcmp.ge.s32.totalorder %v5642_v5, 32  ;;  %vm8041_vm7 = vcmp.ge.s32.totalorder %v5642_v5, 16  ;;  %s5554_s24 = smov 1   ;;  %v755_v55 = vld [vmem:[%s8029_s3] sm:$0xff] }
  0x10   : > { %v5627_v0 = vld [vmem:[%s354_s18] sm:$0xff]  ;;  %v5629_v1 = vld [vmem:[%s354_s18 + $0x8] sm:$0xff]  ;;  %s5555_s25 = smov 2   ;;  %s5556_s26 = smov 126   ;;  %v5754_v59 = vsub.s32 1, %v501_v58  ;;  %v5757_v61 = vsub.s32 0, %v501_v58 }
  0x11   : > { %v5633_v2 = vpack.i.bf16 %v5629_v1, %v5627_v0  ;;  %v4544_v3 = vpack.i.bf16 %v5627_v0, %v5629_v1  ;;  %8109 = vst [vmem:[#allocation3_spill] sm:$0xff] %v5645_v6  ;;  %vm372_vm4 = vcmp.lt.s32.totalorder %v5645_v6, 224  ;;  %vm8038_vm6 = vcmp.lt.s32.totalorder %v5645_v6, 240  ;;  %v756_v56 = vld [vmem:[%s8029_s3 + $0x8] sm:$0xff]  ;;  %v5750_v57 = vld [vmem:[%s8027_s1] sm:$0x3] }
  0x12   : > { %vm375_vm9 = vcmp.lt.s32.totalorder %v5750_v57, 15  ;;  %vm374_vm10 = vcmp.ge.s32.totalorder %v5750_v57, 1  ;;  %vm607_vm11 = vcmask 1039360   ;;  %vm5557_vm15 = vmmov 1  }
  0x13   : > { %4555 = vrot.lane.b32.xlu1 %v5633_v2, %s5548_s19  ;;  %4545 = vrot.lane.b32.xlu0 %v4544_v3, %s5549_s20  ;;  %v633_v60 = vsel %vm375_vm9, 1, %v8042_v7  ;;  %vm8040_vm9 = vcmask 7168  }
  0x14   : > { %v641_v62 = vrot.slane %v633_v60, %v5754_v59  ;;  %v637_v63 = vrot.slane %v633_v60, %v5757_v61 }
  0x16   : > { %vm5762_vm12 = vcmp.eq.s32.totalorder %v641_v62, 1  ;;  %vm5766_vm13 = vcmp.eq.s32.totalorder %v637_v63, 1 }
  0x17   : > { %4560 = vrot.lane.b32.xlu1 %v4544_v3, %s5550_s21  ;;  %4550 = vrot.lane.b32.xlu0 %v5633_v2, %s5551_s22  ;;  %vm3987_vm14 = vmpackc.low %vm5762_vm12, %vm372_vm4  ;;  %v8133_v3 = vmov 0 }
  0x85   : > { %v4556_v8 = vpop.permute.xlu1 %4555  ;;  %v4546_v9 = vpop.permute.xlu0 %4545 }
  0x86   : > { %v4558_v10 = vunpack.i.h.bf16 %v4556_v8  ;;  %v4557_v11 = vunpack.i.l.bf16 %v4556_v8  ;;  %v4548_v12 = vunpack.i.h.bf16 %v4546_v9  ;;  %v4547_v13 = vunpack.i.l.bf16 %v4546_v9 }
  0x88   : > { %v5650_v14 = vsel %vm433_vm0, %v4558_v10, %v4557_v11  ;;  %v5653_v15 = vsel %vm8037_vm1, %v4548_v12, %v4547_v13  ;;  %v5656_v16 = vsel %vm8037_vm1, %v4547_v13, %v4548_v12  ;;  %v5659_v17 = vsel %vm433_vm0, %v4557_v11, %v4558_v10  ;;  %vm3990_vm0 = vmpackc.low %vm5766_vm13, %vm5557_vm15 }
  0x89   : > { %v4561_v18 = vpop.permute.xlu1 %4560  ;;  %v4551_v19 = vpop.permute.xlu0 %4550  ;;  %v395_v20 = vsel %vm365_vm2, %v5656_v16, 0.0  ;;  %v444_v26 = vsel %vm372_vm4, %v5650_v14, 0.0  ;;  %v566_v11 = vsel %vm374_vm10, 1, %v8042_v7  ;;  %vm3993_vm10 = vmpackc.low %vm8038_vm6, %vm5557_vm15  ;;  %vm373_vm4 = vcmp.ge.s32.totalorder %v5750_v57, 2 }
  0x8a   : > { %v4563_v21 = vunpack.i.h.bf16 %v4561_v18  ;;  %v4562_v22 = vunpack.i.l.bf16 %v4561_v18  ;;  %v4553_v23 = vunpack.i.h.bf16 %v4551_v19  ;;  %v4552_v24 = vunpack.i.l.bf16 %v4551_v19  ;;  %vm3996_vm15 = vmpackc.low %vm8041_vm7, %vm365_vm2 }
  0x8b   : > { %v4564_v25 = vpack.i.bf16 %v5653_v15, %v395_v20  ;;  %v4589_v39 = vpack.i.bf16 %v5659_v17, %v444_v26  ;;  %v4594_v40 = vpack.i.bf16 %v395_v20, %v5653_v15  ;;  %v4619_v45 = vpack.i.bf16 %v444_v26, %v5659_v17 }
  0x8c   : > { %v5670_v27 = vsel %vm8039_vm5, %v4552_v24, %v4553_v23  ;;  %v5673_v28 = vsel %vm8039_vm5, %v4553_v23, %v4552_v24  ;;  %v5676_v29 = vsel %vm8107_vm3, %v4562_v22, %v4563_v21  ;;  %v5686_v33 = vsel %vm8107_vm3, %v4563_v21, %v4562_v22 }
  0x8d   : > { %4565 = vrot.lane.b32.xlu0 %v4564_v25, %s5553_s23  ;;  %v428_v30 = vsel %vm8038_vm6, %v5673_v28, 0.0  ;;  %v4569_v31 = vpack.i.bf16 %v5659_v17, %v5670_v27  ;;  %v4579_v34 = vpack.i.bf16 %v5629_v1, %v5686_v33  ;;  %v411_v35 = vsel %vm8041_vm7, %v5676_v29, 0.0 }
  0x8e   : > { %v4574_v32 = vpack.i.bf16 %v444_v26, %v428_v30  ;;  %v4584_v36 = vpack.i.bf16 %v5627_v0, %v411_v35  ;;  %v740_v37 = vpack.c.bf16 %v5686_v33, %v5653_v15  ;;  %v3997_v38 = vpack.c.bf16 %v5676_v29, %v5656_v16 }
  0x8f   : > { %v4604_v41 = vpack.i.bf16 %v428_v30, %v5629_v1  ;;  %v4599_v42 = vpack.i.bf16 %v5670_v27, %v5627_v0  ;;  %v4609_v43 = vpack.i.bf16 %v5686_v33, %v5653_v15  ;;  %v4614_v44 = vpack.i.bf16 %v411_v35, %v395_v20 }
  0x90   : > { %4575 = vrot.lane.b32.xlu1 %v4574_v32, %s5554_s24  ;;  %v4629_v46 = vpack.i.bf16 %v428_v30, %v5670_v27  ;;  %v4639_v47 = vpack.i.bf16 %v5686_v33, %v411_v35  ;;  %v570_v26 = vrot.slane %v566_v11, %v5757_v61  ;;  %v499_v35 = vsel %vm373_vm4, 1, %v8042_v7 }
  0x91   : > { %4570 = vrot.lane.b32.xlu0 %v4569_v31, %s5554_s24  ;;  %vm478_vm4 = vcmask 15360   ;;  %v503_v16 = vrot.slane %v499_v35, %v5757_v61 }
  0x93   : > { %vm5851_vm5 = vcmp.eq.s32.totalorder %v503_v16, 1 }
  0x94   : > { %4580 = vrot.lane.b32.xlu1 %v4579_v34, %s5554_s24  ;;  %v741_v34 = vpack.c.bf16 %v5670_v27, %v5627_v0  ;;  %v507_v27 = vrot.slane %v499_v35, %v5754_v59 }
  0x95   : > { %4585 = vrot.lane.b32.xlu0 %v4584_v36, %s5554_s24 }
  0x96   : > { %vm5832_vm1 = vcmp.eq.s32.totalorder %v507_v27, 1 }
  0x97   : > { %vm4017_vm7 = vmpackc.low %vm5832_vm1, %vm5832_vm1 }
  0x98   : > { %4590 = vrot.lane.b32.xlu1 %v4589_v39, %s5555_s25 }
  0x99   : > { %4595 = vrot.lane.b32.xlu0 %v4594_v40, %s5554_s24 }
  0x9c   : > { %4605 = vrot.lane.b32.xlu1 %v4604_v41, %s5555_s25 }
  0x9d   : > { %4600 = vrot.lane.b32.xlu0 %v4599_v42, %s5555_s25 }
  0xa0   : > { %4610 = vrot.lane.b32.xlu1 %v4609_v43, %s5555_s25 }
  0xa1   : > { %4615 = vrot.lane.b32.xlu0 %v4614_v44, %s5555_s25  ;;  %s4525_s25 = sshll.u32 %s8466_s14, 5 }
  0xa2   : > { %s359_s28 = scalar_lea.vmem %s8036_s10, %s4525_s25 }
  0xa4   : > { %4620 = vrot.lane.b32.xlu1 %v4619_v45, %s5556_s26 }
  0xa5   : > { %4625 = vrot.lane.b32.xlu0 %v5633_v2, %s5556_s26 }
  0xa8   : > { %4630 = vrot.lane.b32.xlu1 %v4629_v46, %s5556_s26 }
  0xa9   : > { %4635 = vrot.lane.b32.xlu0 %v4564_v25, %s5556_s26  ;;  %v574_v25 = vrot.slane %v566_v11, %v5754_v59 }
  0xac   : > { %4640 = vrot.lane.b32.xlu1 %v4639_v47, %s5556_s26 }
  0xad   : > { %4645 = vrot.lane.b32.xlu0 %v4629_v46, %s5553_s23 }
  0xb0   : > { %4650 = vrot.lane.b32.xlu1 %v4619_v45, %s5553_s23 }
  0xb1   : > { %4655 = vrot.lane.b32.xlu0 %v4639_v47, %s5553_s23 }
  0xb4   : > { %4660 = vrot.lane.b32.xlu1 %v5633_v2, %s5553_s23 }
  0xb5   : > { %795 = vperm.xlu0 %4664, %v761_v50  }
  0xb8   : > { %800 = vperm.xlu1 %4665, %v762_v49  }
  0xb9   : > { %790 = vperm.xlu0 %4664, %v760_v52  }
  0xbc   : > { %785 = vperm.xlu1 %4665, %v759_v51  }
  0xbd   : > { %780 = vperm.xlu0 %4664, %v758_v54  }
  0xc0   : > { %775 = vperm.xlu1 %4665, %v757_v53  }
  0xc1   : > { %770 = vperm.xlu0 %4664, %v756_v56  }
  0xc4   : > { %765 = vperm.xlu1 %4665, %v755_v55  }
  0xff   : > { %v4566_v2 = vpop.permute.xlu0 %4565 }
 0x100   : > { %v4568_v4 = vunpack.i.h.bf16 %v4566_v2  ;;  %v4567_v8 = vunpack.i.l.bf16 %v4566_v2 }
 0x102   : > { %v4576_v10 = vpop.permute.xlu1 %4575  ;;  %v628_v12 = vsel %vm607_vm11, %v4568_v4, %v4567_v8  ;;  %v608_v13 = vsel %vm607_vm11, %v4567_v8, %v4568_v4 }
 0x103   : > { %v4578_v18 = vunpack.i.h.bf16 %v4576_v10  ;;  %v4577_v19 = vunpack.i.l.bf16 %v4576_v10  ;;  %v4571_v20 = vpop.permute.xlu0 %4570  ;;  %v3988_v21 = vpack.c.bf16 %v628_v12, %v5650_v14  ;;  %v3991_v22 = vpack.c.bf16 %v608_v13, %v5659_v17 }
 0x104   : > { %v4573_v23 = vunpack.i.h.bf16 %v4571_v20  ;;  %v4572_v24 = vunpack.i.l.bf16 %v4571_v20  ;;  %v3994_v14 = vpack.c.bf16 %v5673_v28, %v5629_v1 }
 0x105   : > { %3989 = vmatprep.subr.msk.bf16.mxu0 %vm3987_vm14, %v3988_v21  ;;  %vm5793_vm14 = vcmp.eq.s32.totalorder %v574_v25, 1 }
 0x106   : > { %3992 = vmatpush1.bf16.msk.msra.mxu0 %vm3990_vm0, %v3991_v22  ;;  %v4581_v30 = vpop.permute.xlu1 %4580  ;;  %v550_v17 = vsel %vm8040_vm9, %v4573_v23, %v4578_v18  ;;  %v549_v31 = vsel %vm8040_vm9, %v4572_v24, %v4577_v19  ;;  %vm5808_vm0 = vmpackc.low %vm5793_vm14, %vm5793_vm14  ;;  %v564_v45 = vsel %vm8040_vm9, %v4577_v19, %v4572_v24 }
 0x107   : > { %v4586_v32 = vpop.permute.xlu0 %4585  ;;  %3995 = vmatprep.subr.msk.bf16.mxu0 %vm3993_vm10, %v3994_v14  ;;  %v4583_v36 = vunpack.i.h.bf16 %v4581_v30  ;;  %v4582_v39 = vunpack.i.l.bf16 %v4581_v30  ;;  %v4000_v0 = vpack.c.bf16 %v550_v17, %v549_v31  ;;  %vm5812_vm10 = vcmp.eq.s32.totalorder %v570_v26, 1  ;;  %vm4011_vm6 = vmpackc.low %vm5793_vm14, %vm5832_vm1 }
 0x108   : > { %v4588_v40 = vunpack.i.h.bf16 %v4586_v32  ;;  %v4587_v41 = vunpack.i.l.bf16 %v4586_v32  ;;  %vm5826_vm2 = vmpackc.low %vm5812_vm10, %vm5812_vm10 }
 0x10a   : > { %862 = vmatpush1.bf16.msra.mxu0 %v741_v34  ;;  %v4591_v28 = vpop.permute.xlu1 %4590  ;;  %v548_v15 = vsel %vm8040_vm9, %v4588_v40, %v4583_v36  ;;  %v547_v33 = vsel %vm8040_vm9, %v4587_v41, %v4582_v39  ;;  %v563_v29 = vsel %vm8040_vm9, %v4583_v36, %v4588_v40 }
 0x10b   : > { %v4596_v42 = vpop.permute.xlu0 %4595  ;;  %863 = vmatprep.subr.bf16.mxu0 %v740_v37  ;;  %v565_v37 = vsel %vm8040_vm9, %v4578_v18, %v4573_v23  ;;  %v4593_v46 = vunpack.i.h.bf16 %v4591_v28  ;;  %v4592_v47 = vunpack.i.l.bf16 %v4591_v28  ;;  %v4006_v53 = vpack.c.bf16 %v548_v15, %v547_v33  ;;  %v5466_v28 = vld [vmem:[%s8028_s2] ss:$8 sps:$4 sm:$0xff]  }
 0x10c   : > { %v4598_v48 = vunpack.i.h.bf16 %v4596_v42  ;;  %v4597_v49 = vunpack.i.l.bf16 %v4596_v42  ;;  %v4003_v55 = vpack.c.bf16 %v565_v37, %v564_v45 }
 0x10d   : > { %v483_v63 = vsel %vm478_vm4, %v4593_v46, %v4592_v47  ;;  %v498_v10 = vsel %vm478_vm4, %v4592_v47, %v4593_v46 }
 0x10e   : > { %3998 = vmatpush1.bf16.msk.msra.mxu0 %vm3996_vm15, %v3997_v38  ;;  %v4606_v50 = vpop.permute.xlu1 %4605  ;;  %v562_v38 = vsel %vm8040_vm9, %v4582_v39, %v4587_v41  ;;  %vm376_vm15 = vcmp.lt.s32.totalorder %v5750_v57, 14  ;;  %v546_v2 = vsel %vm8040_vm9, %v4598_v48, %v4597_v49  ;;  %v561_v13 = vsel %vm8040_vm9, %v4597_v49, %v4598_v48 }
 0x10f   : > { %v4601_v52 = vpop.permute.xlu0 %4600  ;;  %4001 = vmatprep.subr.msk.bf16.mxu0 %vm5808_vm0, %v4000_v0  ;;  %v4608_v56 = vunpack.i.h.bf16 %v4606_v50  ;;  %v4607_v58 = vunpack.i.l.bf16 %v4606_v50  ;;  %v4009_v11 = vpack.c.bf16 %v563_v29, %v562_v38  ;;  %v700_v12 = vsel %vm376_vm15, 1, %v8042_v7  ;;  %vm4014_vm15 = vmpackc.low %vm5812_vm10, %vm5851_vm5 }
 0x110   : > { %v4603_v60 = vunpack.i.h.bf16 %v4601_v52  ;;  %v4602_v62 = vunpack.i.l.bf16 %v4601_v52  ;;  %v4012_v20 = vpack.c.bf16 %v546_v2, %v483_v63  ;;  %v708_v17 = vrot.slane %v700_v12, %v5754_v59 }
 0x111   : > { %v704_v31 = vrot.slane %v700_v12, %v5757_v61  ;;  %vm674_vm9 = vcmask 1031168   ;;  %v4015_v32 = vpack.c.bf16 %v561_v13, %v498_v10 }
 0x112   : > { %4004 = vmatpush1.bf16.msk.msra.mxu0 %vm5826_vm2, %v4003_v55  ;;  %v4611_v4 = vpop.permute.xlu1 %4610  ;;  %v482_v18 = vsel %vm478_vm4, %v4603_v60, %v4608_v56  ;;  %v481_v19 = vsel %vm478_vm4, %v4602_v62, %v4607_v58  ;;  %v497_v34 = vsel %vm478_vm4, %v4608_v56, %v4603_v60  ;;  %v496_v35 = vsel %vm478_vm4, %v4607_v58, %v4602_v62 }
 0x113   : > { %v4616_v8 = vpop.permute.xlu0 %4615  ;;  %4007 = vmatprep.subr.msk.bf16.mxu0 %vm5808_vm0, %v4006_v53  ;;  %v4613_v21 = vunpack.i.h.bf16 %v4611_v4  ;;  %v4612_v22 = vunpack.i.l.bf16 %v4611_v4  ;;  %v4018_v36 = vpack.c.bf16 %v482_v18, %v481_v19  ;;  %vm5888_vm14 = vcmp.eq.s32.totalorder %v708_v17, 1 }
 0x114   : > { %v4618_v23 = vunpack.i.h.bf16 %v4616_v8  ;;  %v4617_v24 = vunpack.i.l.bf16 %v4616_v8  ;;  %vm5893_vm10 = vcmp.eq.s32.totalorder %v704_v31, 1  ;;  %v4021_v0 = vpack.c.bf16 %v497_v34, %v496_v35  ;;  %vm4030_vm1 = vmpackc.low %vm5888_vm14, %vm5888_vm14 }
 0x116   : > { %4010 = vmatpush1.bf16.msk.msra.mxu0 %vm5826_vm2, %v4009_v11  ;;  %v4621_v25 = vpop.permute.xlu1 %4620  ;;  %v480_v39 = vsel %vm478_vm4, %v4618_v23, %v4613_v21  ;;  %v479_v40 = vsel %vm478_vm4, %v4617_v24, %v4612_v22  ;;  %v495_v42 = vsel %vm478_vm4, %v4613_v21, %v4618_v23  ;;  %v494_v27 = vsel %vm478_vm4, %v4612_v22, %v4617_v24 }
 0x117   : > { %v4623_v14 = vunpack.i.h.bf16 %v4621_v25  ;;  %v4622_v26 = vunpack.i.l.bf16 %v4621_v25  ;;  %v4626_v30 = vpop.permute.xlu0 %4625  ;;  %4013 = vmatprep.subr.msk.bf16.mxu0 %vm4011_vm6, %v4012_v20  ;;  %vm4020_vm6 = vmpackc.low %vm5851_vm5, %vm5851_vm5  ;;  %v4024_v37 = vpack.c.bf16 %v480_v39, %v479_v40  ;;  %v4027_v50 = vpack.c.bf16 %v495_v42, %v494_v27  ;;  %v5469_v42 = vld [vmem:[%s8028_s2 + $0x14] ss:$8 sps:$4 sm:$0xff]   ;;  %v5472_v27 = vld [vmem:[%s8028_s2 + $0x24] ss:$8 sps:$4 sm:$0xff]  }
 0x118   : > { %v4628_v44 = vunpack.i.h.bf16 %v4626_v30  ;;  %v4627_v15 = vunpack.i.l.bf16 %v4626_v30  ;;  %vm852_vm4 = vcmask 1043456   ;;  %vm4033_vm5 = vmpackc.low %vm5893_vm10, %vm5893_vm10 }
 0x119   : > { %v699_v59 = vsel %vm674_vm9, %v4623_v14, %v4622_v26  ;;  %v679_v1 = vsel %vm674_vm9, %v4622_v26, %v4623_v14  ;;  %v8130_v26 = vmov 0 }
 0x11a   : > { %4016 = vmatpush1.bf16.msk.msra.mxu0 %vm4014_vm15, %v4015_v32  ;;  %v4631_v41 = vpop.permute.xlu1 %4630  ;;  %v720_v48 = vsel %vm5888_vm14, %v699_v59, 0.0  ;;  %v719_v49 = vsel %vm5893_vm10, %v679_v1, 0.0  ;;  %v697_v16 = vsel %vm674_vm9, %v4628_v44, %v4627_v15  ;;  %v677_v62 = vsel %vm674_vm9, %v4627_v15, %v4628_v44  ;;  %v5474_v44 = vld [vmem:[%s8028_s2 + $0x20] ss:$8 sps:$4 sm:$0xff]   ;;  %v5475_v15 = vld [vmem:[%s8028_s2 + $0x34] ss:$8 sps:$4 sm:$0xff]  }
 0x11b   : > { %4019 = vmatprep.subr.msk.bf16.mxu0 %vm4017_vm7, %v4018_v36  ;;  %v4636_v33 = vpop.permute.xlu0 %4635  ;;  %v4633_v45 = vunpack.i.h.bf16 %v4631_v41  ;;  %v4632_v46 = vunpack.i.l.bf16 %v4631_v41  ;;  %v754_v52 = vpack.c.bf16 %v720_v48, %v720_v48  ;;  %v753_v53 = vpack.c.bf16 %v719_v49, %v719_v49 }
 0x11c   : > { %v4638_v58 = vunpack.i.h.bf16 %v4636_v33  ;;  %v4637_v60 = vunpack.i.l.bf16 %v4636_v33  ;;  %v5477_v33 = vld [vmem:[%s8028_s2 + $0x30] ss:$8 sps:$4 sm:$0xff]  }
 0x11d   : > { %v698_v29 = vsel %vm674_vm9, %v4633_v45, %v4632_v46  ;;  %v678_v63 = vsel %vm674_vm9, %v4632_v46, %v4633_v45  ;;  %v854_v2 = vsel %vm852_vm4, %v753_v53, 0 }
 0x11e   : > { %4022 = vmatpush1.bf16.msk.msra.mxu0 %vm4020_vm6, %v4021_v0  ;;  %v4641_v47 = vpop.permute.xlu1 %4640  ;;  %v4031_v4 = vpack.c.bf16 %v698_v29, %v697_v16  ;;  %v695_v12 = vsel %vm674_vm9, %v4638_v58, %v4637_v60  ;;  %v4034_v19 = vpack.c.bf16 %v678_v63, %v677_v62  ;;  %v675_v14 = vsel %vm674_vm9, %v4637_v60, %v4638_v58  ;;  %v5471_v0 = vld [vmem:[%s8028_s2 + $0x10] ss:$8 sps:$4 sm:$0xff]  }
 0x11f   : > { %4025 = vmatprep.subr.msk.bf16.mxu0 %vm4017_vm7, %v4024_v37  ;;  %v4643_v38 = vunpack.i.h.bf16 %v4641_v47  ;;  %v4642_v55 = vunpack.i.l.bf16 %v4641_v47  ;;  %v4646_v54 = vpop.permute.xlu0 %4645  ;;  %vm5951_vm7 = vmpackc.low %vm5762_vm12, %vm5762_vm12 }
 0x120   : > { %v4648_v13 = vunpack.i.h.bf16 %v4646_v54  ;;  %v4647_v18 = vunpack.i.l.bf16 %v4646_v54  ;;  %v8131_v26 = vsel %vm5951_vm7, 4294967295, %v8130_v26  ;;  %vm5966_vm12 = vmpackc.low %vm5766_vm13, %vm5766_vm13 }
 0x121   : > { %v696_v8 = vsel %vm674_vm9, %v4643_v38, %v4642_v55  ;;  %v676_v20 = vsel %vm674_vm9, %v4642_v55, %v4643_v38  ;;  %8132 = vst [vmem:[#allocation4_spill] sm:$0xff] %v8131_v26  ;;  %v8134_v3 = vsel %vm5966_vm12, 4294967295, %v8133_v3 }
 0x122   : > { %4028 = vmatpush1.bf16.msk.msra.mxu0 %vm4020_vm6, %v4027_v50  ;;  %v4651_v56 = vpop.permute.xlu1 %4650  ;;  %v4037_v22 = vpack.c.bf16 %v696_v8, %v695_v12  ;;  %v631_v30 = vsel %vm607_vm11, %v4648_v13, %v4647_v18  ;;  %v4040_v32 = vpack.c.bf16 %v676_v20, %v675_v14  ;;  %8135 = vst [vmem:[#allocation5_spill] sm:$0xff] %v8134_v3 }
 0x123   : > { %4029 = vmatprep.subr.msk.bf16.mxu0 %vm852_vm4, %v754_v52  ;;  %v4653_v10 = vunpack.i.h.bf16 %v4651_v56  ;;  %v4652_v11 = vunpack.i.l.bf16 %v4651_v56  ;;  %v4656_v21 = vpop.permute.xlu0 %4655  ;;  %v611_v39 = vsel %vm607_vm11, %v4647_v18, %v4648_v13 }
 0x124   : > { %v4658_v17 = vunpack.i.h.bf16 %v4656_v21  ;;  %v4657_v31 = vunpack.i.l.bf16 %v4656_v21 }
 0x125   : > { %v632_v23 = vsel %vm607_vm11, %v4653_v10, %v4652_v11  ;;  %v612_v34 = vsel %vm607_vm11, %v4652_v11, %v4653_v10 }
 0x126   : > { %882 = vmatpush2.bf16.msra.mxu0 %v854_v2  ;;  %v4661_v57 = vpop.permute.xlu1 %4660  ;;  %v4043_v35 = vpack.c.bf16 %v632_v23, %v631_v30  ;;  %v629_v40 = vsel %vm607_vm11, %v4658_v17, %v4657_v31  ;;  %v4046_v41 = vpack.c.bf16 %v612_v34, %v611_v39  ;;  %v609_v9 = vsel %vm607_vm11, %v4657_v31, %v4658_v17 }
 0x127   : > { %4032 = vmatprep.subr.msk.bf16.mxu0 %vm4030_vm1, %v4031_v4  ;;  %v4663_v24 = vunpack.i.h.bf16 %v4661_v57  ;;  %v4662_v25 = vunpack.i.l.bf16 %v4661_v57 }
 0x129   : > { %v630_v36 = vsel %vm607_vm11, %v4663_v24, %v4662_v25  ;;  %v610_v59 = vsel %vm607_vm11, %v4662_v25, %v4663_v24 }
 0x12a   : > { %4035 = vmatpush2.bf16.msk.msra.mxu0 %vm4033_vm5, %v4034_v19  ;;  %v4049_v61 = vpack.c.bf16 %v630_v36, %v629_v40  ;;  %v4052_v1 = vpack.c.bf16 %v610_v59, %v609_v9 }
 0x12b   : > { %4038 = vmatprep.subr.msk.bf16.mxu0 %vm4030_vm1, %v4037_v22 }
 0x12e   : > { %4041 = vmatpush2.bf16.msk.msra.mxu0 %vm4033_vm5, %v4040_v32 }
 0x12f   : > { %4044 = vmatprep.subr.msk.bf16.mxu0 %vm5951_vm7, %v4043_v35 }
 0x130   : > { %v6008_v45 = vpop.permute.xlu0 %795 }
 0x132   : > { %4047 = vmatpush2.bf16.msk.msra.mxu0 %vm5966_vm12, %v4046_v41 }
 0x133   : > { %4050 = vmatprep.subr.msk.bf16.mxu0 %vm5951_vm7, %v4049_v61  ;;  %v6006_v37 = vpop.permute.xlu1 %800 }
 0x134   : > { %v6010_v47 = vpop.permute.xlu0 %790 }
 0x136   : > { %4053 = vmatpush2.bf16.msk.msra.mxu0 %vm5966_vm12, %v4052_v1 }
 0x137   : > { %v786_v46 = vpop.permute.xlu1 %785 }
 0x138   : > { %v781_v49 = vpop.permute.xlu0 %780 }
 0x139   : > { %892 = vmatmul.mubr.bf16.vlgmr.msra.gmra.mxu0 %v5466_v28 }
 0x13a   : > { %4055 = vmatprep.mubr.msk.bf16.mxu0 %vm839_vm8, %v5469_v42 }
 0x13b   : > { %v776_v48 = vpop.permute.xlu1 %775 }
 0x13c   : > { %v771_v29 = vpop.permute.xlu0 %770 }
 0x13f   : > { %v766_v50 = vpop.permute.xlu1 %765 }
 0x141   : > { %902 = vmatmul.mubr.bf16.gmra.mxu0 %v5471_v0 }
 0x142   : > { %4056 = vmatprep.mubr.msk.bf16.mxu0 %vm839_vm8, %v5472_v27 }
 0x149   : > { %912 = vmatmul.mubr.bf16.gmra.mxu0 %v5474_v44 }
 0x14a   : > { %4057 = vmatprep.mubr.msk.bf16.mxu0 %vm839_vm8, %v5475_v15 }
 0x151   : > { %922 = vmatmul.mubr.bf16.gmra.mxu0 %v5477_v33 }
 0x1f9   : > { %v893_v52 = vpop.f32.mrf.mxu0 }
 0x1fa   : > { %v894_v53 = vadd.f32 %v893_v52, %v766_v50 }
 0x1fb   : > { %v895_v16 = vpop.f32.mrf.mxu0 }
 0x1fc   : > { %vm932_vm8 = vcmp.ge.f32.partialorder %v894_v53, 0.0  ;;  %v948_v38 = vmul.f32 0.01, %v894_v53  ;;  %v896_v55 = vadd.f32 %v895_v16, %v766_v50 }
 0x1fd   : > { %v897_v56 = vpop.f32.mrf.mxu0 }
 0x1fe   : > { %vm933_vm13 = vcmp.ge.f32.partialorder %v896_v55, 0.0  ;;  %v949_v54 = vmul.f32 0.01, %v896_v55  ;;  %v898_v58 = vadd.f32 %v897_v56, %v771_v29  ;;  %v6012_v60 = vsel %vm932_vm8, %v894_v53, %v948_v38 }
 0x1ff   : > { %v899_v62 = vpop.f32.mrf.mxu0 }
 0x200   : > { %v6014_v63 = vsel %vm933_vm13, %v896_v55, %v949_v54  ;;  %vm934_vm9 = vcmp.ge.f32.partialorder %v898_v58, 0.0  ;;  %v950_v2 = vmul.f32 0.01, %v898_v58  ;;  %v900_v4 = vadd.f32 %v899_v62, %v771_v29 }
 0x201   : > { %v903_v8 = vpop.f32.mrf.mxu0  ;;  %v6018_v10 = vpack.i.bf16 %v6014_v63, %v6012_v60 }
 0x202   : > { %v6020_v11 = vsel %vm934_vm9, %v898_v58, %v950_v2  ;;  %vm935_vm15 = vcmp.ge.f32.partialorder %v900_v4, 0.0  ;;  %v951_v57 = vmul.f32 0.01, %v900_v4  ;;  %v904_v12 = vadd.f32 %v903_v8, %v776_v48 }
 0x203   : > { %v905_v13 = vpop.f32.mrf.mxu0 }
 0x204   : > { %v6024_v19 = vsel %vm935_vm15, %v900_v4, %v951_v57  ;;  %vm936_vm6 = vcmp.ge.f32.partialorder %v904_v12, 0.0  ;;  %v952_v20 = vmul.f32 0.01, %v904_v12  ;;  %v906_v21 = vadd.f32 %v905_v13, %v776_v48 }
 0x205   : > { %v907_v22 = vpop.f32.mrf.mxu0  ;;  %v6032_v17 = vpack.i.bf16 %v6024_v19, %v6020_v11 }
 0x206   : > { %vm937_vm14 = vcmp.ge.f32.partialorder %v906_v21, 0.0  ;;  %v953_v24 = vmul.f32 0.01, %v906_v21  ;;  %v908_v25 = vadd.f32 %v907_v22, %v781_v49  ;;  %v6028_v14 = vsel %vm936_vm6, %v904_v12, %v952_v20 }
 0x207   : > { %v909_v30 = vpop.f32.mrf.mxu0 }
 0x208   : > { %v6034_v31 = vsel %vm937_vm14, %v906_v21, %v953_v24  ;;  %vm938_vm10 = vcmp.ge.f32.partialorder %v908_v25, 0.0  ;;  %v954_v32 = vmul.f32 0.01, %v908_v25  ;;  %v910_v34 = vadd.f32 %v909_v30, %v781_v49 }
 0x209   : > { %v913_v35 = vpop.f32.mrf.mxu0  ;;  %v6038_v36 = vpack.i.bf16 %v6034_v31, %v6028_v14 }
 0x20a   : > { %v6040_v39 = vsel %vm938_vm10, %v908_v25, %v954_v32  ;;  %vm939_vm4 = vcmp.ge.f32.partialorder %v910_v34, 0.0  ;;  %v955_v40 = vmul.f32 0.01, %v910_v34  ;;  %v914_v41 = vadd.f32 %v913_v35, %v786_v46 }
 0x20b   : > { %v915_v59 = vpop.f32.mrf.mxu0  ;;  %vm8138_vm10 = vcmp.ge.s32.totalorder %v5642_v5, 16 }
 0x20c   : > { %v6044_v9 = vsel %vm939_vm4, %v910_v34, %v955_v40  ;;  %vm940_vm1 = vcmp.ge.f32.partialorder %v914_v41, 0.0  ;;  %v956_v1 = vmul.f32 0.01, %v914_v41  ;;  %v916_v28 = vadd.f32 %v915_v59, %v786_v46  ;;  %vm8139_vm4 = vmmov %vm8138_vm10 }
 0x20d   : > { %v917_v42 = vpop.f32.mrf.mxu0  ;;  %v6053_v48 = vpack.i.bf16 %v6044_v9, %v6040_v39 }
 0x20e   : > { %vm941_vm5 = vcmp.ge.f32.partialorder %v916_v28, 0.0  ;;  %v957_v27 = vmul.f32 0.01, %v916_v28  ;;  %v918_v44 = vadd.f32 %v917_v42, %v6010_v47  ;;  %v6049_v15 = vsel %vm940_vm1, %v914_v41, %v956_v1  ;;  %vm8142_vm1 = vmmov %vm8139_vm4 }
 0x20f   : > { %v919_v33 = vpop.f32.mrf.mxu0  ;;  %v4691_v1 = vpack.i.bf16 %v6040_v39, %v6028_v14  ;;  %v4701_v42 = vpack.i.bf16 %v6020_v11, %v6012_v60 }
 0x210   : > { %v6055_v49 = vsel %vm941_vm5, %v916_v28, %v957_v27  ;;  %vm942_vm8 = vcmp.ge.f32.partialorder %v918_v44, 0.0  ;;  %v958_v50 = vmul.f32 0.01, %v918_v44  ;;  %v920_v46 = vadd.f32 %v919_v33, %v6010_v47  ;;  %vm8143_vm5 = vmmov %vm8142_vm1 }
 0x211   : > { %v923_v52 = vpop.f32.mrf.mxu0  ;;  %v6060_v53 = vpack.i.bf16 %v6055_v49, %v6049_v15  ;;  %v4686_v28 = vpack.i.bf16 %v6044_v9, %v6034_v31  ;;  %v4696_v27 = vpack.i.bf16 %v6024_v19, %v6014_v63 }
 0x212   : > { %v6062_v16 = vsel %vm942_vm8, %v918_v44, %v958_v50  ;;  %vm943_vm13 = vcmp.ge.f32.partialorder %v920_v46, 0.0  ;;  %v959_v29 = vmul.f32 0.01, %v920_v46  ;;  %v924_v38 = vadd.f32 %v923_v52, %v6008_v45  ;;  %vm8147_vm8 = vmmov %vm8142_vm1 }
 0x213   : > { %v925_v55 = vpop.f32.mrf.mxu0  ;;  %v4681_v41 = vpack.i.bf16 %v6062_v16, %v6049_v15 }
 0x214   : > { %v6067_v54 = vsel %vm943_vm13, %v920_v46, %v959_v29  ;;  %vm944_vm9 = vcmp.ge.f32.partialorder %v924_v38, 0.0  ;;  %v960_v58 = vmul.f32 0.01, %v924_v38  ;;  %v926_v47 = vadd.f32 %v925_v55, %v6008_v45  ;;  %vm8149_vm13 = vmmov %vm8142_vm1 }
 0x215   : > { %v927_v62 = vpop.f32.mrf.mxu0  ;;  %v6077_v13 = vpack.i.bf16 %v6067_v54, %v6062_v16  ;;  %v4676_v59 = vpack.i.bf16 %v6067_v54, %v6055_v49 }
 0x216   : > { %vm945_vm15 = vcmp.ge.f32.partialorder %v926_v47, 0.0  ;;  %v961_v4 = vmul.f32 0.01, %v926_v47  ;;  %v928_v8 = vadd.f32 %v927_v62, %v6006_v37  ;;  %v6073_v57 = vsel %vm944_vm9, %v924_v38, %v960_v58  ;;  %vm8154_vm9 = vmmov %vm8142_vm1 }
 0x217   : > { %v929_v12 = vpop.f32.mrf.mxu0 }
 0x218   : > { %v6079_v20 = vsel %vm945_vm15, %v926_v47, %v961_v4  ;;  %vm946_vm6 = vcmp.ge.f32.partialorder %v928_v8, 0.0  ;;  %v962_v21 = vmul.f32 0.01, %v928_v8  ;;  %v930_v45 = vadd.f32 %v929_v12, %v6006_v37  ;;  %vm8156_vm15 = vmmov %vm8142_vm1 }
 0x219   : > { %v6084_v22 = vpack.i.bf16 %v6079_v20, %v6073_v57 }
 0x21a   : > { %v6086_v24 = vsel %vm946_vm6, %v928_v8, %v962_v21  ;;  %vm947_vm14 = vcmp.ge.f32.partialorder %v930_v45, 0.0  ;;  %v963_v25 = vmul.f32 0.01, %v930_v45  ;;  %vm8158_vm6 = vcmask 916480  }
 0x21b   : > { %v4666_v30 = vpack.i.bf16 %v6086_v24, %v6073_v57 }
 0x21c   : > { %v6092_v34 = vsel %vm947_vm14, %v930_v45, %v963_v25  ;;  %vm8159_vm14 = vmmov %vm8158_vm6 }
 0x21d   : > { %4667 = vrot.lane.b32.xlu0 %v4666_v30, %s5550_s21  ;;  %v4671_v37 = vpack.i.bf16 %v6092_v34, %v6079_v20  ;;  %v6101_v40 = vpack.i.bf16 %v6092_v34, %v6086_v24 }
 0x21f   : > { %4672 = vrot.lane.b32.xlu1 %v4671_v37, %s5550_s21 }
 0x221   : > { %4682 = vrot.lane.b32.xlu0 %v4681_v41, %s5550_s21 }
 0x223   : > { %4677 = vrot.lane.b32.xlu1 %v4676_v59, %s5550_s21 }
 0x225   : > { %4692 = vrot.lane.b32.xlu0 %v4691_v1, %s5550_s21 }
 0x227   : > { %4687 = vrot.lane.b32.xlu1 %v4686_v28, %s5550_s21 }
 0x229   : > { %4702 = vrot.lane.b32.xlu0 %v4701_v42, %s5550_s21 }
 0x22b   : > { %4697 = vrot.lane.b32.xlu1 %v4696_v27, %s5550_s21 }
 0x22d   : > { %4717 = vrot.lane.b32.xlu0 %v6077_v13, %s5551_s22 }
 0x22f   : > { %4707 = vrot.lane.b32.xlu1 %v6084_v22, %s5551_s22 }
 0x231   : > { %4727 = vrot.lane.b32.xlu0 %v6101_v40, %s5551_s22 }
 0x233   : > { %4712 = vrot.lane.b32.xlu1 %v6060_v53, %s5551_s22 }
 0x235   : > { %4732 = vrot.lane.b32.xlu0 %v6053_v48, %s5551_s22 }
 0x237   : > { %4722 = vrot.lane.b32.xlu1 %v6038_v36, %s5551_s22 }
 0x239   : > { %4742 = vrot.lane.b32.xlu0 %v6032_v17, %s5551_s22 }
 0x23b   : > { %4737 = vrot.lane.b32.xlu1 %v6018_v10, %s5551_s22 }
 0x23d   : > { %4747 = vrot.lane.b32.xlu0 %v4666_v30, %s5554_s24 }
 0x23f   : > { %4752 = vrot.lane.b32.xlu1 %v4671_v37, %s5554_s24 }
 0x241   : > { %4762 = vrot.lane.b32.xlu0 %v4681_v41, %s5554_s24 }
 0x243   : > { %4757 = vrot.lane.b32.xlu1 %v4676_v59, %s5554_s24 }
 0x245   : > { %4772 = vrot.lane.b32.xlu0 %v4691_v1, %s5554_s24 }
 0x247   : > { %4767 = vrot.lane.b32.xlu1 %v4686_v28, %s5554_s24 }
 0x249   : > { %4782 = vrot.lane.b32.xlu0 %v4701_v42, %s5554_s24 }
 0x24b   : > { %4777 = vrot.lane.b32.xlu1 %v4696_v27, %s5554_s24 }
 0x28f   : > { %v4668_v44 = vpop.permute.xlu0 %4667 }
 0x290   : > { %v4670_v50 = vunpack.i.h.bf16 %v4668_v44  ;;  %v4669_v46 = vunpack.i.l.bf16 %v4668_v44 }
 0x291   : > { %v4673_v33 = vpop.permute.xlu1 %4672 }
 0x292   : > { %v4675_v52 = vunpack.i.h.bf16 %v4673_v33  ;;  %v4674_v29 = vunpack.i.l.bf16 %v4673_v33 }
 0x293   : > { %v4683_v38 = vpop.permute.xlu0 %4682 }
 0x294   : > { %v4685_v55 = vunpack.i.h.bf16 %v4683_v38  ;;  %v4684_v58 = vunpack.i.l.bf16 %v4683_v38  ;;  %v6147_v47 = vsel %vm8107_vm3, %v4669_v46, %v4674_v29  ;;  %v6150_v62 = vsel %vm8107_vm3, %v4670_v50, %v4675_v52 }
 0x295   : > { %v4678_v4 = vpop.permute.xlu1 %4677  ;;  %v4786_v8 = vpack.i.bf16 %v6150_v62, %v6147_v47  ;;  %v6155_v12 = vsel %vm8107_vm3, %v4674_v29, %v4669_v46  ;;  %v6158_v21 = vsel %vm8107_vm3, %v4675_v52, %v4670_v50 }
 0x296   : > { %8136 = vst [vmem:[#allocation6_spill] sm:$0xff] %v6155_v12  ;;  %8137 = vst [vmem:[#allocation7_spill] sm:$0xff] %v6158_v21  ;;  %v4680_v25 = vunpack.i.h.bf16 %v4678_v4  ;;  %v4679_v30 = vunpack.i.l.bf16 %v4678_v4  ;;  %v6165_v37 = vsel %vm8138_vm10, %v6155_v12, 0.0  ;;  %v6170_v41 = vsel %vm8139_vm4, %v6158_v21, 0.0 }
 0x297   : > { %v4693_v59 = vpop.permute.xlu0 %4692  ;;  %4787 = vrot.lane.b32.xlu1 %v4786_v8, %s5554_s24  ;;  %v4796_v28 = vpack.i.bf16 %v6170_v41, %v6165_v37  ;;  %vm8160_vm10 = vmmov %vm8158_vm6 }
 0x298   : > { %v4695_v42 = vunpack.i.h.bf16 %v4693_v59  ;;  %v4694_v27 = vunpack.i.l.bf16 %v4693_v59  ;;  %v6178_v44 = vsel %vm8107_vm3, %v4684_v58, %v4679_v30  ;;  %v6181_v33 = vsel %vm8107_vm3, %v4685_v55, %v4680_v25  ;;  %vm8161_vm4 = vmmov %vm8158_vm6 }
 0x299   : > { %4797 = vrot.lane.b32.xlu0 %v4796_v28, %s5554_s24  ;;  %v4688_v50 = vpop.permute.xlu1 %4687  ;;  %v4791_v46 = vpack.i.bf16 %v6181_v33, %v6178_v44  ;;  %v6187_v52 = vsel %vm8107_vm3, %v4679_v30, %v4684_v58  ;;  %v6190_v29 = vsel %vm8107_vm3, %v4680_v25, %v4685_v55 }
 0x29a   : > { %8140 = vst [vmem:[#allocation8_spill] sm:$0xff] %v6187_v52  ;;  %8141 = vst [vmem:[#allocation9_spill] sm:$0xff] %v6190_v29  ;;  %v4690_v4 = vunpack.i.h.bf16 %v4688_v50  ;;  %v4689_v8 = vunpack.i.l.bf16 %v4688_v50  ;;  %v6197_v59 = vsel %vm8142_vm1, %v6187_v52, 0.0  ;;  %v6202_v28 = vsel %vm8143_vm5, %v6190_v29, 0.0 }
 0x29b   : > { %4792 = vrot.lane.b32.xlu1 %v4791_v46, %s5554_s24  ;;  %v4703_v58 = vpop.permute.xlu0 %4702  ;;  %v4801_v25 = vpack.i.bf16 %v6202_v28, %v6197_v59  ;;  %vm8162_vm1 = vcmp.lt.s32.totalorder %v5645_v6, 240 }
 0x29c   : > { %v4705_v30 = vunpack.i.h.bf16 %v4703_v58  ;;  %v4704_v50 = vunpack.i.l.bf16 %v4703_v58  ;;  %v6210_v7 = vsel %vm8107_vm3, %v4694_v27, %v4689_v8  ;;  %v6213_v38 = vsel %vm8107_vm3, %v4695_v42, %v4690_v4  ;;  %vm6287_vm5 = vmpackc.low %vm8162_vm1, %vm8162_vm1 }
 0x29d   : > { %8144 = vst [vmem:[#allocation10_spill] sm:$0xff] %v6210_v7  ;;  %4802 = vrot.lane.b32.xlu0 %v4801_v25, %s5554_s24  ;;  %v4698_v1 = vpop.permute.xlu1 %4697  ;;  %v4806_v46 = vpack.i.bf16 %v6213_v38, %v6210_v7  ;;  %v6219_v45 = vsel %vm8107_vm3, %v4689_v8, %v4694_v27  ;;  %v6222_v55 = vsel %vm8107_vm3, %v4690_v4, %v4695_v42 }
 0x29e   : > { %8145 = vst [vmem:[#allocation11_spill] sm:$0xff] %v6219_v45  ;;  %8146 = vst [vmem:[#allocation12_spill] sm:$0xff] %v6222_v55  ;;  %v4700_v18 = vunpack.i.h.bf16 %v4698_v1  ;;  %v4699_v23 = vunpack.i.l.bf16 %v4698_v1  ;;  %v6229_v61 = vsel %vm8147_vm8, %v6219_v45, 0.0  ;;  %v6234_v25 = vsel %vm8149_vm13, %v6222_v55, 0.0 }
 0x29f   : > { %8148 = vst [vmem:[#allocation13_spill] sm:$0xff] %v6229_v61  ;;  %4807 = vrot.lane.b32.xlu1 %v4806_v46, %s5554_s24  ;;  %v4718_v27 = vpop.permute.xlu0 %4717  ;;  %v4811_v4 = vpack.i.bf16 %v6234_v25, %v6229_v61  ;;  %vm8166_vm8 = vmmov %vm8161_vm4 }
 0x2a0   : > { %v4720_v1 = vunpack.i.h.bf16 %v4718_v27  ;;  %v4719_v8 = vunpack.i.l.bf16 %v4718_v27  ;;  %v6242_v58 = vsel %vm8107_vm3, %v4704_v50, %v4699_v23  ;;  %v6245_v0 = vsel %vm8107_vm3, %v4705_v30, %v4700_v18  ;;  %vm8168_vm13 = vmmov %vm8161_vm4 }
 0x2a1   : > { %8150 = vst [vmem:[#allocation14_spill] sm:$0xff] %v6242_v58  ;;  %8151 = vst [vmem:[#allocation15_spill] sm:$0xff] %v6245_v0  ;;  %4812 = vrot.lane.b32.xlu0 %v4811_v4, %s5554_s24  ;;  %v4708_v56 = vpop.permute.xlu1 %4707  ;;  %v4816_v46 = vpack.i.bf16 %v6245_v0, %v6242_v58  ;;  %v6251_v2 = vsel %vm8107_vm3, %v4699_v23, %v4704_v50  ;;  %v6254_v42 = vsel %vm8107_vm3, %v4700_v18, %v4705_v30 }
 0x2a2   : > { %8152 = vst [vmem:[#allocation16_spill] sm:$0xff] %v6251_v2  ;;  %8153 = vst [vmem:[#allocation17_spill] sm:$0xff] %v6254_v42  ;;  %v4710_v32 = vunpack.i.h.bf16 %v4708_v56  ;;  %v4709_v35 = vunpack.i.l.bf16 %v4708_v56  ;;  %v6261_v3 = vsel %vm8154_vm9, %v6251_v2, 0.0  ;;  %v6267_v23 = vsel %vm8156_vm15, %v6254_v42, 0.0 }
 0x2a3   : > { %8155 = vst [vmem:[#allocation18_spill] sm:$0xff] %v6261_v3  ;;  %v4728_v4 = vpop.permute.xlu0 %4727  ;;  %4817 = vrot.lane.b32.xlu1 %v4816_v46, %s5554_s24  ;;  %8157 = vst [vmem:[#allocation19_spill] sm:$0xff] %v6267_v23  ;;  %v4821_v56 = vpack.i.bf16 %v6267_v23, %v6261_v3  ;;  %v1153_v27 = vsel %vm8158_vm6, %v4720_v1, %v4719_v8 }
 0x2a4   : > { %v4730_v30 = vunpack.i.h.bf16 %v4728_v4  ;;  %v4729_v50 = vunpack.i.l.bf16 %v4728_v4  ;;  %v6275_v26 = vsel %vm8159_vm14, %v4710_v32, %v4709_v35  ;;  %v6278_v46 = vsel %vm8160_vm10, %v4709_v35, %v4710_v32  ;;  %vm8169_vm9 = vmmov %vm8161_vm4 }
 0x2a5   : > { %v4713_v45 = vpop.permute.xlu1 %4712  ;;  %4822 = vrot.lane.b32.xlu0 %v4821_v56, %s5554_s24  ;;  %v8163_v4 = vmov 0  ;;  %vm8170_vm15 = vmmov %vm8162_vm1 }
 0x2a6   : > { %v6281_v55 = vsel %vm8161_vm4, %v4730_v30, %v4729_v50  ;;  %v4715_v18 = vunpack.i.h.bf16 %v4713_v45  ;;  %v4714_v2 = vunpack.i.l.bf16 %v4713_v45  ;;  %v8164_v4 = vsel %vm6287_vm5, 4294967295, %v8163_v4  ;;  %vm8172_vm6 = vmmov %vm8162_vm1 }
 0x2a7   : > { %8165 = vst [vmem:[#allocation20_spill] sm:$0xff] %v8164_v4  ;;  %v6292_v42 = vsel %vm8166_vm8, %v4729_v50, %v4730_v30  ;;  %v4733_v52 = vpop.permute.xlu0 %4732  ;;  %v4163_v32 = vpack.c.bf16 %v6281_v55, %v6275_v26  ;;  %v6312_v58 = vsel %vm8172_vm6, %v1153_v27, 0.0  ;;  %vm8173_vm14 = vmmov %vm8161_vm4 }
 0x2a8   : > { %8167 = vst [vmem:[#allocation21_spill] sm:$0xff] %v6292_v42  ;;  %v4826_v35 = vpack.i.bf16 %v6292_v42, %v6278_v46  ;;  %v1802_v45 = vpack.c.bf16 %v6292_v42, %v6278_v46  ;;  %v1152_v56 = vsel %vm8168_vm13, %v4715_v18, %v4714_v2  ;;  %v4735_v29 = vunpack.i.h.bf16 %v4733_v52  ;;  %vm8174_vm10 = vmmov %vm8161_vm4 }
 0x2a9   : > { %v4734_v12 = vunpack.i.l.bf16 %v4733_v52  ;;  %v6302_v21 = vsel %vm8169_vm9, %v4714_v2, %v4715_v18  ;;  %v4723_v5 = vpop.permute.xlu1 %4722  ;;  %4164 = vmatprep.subr.msk.bf16.mxu0 %vm6287_vm5, %v4163_v32  ;;  %v4166_v30 = vpack.c.bf16 %v1153_v27, %v1152_v56  ;;  %v6308_v50 = vsel %vm8170_vm15, %v1152_v56, 0.0  ;;  %vm8176_vm8 = vmmov %vm8162_vm1 }
 0x2aa   : > { %8171 = vst [vmem:[#allocation22_spill] sm:$0xff] %v6308_v50  ;;  %v6315_v3 = vsel %vm8173_vm14, %v4719_v8, %v4720_v1  ;;  %v4725_v2 = vunpack.i.h.bf16 %v4723_v5  ;;  %v4724_v18 = vunpack.i.l.bf16 %v4723_v5  ;;  %4827 = vrot.lane.b32.xlu0 %v4826_v35, %s5554_s24  ;;  %2063 = vmatpush1.bf16.msra.mxu0 %v1802_v45  ;;  %v4831_v32 = vpack.i.bf16 %v6312_v58, %v6308_v50  ;;  %vm8178_vm13 = vmmov %vm8161_vm4 }
 0x2ab   : > { %v1151_v52 = vsel %vm8174_vm10, %v4735_v29, %v4734_v12  ;;  %v4743_v0 = vpop.permute.xlu0 %4742  ;;  %4167 = vmatprep.subr.msk.bf16.mxu0 %vm6287_vm5, %v4166_v30  ;;  %v4836_v27 = vpack.i.bf16 %v6315_v3, %v6302_v21  ;;  %v1800_v5 = vpack.c.bf16 %v6315_v3, %v6302_v21  ;;  %vm8180_vm9 = vmmov %vm8161_vm4 }
 0x2ac   : > { %v1150_v1 = vsel %vm8161_vm4, %v4725_v2, %v4724_v18  ;;  %v4745_v8 = vunpack.i.h.bf16 %v4743_v0  ;;  %v4744_v56 = vunpack.i.l.bf16 %v4743_v0  ;;  %4832 = vrot.lane.b32.xlu1 %v4831_v32, %s5554_s24  ;;  %v6335_v30 = vsel %vm8176_vm8, %v1151_v52, 0.0  ;;  %vm8181_vm15 = vmmov %vm8161_vm4 }
 0x2ad   : > { %v4738_v35 = vpop.permute.xlu1 %4737  ;;  %v4169_v45 = vpack.c.bf16 %v1151_v52, %v1150_v1  ;;  %v6331_v23 = vsel %vm8162_vm1, %v1150_v1, 0.0  ;;  %8177 = vst [vmem:[#allocation24_spill] sm:$0xff] %v6335_v30  ;;  %v6338_v7 = vsel %vm8178_vm13, %v4724_v18, %v4725_v2  ;;  %v6347_v52 = vsel %vm8181_vm15, %v4734_v12, %v4735_v29  ;;  %vm8183_vm6 = vmmov %vm8161_vm4 }
 0x2ae   : > { %8175 = vst [vmem:[#allocation23_spill] sm:$0xff] %v6331_v23  ;;  %8179 = vst [vmem:[#allocation25_spill] sm:$0xff] %v6338_v7  ;;  %v1149_v0 = vsel %vm8180_vm9, %v4745_v8, %v4744_v56  ;;  %v4740_v61 = vunpack.i.h.bf16 %v4738_v35  ;;  %v4739_v32 = vunpack.i.l.bf16 %v4738_v35  ;;  %4837 = vrot.lane.b32.xlu0 %v4836_v27, %s5554_s24  ;;  %2065 = vmatpush1.bf16.msra.mxu0 %v1800_v5  ;;  %vm8190_vm8 = vcmask 7168  }
 0x2af   : > { %v4841_v42 = vpack.i.bf16 %v6335_v30, %v6331_v23  ;;  %v4748_v50 = vpop.permute.xlu0 %4747  ;;  %4170 = vmatprep.subr.msk.bf16.mxu0 %vm6287_vm5, %v4169_v45  ;;  %8182 = vst [vmem:[#allocation26_spill] sm:$0xff] %v6347_v52  ;;  %v4846_v18 = vpack.i.bf16 %v6347_v52, %v6338_v7  ;;  %v1798_v27 = vpack.c.bf16 %v6347_v52, %v6338_v7  ;;  %vm8184_vm14 = vmmov %vm8162_vm1 }
 0x2b0   : > { %v1148_v2 = vsel %vm8183_vm6, %v4740_v61, %v4739_v32  ;;  %v6357_v1 = vsel %vm8184_vm14, %v1149_v0, 0.0  ;;  %v4750_v5 = vunpack.i.h.bf16 %v4748_v50  ;;  %vm8186_vm10 = vmmov %vm8162_vm1  ;;  %v6364_v29 = vsel %vm8161_vm4, %v4739_v32, %v4740_v61 }
 0x2b1   : > { %4842 = vrot.lane.b32.xlu1 %v4841_v42, %s5554_s24  ;;  %8185 = vst [vmem:[#allocation27_spill] sm:$0xff] %v6357_v1  ;;  %v4753_v35 = vpop.permute.xlu1 %4752  ;;  %v4172_v45 = vpack.c.bf16 %v1149_v0, %v1148_v2  ;;  %v6361_v12 = vsel %vm8186_vm10, %v1148_v2, 0.0  ;;  %8188 = vst [vmem:[#allocation29_spill] sm:$0xff] %v6364_v29  ;;  %v4749_v42 = vunpack.i.l.bf16 %v4748_v50 }
 0x2b2   : > { %8187 = vst [vmem:[#allocation28_spill] sm:$0xff] %v6361_v12  ;;  %v4755_v23 = vunpack.i.h.bf16 %v4753_v35  ;;  %v4754_v30 = vunpack.i.l.bf16 %v4753_v35  ;;  %4847 = vrot.lane.b32.xlu0 %v4846_v18, %s5554_s24  ;;  %2067 = vmatpush1.bf16.msra.mxu0 %v1798_v27  ;;  %v4851_v7 = vpack.i.bf16 %v6357_v1, %v6361_v12  ;;  %vm8189_vm1 = vmmov %vm8161_vm4 }
 0x2b3   : > { %v4763_v52 = vpop.permute.xlu0 %4762  ;;  %4173 = vmatprep.subr.msk.bf16.mxu0 %vm6287_vm5, %v4172_v45  ;;  %v6372_v0 = vsel %vm8189_vm1, %v4744_v56, %v4745_v8  ;;  %vm8191_vm13 = vmmov %vm8190_vm8 }
 0x2b4   : > { %v4856_v61 = vpack.i.bf16 %v6372_v0, %v6364_v29  ;;  %v1796_v50 = vpack.c.bf16 %v6372_v0, %v6364_v29  ;;  %v1338_v32 = vsel %vm8190_vm8, %v4749_v42, %v4754_v30  ;;  %v1339_v2 = vsel %vm8191_vm13, %v4750_v5, %v4755_v23  ;;  %vm8192_vm9 = vmmov %vm8190_vm8 }
 0x2b5   : > { %4852 = vrot.lane.b32.xlu1 %v4851_v7, %s5554_s24  ;;  %v4765_v18 = vunpack.i.h.bf16 %v4763_v52  ;;  %v4758_v27 = vpop.permute.xlu1 %4757  ;;  %v4079_v35 = vpack.c.bf16 %v1339_v2, %v1338_v32  ;;  %v1410_v45 = vsel %vm8192_vm9, %v4754_v30, %v4749_v42  ;;  %vm8193_vm15 = vmmov %vm8190_vm8  ;;  %v4764_v56 = vunpack.i.l.bf16 %v4763_v52 }
 0x2b6   : > { %v1411_v8 = vsel %vm8193_vm15, %v4755_v23, %v4750_v5  ;;  %v4760_v4 = vunpack.i.h.bf16 %v4758_v27  ;;  %v4759_v7 = vunpack.i.l.bf16 %v4758_v27  ;;  %4857 = vrot.lane.b32.xlu0 %v4856_v61, %s5554_s24  ;;  %2069 = vmatpush1.bf16.msra.mxu0 %v1796_v50  ;;  %v8194_v29 = vpack.c.bf16 %v6092_v34, %v6079_v20  ;;  %vm8195_vm6 = vmmov %vm8186_vm10 }
 0x2b7   : > { %v4082_v12 = vpack.c.bf16 %v1411_v8, %v1410_v45  ;;  %v4773_v1 = vpop.permute.xlu0 %4772  ;;  %4080 = vmatprep.subr.msk.bf16.mxu1 %vm5808_vm0, %v4079_v35  ;;  %v6392_v30 = vsel %vm8195_vm6, %v6281_v55, 0.0  ;;  %vm8196_vm14 = vmmov %vm8190_vm8 }
 0x2b8   : > { %2070 = vmatprep.subr.bf16.mxu0 %v8194_v29  ;;  %v1336_v23 = vsel %vm8196_vm14, %v4764_v56, %v4759_v7  ;;  %vm8197_vm10 = vmmov %vm8190_vm8  ;;  %v4775_v61 = vunpack.i.h.bf16 %v4773_v1  ;;  %v4774_v50 = vunpack.i.l.bf16 %v4773_v1 }
 0x2b9   : > { %v1337_v52 = vsel %vm8197_vm10, %v4765_v18, %v4760_v4  ;;  %vm8198_vm4 = vmmov %vm8190_vm8  ;;  %4083 = vmatpush1.bf16.msk.msra.mxu1 %vm5826_vm2, %v4082_v12  ;;  %4862 = vrot.lane.b32.xlu1 %v6084_v22, %s5553_s23  ;;  %v4768_v20 = vpop.permute.xlu1 %4767  ;;  %v8202_v22 = vpack.c.bf16 %v6067_v54, %v6055_v49 }
 0x2ba   : > { %v1408_v5 = vsel %vm8198_vm4, %v4759_v7, %v4764_v56  ;;  %vm8199_vm1 = vmmov %vm8198_vm4  ;;  %v4085_v34 = vpack.c.bf16 %v1337_v52, %v1336_v23  ;;  %v4770_v32 = vunpack.i.h.bf16 %v4768_v20  ;;  %v4769_v2 = vunpack.i.l.bf16 %v4768_v20  ;;  %4867 = vrot.lane.b32.xlu0 %v6101_v40, %s5553_s23  ;;  %v8222_v20 = vld [vmem:[#allocation23_spill] sm:$0xff] }
 0x2bb   : > { %v1409_v42 = vsel %vm8199_vm1, %v4760_v4, %v4765_v18  ;;  %vm8200_vm8 = vmmov %vm8195_vm6  ;;  %v8201_v4 = vpack.c.bf16 %v6086_v24, %v6073_v57  ;;  %v4783_v12 = vpop.permute.xlu0 %4782  ;;  %v8207_v56 = vpack.c.bf16 %v6062_v16, %v6049_v15  ;;  %v8208_v7 = vpack.c.bf16 %v6044_v9, %v6034_v31 }
 0x2bc   : > { %v4088_v29 = vpack.c.bf16 %v1409_v42, %v1408_v5  ;;  %v1169_v55 = vsel %vm8200_vm8, %v6275_v26, 0.0  ;;  %4086 = vmatprep.subr.msk.bf16.mxu1 %vm5808_vm0, %v4085_v34  ;;  %vm8203_vm13 = vmmov %vm8199_vm1  ;;  %v4785_v49 = vunpack.i.h.bf16 %v4783_v12  ;;  %v4784_v54 = vunpack.i.l.bf16 %v4783_v12  ;;  %v8223_v34 = vld [vmem:[#allocation19_spill] sm:$0xff]  ;;  %v8228_v12 = vld [vmem:[#allocation29_spill] sm:$0xff] }
 0x2bd   : > { %2071 = vmatpush1.bf16.msra.mxu0 %v8201_v4  ;;  %v4871_v26 = vpack.i.bf16 %v6392_v30, %v1169_v55  ;;  %v1334_v1 = vsel %vm8203_vm13, %v4774_v50, %v4769_v2  ;;  %vm8204_vm9 = vmmov %vm8199_vm1  ;;  %v4778_v57 = vpop.permute.xlu1 %4777  ;;  %v8212_v31 = vpack.c.bf16 %v6040_v39, %v6028_v14  ;;  %v8213_v9 = vpack.c.bf16 %v6024_v19, %v6014_v63  ;;  %v5480_v39 = vld [vmem:[%s8030_s4 + $0x4] ss:$20 sps:$4 sm:$0xff]  }
 0x2be   : > { %2072 = vmatprep.subr.bf16.mxu0 %v8202_v22  ;;  %v1335_v18 = vsel %vm8204_vm9, %v4775_v61, %v4770_v32  ;;  %vm8205_vm15 = vmmov %vm8199_vm1  ;;  %4089 = vmatpush1.bf16.msk.msra.mxu1 %vm5826_vm2, %v4088_v29  ;;  %v4780_v45 = vunpack.i.h.bf16 %v4778_v57  ;;  %v4779_v8 = vunpack.i.l.bf16 %v4778_v57  ;;  %v8214_v14 = vpack.c.bf16 %v6020_v11, %v6012_v60  ;;  %v8224_v29 = vld [vmem:[#allocation15_spill] sm:$0xff]  ;;  %v8229_v22 = vld [vmem:[#allocation28_spill] sm:$0xff] }
 0x2bf   : > { %v1406_v40 = vsel %vm8205_vm15, %v4769_v2, %v4774_v50  ;;  %vm8206_vm6 = vmmov %vm8199_vm1  ;;  %4872 = vrot.lane.b32.xlu1 %v4871_v26, %s5554_s24  ;;  %v4091_v24 = vpack.c.bf16 %v1335_v18, %v1334_v1  ;;  %4882 = vrot.lane.b32.xlu0 %v6077_v13, %s5553_s23  ;;  %v4921_v63 = vpack.i.bf16 %v6181_v33, %v6202_v28  ;;  %v8218_v28 = vld [vmem:[#allocation10_spill] sm:$0xff]  ;;  %v8227_v2 = vld [vmem:[#allocation27_spill] sm:$0xff] }
 0x2c0   : > { %v1407_v27 = vsel %vm8206_vm6, %v4770_v32, %v4775_v61  ;;  %vm8209_vm14 = vmmov %vm8199_vm1  ;;  %v1405_v42 = vsel %vm8199_vm1, %v4780_v45, %v4785_v49  ;;  %2021 = vmatprep.mubr.bf16.mxu1 %v5480_v39  ;;  %v4906_v19 = vpack.i.bf16 %v6147_v47, %v6165_v37  ;;  %v4931_v60 = vpack.i.bf16 %v6312_v58, %v6315_v3  ;;  %v8215_v3 = vld [vmem:[#allocation22_spill] sm:$0xff]  ;;  %v8217_v37 = vld [vmem:[#allocation13_spill] sm:$0xff] }
 0x2c1   : > { %v4094_v35 = vpack.c.bf16 %v1407_v27, %v1406_v40  ;;  %2073 = vmatpush1.bf16.msra.mxu0 %v8207_v56  ;;  %4092 = vmatprep.subr.msk.bf16.mxu1 %vm5808_vm0, %v4091_v24  ;;  %v1332_v23 = vsel %vm8209_vm14, %v4784_v54, %v4779_v8  ;;  %vm8210_vm10 = vmmov %vm8199_vm1  ;;  %v4911_v11 = vpack.i.bf16 %v1169_v55, %v6278_v46  ;;  %v8219_v58 = vld [vmem:[#allocation26_spill] sm:$0xff]  ;;  %v8221_v46 = vld [vmem:[#allocation25_spill] sm:$0xff] }
 0x2c2   : > { %2074 = vmatprep.subr.bf16.mxu0 %v8208_v7  ;;  %v1333_v52 = vsel %vm8210_vm10, %v4785_v49, %v4780_v45  ;;  %vm8211_vm4 = vmmov %vm8199_vm1  ;;  %v5492_v55 = vld [vmem:[%s8030_s4 + $0xc] ss:$20 sps:$4 sm:$0xff]   ;;  %v4981_v4 = vpack.i.bf16 %v8227_v2, %v6372_v0  ;;  %v4976_v26 = vpack.i.bf16 %v8229_v22, %v8228_v12  ;;  %v1835_v1 = vld [vmem:[%s8031_s5 + $0x38] sm:$0xff] }
 0x2c3   : > { %v1404_v5 = vsel %vm8211_vm4, %v4779_v8, %v4784_v54  ;;  %4095 = vmatpush1.bf16.msk.msra.mxu1 %vm5826_vm2, %v4094_v35  ;;  %4877 = vrot.lane.b32.xlu1 %v6060_v53, %s5553_s23  ;;  %v4097_v15 = vpack.c.bf16 %v1333_v52, %v1332_v23  ;;  %v8216_v53 = vld [vmem:[#allocation21_spill] sm:$0xff]  ;;  %v8225_v61 = vld [vmem:[#allocation18_spill] sm:$0xff]  ;;  %v1834_v18 = vld [vmem:[%s8031_s5 + $0x30] sm:$0xff] }
 0x2c4   : > { %v4100_v16 = vpack.c.bf16 %v1405_v42, %v1404_v5  ;;  %4892 = vrot.lane.b32.xlu0 %v6053_v48, %s5553_s23  ;;  %v4926_v48 = vpack.i.bf16 %v8215_v3, %v6302_v21  ;;  %v4956_v13 = vpack.i.bf16 %v6392_v30, %v8216_v53  ;;  %v4946_v21 = vpack.i.bf16 %v8222_v20, %v8221_v46  ;;  %v8226_v50 = vld [vmem:[#allocation14_spill] sm:$0xff]  ;;  %v1833_v0 = vld [vmem:[%s8031_s5 + $0x28] sm:$0xff]  ;;  %v1831_v27 = vld [vmem:[%s8031_s5 + $0x18] sm:$0xff] }
 0x2c5   : > { %2075 = vmatpush1.bf16.msra.mxu0 %v8212_v31  ;;  %4098 = vmatprep.subr.msk.bf16.mxu1 %vm5808_vm0, %v4097_v15  ;;  %v4971_v30 = vpack.i.bf16 %v8224_v29, %v8223_v34  ;;  %v4966_v32 = vpack.i.bf16 %v8226_v50, %v8225_v61  ;;  %v1832_v40 = vld [vmem:[%s8031_s5 + $0x20] sm:$0xff]  ;;  %v1830_v57 = vld [vmem:[%s8031_s5 + $0x10] sm:$0xff]  ;;  %v1829_v24 = vld [vmem:[%s8031_s5 + $0x8] sm:$0xff] }
 0x2c6   : > { %2076 = vmatprep.subr.bf16.mxu0 %v8213_v9  ;;  %2094 = vmatprep.mubr.bf16.mxu0 %v5492_v55  ;;  %v1828_v35 = vld [vmem:[%s8031_s5] sm:$0xff]  ;;  %vm8230_vm8 = vmmov %vm8199_vm1 }
 0x2c7   : > { %4101 = vmatpush1.bf16.msk.msra.mxu1 %vm5826_vm2, %v4100_v16  ;;  %4887 = vrot.lane.b32.xlu1 %v6038_v36, %s5553_s23  ;;  %v4951_v36 = vpack.i.bf16 %v6150_v62, %v6170_v41  ;;  %vm8231_vm13 = vmmov %vm8199_vm1 }
 0x2c8   : > { %4902 = vrot.lane.b32.xlu0 %v6032_v17, %s5553_s23  ;;  %v4941_v17 = vpack.i.bf16 %v6213_v38, %v6234_v25  ;;  %v8220_v25 = vld [vmem:[#allocation24_spill] sm:$0xff]  ;;  %vm8232_vm9 = vmmov %vm8199_vm1 }
 0x2c9   : > { %2077 = vmatpush1.bf16.msra.mxu0 %v8214_v14  ;;  %v4961_v41 = vpack.i.bf16 %v8220_v25, %v8219_v58  ;;  %vm8233_vm15 = vmmov %vm8199_vm1 }
 0x2ca   : > { %vm8234_vm6 = vmmov %vm8199_vm1 }
 0x2cb   : > { %4897 = vrot.lane.b32.xlu1 %v6018_v10, %s5553_s23  ;;  %v4916_v10 = vpack.i.bf16 %v6178_v44, %v6197_v59  ;;  %v4936_v59 = vpack.i.bf16 %v8218_v28, %v8217_v37  ;;  %vm8235_vm14 = vmmov %vm8199_vm1 }
 0x2cc   : > { %4922 = vrot.lane.b32.xlu0 %v4921_v63, %s5553_s23  ;;  %vm8236_vm10 = vmmov %vm8199_vm1 }
 0x2cd   : > { %vm8237_vm4 = vmmov %vm8199_vm1 }
 0x2cf   : > { %4907 = vrot.lane.b32.xlu1 %v4906_v19, %s5553_s23 }
 0x2d0   : > { %4932 = vrot.lane.b32.xlu0 %v4931_v60, %s5553_s23 }
 0x2d3   : > { %4912 = vrot.lane.b32.xlu1 %v4911_v11, %s5553_s23 }
 0x2d4   : > { %4942 = vrot.lane.b32.xlu0 %v4941_v17, %s5553_s23 }
 0x2d7   : > { %4917 = vrot.lane.b32.xlu1 %v4916_v10, %s5553_s23 }
 0x2d8   : > { %4952 = vrot.lane.b32.xlu0 %v4951_v36, %s5553_s23 }
 0x2db   : > { %4927 = vrot.lane.b32.xlu1 %v4926_v48, %s5553_s23 }
 0x2dc   : > { %4957 = vrot.lane.b32.xlu0 %v4956_v13, %s5553_s23 }
 0x2df   : > { %4937 = vrot.lane.b32.xlu1 %v4936_v59, %s5553_s23 }
 0x2e0   : > { %4962 = vrot.lane.b32.xlu0 %v4961_v41, %s5553_s23 }
 0x2e3   : > { %4947 = vrot.lane.b32.xlu1 %v4946_v21, %s5553_s23 }
 0x2e4   : > { %4972 = vrot.lane.b32.xlu0 %v4971_v30, %s5553_s23 }
 0x2e7   : > { %4967 = vrot.lane.b32.xlu1 %v4966_v32, %s5553_s23 }
 0x2e8   : > { %4982 = vrot.lane.b32.xlu0 %v4981_v4, %s5553_s23 }
 0x2eb   : > { %4977 = vrot.lane.b32.xlu1 %v4976_v26, %s5553_s23 }
 0x2ec   : > { %1873 = vperm.xlu0 %4664, %v1835_v1  }
 0x2ef   : > { %1868 = vperm.xlu1 %4665, %v1834_v18  }
 0x2f0   : > { %1863 = vperm.xlu0 %4664, %v1833_v0  }
 0x2f3   : > { %1858 = vperm.xlu1 %4665, %v1832_v40  }
 0x2f4   : > { %1853 = vperm.xlu0 %4664, %v1831_v27  }
 0x2f7   : > { %1848 = vperm.xlu1 %4665, %v1830_v57   ;;  %v8245_v57 = vpack.c.bf16 %v6150_v62, %v6147_v47  ;;  %v8254_v47 = vpack.c.bf16 %v6181_v33, %v6178_v44 }
 0x2f8   : > { %1843 = vperm.xlu0 %4664, %v1829_v24  }
 0x2fb   : > { %1838 = vperm.xlu1 %4665, %v1828_v35   ;;  %v8246_v35 = vld [vmem:[#allocation2_spill] sm:$0xff] }
 0x309   : > { %v4788_v49 = vpop.permute.xlu1 %4787 }
 0x30a   : > { %v4790_v54 = vunpack.i.h.bf16 %v4788_v49  ;;  %v4789_v45 = vunpack.i.l.bf16 %v4788_v49  ;;  %v8248_v49 = vmov 0 }
 0x30b   : > { %v4798_v8 = vpop.permute.xlu0 %4797 }
 0x30c   : > { %v4800_v56 = vunpack.i.h.bf16 %v4798_v8  ;;  %v4799_v7 = vunpack.i.l.bf16 %v4798_v8  ;;  %v8252_v8 = vld [vmem:[#allocation6_spill] sm:$0xff] }
 0x30d   : > { %v4793_v23 = vpop.permute.xlu1 %4792 }
 0x30e   : > { %v1331_v52 = vsel %vm8230_vm8, %v4800_v56, %v4790_v54  ;;  %v1403_v5 = vsel %vm8231_vm13, %v4790_v54, %v4800_v56  ;;  %v1330_v42 = vsel %vm8232_vm9, %v4799_v7, %v4789_v45  ;;  %v1402_v15 = vsel %vm8233_vm15, %v4789_v45, %v4799_v7  ;;  %vm8238_vm8 = vmmov %vm8199_vm1  ;;  %v8251_v45 = vld [vmem:[#allocation7_spill] sm:$0xff] }
 0x30f   : > { %v4795_v16 = vunpack.i.h.bf16 %v4793_v23  ;;  %v4794_v31 = vunpack.i.l.bf16 %v4793_v23  ;;  %v4803_v9 = vpop.permute.xlu0 %4802  ;;  %v4103_v14 = vpack.c.bf16 %v1331_v52, %v1330_v42  ;;  %v4106_v39 = vpack.c.bf16 %v1403_v5, %v1402_v15  ;;  %vm8239_vm13 = vmmov %vm8199_vm1  ;;  %v8255_v23 = vld [vmem:[#allocation9_spill] sm:$0xff]  ;;  %v8256_v52 = vld [vmem:[#allocation8_spill] sm:$0xff] }
 0x310   : > { %v4805_v63 = vunpack.i.h.bf16 %v4803_v9  ;;  %v4804_v19 = vunpack.i.l.bf16 %v4803_v9  ;;  %vm8240_vm9 = vmmov %vm8199_vm1  ;;  %v8253_v56 = vpack.c.bf16 %v8251_v45, %v8252_v8  ;;  %v8257_v5 = vpack.c.bf16 %v8255_v23, %v8256_v52 }
 0x311   : > { %4104 = vmatprep.subr.msk.bf16.mxu1 %vm5808_vm0, %v4103_v14  ;;  %v4808_v60 = vpop.permute.xlu1 %4807  ;;  %vm8241_vm15 = vmmov %vm8199_vm1  ;;  %v8258_v9 = vpack.c.bf16 %v6213_v38, %v8218_v28  ;;  %v8264_v38 = vpack.c.bf16 %v8224_v29, %v8226_v50 }
 0x312   : > { %v1329_v11 = vsel %vm8234_vm6, %v4805_v63, %v4795_v16  ;;  %v1401_v17 = vsel %vm8235_vm14, %v4795_v16, %v4805_v63  ;;  %v1328_v10 = vsel %vm8236_vm10, %v4804_v19, %v4794_v31  ;;  %v1400_v36 = vsel %vm8237_vm4, %v4794_v31, %v4804_v19  ;;  %4107 = vmatpush1.bf16.msk.msra.mxu1 %vm5826_vm2, %v4106_v39  ;;  %vm8242_vm6 = vmmov %vm8199_vm1  ;;  %v8259_v39 = vld [vmem:[#allocation12_spill] sm:$0xff]  ;;  %v8260_v63 = vld [vmem:[#allocation11_spill] sm:$0xff] }
 0x313   : > { %v4810_v3 = vunpack.i.h.bf16 %v4808_v60  ;;  %v4809_v48 = vunpack.i.l.bf16 %v4808_v60  ;;  %v4813_v53 = vpop.permute.xlu0 %4812  ;;  %v4109_v13 = vpack.c.bf16 %v1329_v11, %v1328_v10  ;;  %v4112_v37 = vpack.c.bf16 %v1401_v17, %v1400_v36  ;;  %vm8243_vm14 = vmmov %vm8199_vm1 }
 0x314   : > { %v4815_v59 = vunpack.i.h.bf16 %v4813_v53  ;;  %v4814_v58 = vunpack.i.l.bf16 %v4813_v53  ;;  %vm8244_vm10 = vmmov %vm8199_vm1  ;;  %vm8247_vm4 = vcmp.ge.s32.totalorder %v8246_v35, 16  ;;  %v8261_v19 = vpack.c.bf16 %v8259_v39, %v8260_v63 }
 0x315   : > { %4110 = vmatprep.subr.msk.bf16.mxu1 %vm5808_vm0, %v4109_v13  ;;  %v4818_v25 = vpop.permute.xlu1 %4817 }
 0x316   : > { %v1327_v41 = vsel %vm8199_vm1, %v4815_v59, %v4810_v3  ;;  %v1399_v46 = vsel %vm8238_vm8, %v4810_v3, %v4815_v59  ;;  %v1326_v20 = vsel %vm8239_vm13, %v4814_v58, %v4809_v48  ;;  %v1398_v21 = vsel %vm8240_vm9, %v4809_v48, %v4814_v58  ;;  %4113 = vmatpush1.bf16.msk.msra.mxu1 %vm5826_vm2, %v4112_v37  ;;  %vm6577_vm1 = vmpackc.low %vm8247_vm4, %vm8247_vm4 }
 0x317   : > { %v4820_v34 = vunpack.i.h.bf16 %v4818_v25  ;;  %v4819_v30 = vunpack.i.l.bf16 %v4818_v25  ;;  %v4115_v55 = vpack.c.bf16 %v1327_v41, %v1326_v20  ;;  %v4118_v61 = vpack.c.bf16 %v1399_v46, %v1398_v21  ;;  %v4823_v32 = vpop.permute.xlu0 %4822  ;;  %vm8262_vm8 = vmmov %vm8242_vm6  ;;  %v8267_v20 = vld [vmem:[#allocation17_spill] sm:$0xff]  ;;  %v8268_v21 = vld [vmem:[#allocation16_spill] sm:$0xff] }
 0x318   : > { %v4825_v2 = vunpack.i.h.bf16 %v4823_v32  ;;  %v4824_v4 = vunpack.i.l.bf16 %v4823_v32  ;;  %v8249_v49 = vsel %vm6577_vm1, 4294967295, %v8248_v49  ;;  %vm8263_vm13 = vmmov %vm8242_vm6 }
 0x319   : > { %4116 = vmatprep.subr.msk.bf16.mxu1 %vm5808_vm0, %v4115_v55  ;;  %8250 = vst [vmem:[#allocation22_spill] sm:$0xff] %v8249_v49  ;;  %vm8265_vm9 = vmmov %vm8242_vm6 }
 0x31a   : > { %4119 = vmatpush1.bf16.msk.msra.mxu1 %vm5826_vm2, %v4118_v61  ;;  %v1324_v12 = vsel %vm8241_vm15, %v4824_v4, %v4819_v30  ;;  %v1325_v22 = vsel %vm8242_vm6, %v4825_v2, %v4820_v34  ;;  %v1396_v26 = vsel %vm8243_vm14, %v4819_v30, %v4824_v4  ;;  %v1397_v1 = vsel %vm8244_vm10, %v4820_v34, %v4825_v2  ;;  %vm8266_vm15 = vmmov %vm8242_vm6 }
 0x31b   : > { %v4121_v0 = vpack.c.bf16 %v1325_v22, %v1324_v12  ;;  %v4124_v40 = vpack.c.bf16 %v1397_v1, %v1396_v26  ;;  %v8269_v34 = vpack.c.bf16 %v8267_v20, %v8268_v21  ;;  %vm8270_vm14 = vmmov %vm8242_vm6 }
 0x31c   : > { %v4828_v18 = vpop.permute.xlu0 %4827  ;;  %vm8271_vm10 = vmmov %vm8242_vm6 }
 0x31d   : > { %4122 = vmatprep.subr.msk.bf16.mxu1 %vm5808_vm0, %v4121_v0  ;;  %v4830_v33 = vunpack.i.h.bf16 %v4828_v18  ;;  %v4829_v14 = vunpack.i.l.bf16 %v4828_v18  ;;  %vm8272_vm4 = vmmov %vm8242_vm6 }
 0x31e   : > { %v4833_v27 = vpop.permute.xlu1 %4832  ;;  %4125 = vmatpush1.bf16.msk.msra.mxu1 %vm5826_vm2, %v4124_v40 }
 0x31f   : > { %2005 = vmatprep.subr.bf16.mxu1 %v8245_v57  ;;  %v4835_v42 = vunpack.i.h.bf16 %v4833_v27  ;;  %v4834_v15 = vunpack.i.l.bf16 %v4833_v27 }
 0x320   : > { %v4838_v24 = vpop.permute.xlu0 %4837 }
 0x321   : > { %v4840_v16 = vunpack.i.h.bf16 %v4838_v24  ;;  %v4839_v31 = vunpack.i.l.bf16 %v4838_v24 }
 0x322   : > { %4128 = vmatpush2.bf16.msk.msra.mxu1 %vm6577_vm1, %v8253_v56 }
 0x323   : > { %v6581_v54 = vpop.permute.xlu1 %4842  ;;  %2007 = vmatprep.subr.bf16.mxu1 %v8254_v47  ;;  %v1344_v11 = vsel %vm8262_vm8, %v4839_v31, %v4834_v15  ;;  %v1345_v17 = vsel %vm8263_vm13, %v4840_v16, %v4835_v42  ;;  %v6616_v3 = vsel %vm8265_vm9, %v4834_v15, %v4839_v31  ;;  %v6619_v48 = vsel %vm8266_vm15, %v4835_v42, %v4840_v16  ;;  %vm8274_vm8 = vmmov %vm8272_vm4 }
 0x324   : > { %v6591_v62 = vpop.permute.xlu0 %4847  ;;  %v4845_v37 = vunpack.i.h.bf16 %v6581_v54  ;;  %v4844_v59 = vunpack.i.l.bf16 %v6581_v54  ;;  %v4145_v26 = vpack.c.bf16 %v1345_v17, %v1344_v11  ;;  %v4148_v1 = vpack.c.bf16 %v6619_v48, %v6616_v3  ;;  %vm8275_vm13 = vmmov %vm8272_vm4 }
 0x325   : > { %v4850_v29 = vunpack.i.h.bf16 %v6591_v62  ;;  %v4849_v50 = vunpack.i.l.bf16 %v6591_v62  ;;  %vm8277_vm9 = vmmov %vm8272_vm4 }
 0x326   : > { %4131 = vmatpush2.bf16.msk.msra.mxu1 %vm6577_vm1, %v8257_v5  ;;  %vm8278_vm15 = vmmov %vm8272_vm4 }
 0x327   : > { %v6593_v7 = vpop.permute.xlu1 %4852  ;;  %2009 = vmatprep.subr.bf16.mxu1 %v8258_v9  ;;  %v1342_v24 = vsel %vm8274_vm8, %v4849_v50, %v4844_v59  ;;  %v1343_v54 = vsel %vm8275_vm13, %v4850_v29, %v4845_v37  ;;  %vm1976_vm8 = vcmask 523264  }
 0x328   : > { %v6603_v44 = vpop.permute.xlu0 %4857  ;;  %v4854_v62 = vunpack.i.l.bf16 %v6593_v7  ;;  %v4855_v15 = vunpack.i.h.bf16 %v6593_v7  ;;  %v1414_v7 = vsel %vm8277_vm9, %v4844_v59, %v4849_v50 }
 0x329   : > { %v4859_v23 = vunpack.i.l.bf16 %v6603_v44  ;;  %v4860_v16 = vunpack.i.h.bf16 %v6603_v44  ;;  %v1415_v44 = vsel %vm8278_vm15, %v4845_v37, %v4850_v29 }
 0x32a   : > { %4134 = vmatpush2.bf16.msk.msra.mxu1 %vm6577_vm1, %v8261_v19  ;;  %v4154_v21 = vpack.c.bf16 %v1415_v44, %v1414_v7  ;;  %v5484_v7 = vld [vmem:[%s8030_s4 + $0x54] ss:$20 sps:$4 sm:$0xff]  }
 0x32b   : > { %v4863_v60 = vpop.permute.xlu1 %4862  ;;  %2011 = vmatprep.subr.bf16.mxu1 %v8264_v38 }
 0x32c   : > { %v4865_v10 = vunpack.i.h.bf16 %v4863_v60  ;;  %v4864_v36 = vunpack.i.l.bf16 %v4863_v60  ;;  %v4868_v28 = vpop.permute.xlu0 %4867 }
 0x32d   : > { %v4870_v53 = vunpack.i.h.bf16 %v4868_v28  ;;  %v4869_v13 = vunpack.i.l.bf16 %v4868_v28  ;;  %v4151_v28 = vpack.c.bf16 %v1343_v54, %v1342_v24 }
 0x32e   : > { %v1578_v58 = vsel %vm607_vm11, %v4864_v36, %v4865_v10  ;;  %v1674_v25 = vsel %vm607_vm11, %v4865_v10, %v4864_v36  ;;  %4137 = vmatpush2.bf16.msk.msra.mxu1 %vm6577_vm1, %v8269_v34 }
 0x32f   : > { %v1579_v41 = vsel %vm607_vm11, %v4869_v13, %v4870_v53  ;;  %v1675_v46 = vsel %vm607_vm11, %v4870_v53, %v4869_v13 }
 0x330   : > { %v4178_v55 = vpack.c.bf16 %v1579_v41, %v1578_v58  ;;  %v4175_v4 = vpack.c.bf16 %v1675_v46, %v1674_v25 }
 0x331   : > { %v4873_v30 = vpop.permute.xlu1 %4872  ;;  %v4883_v2 = vpop.permute.xlu0 %4882 }
 0x332   : > { %v4875_v61 = vunpack.i.h.bf16 %v4873_v30  ;;  %v4874_v32 = vunpack.i.l.bf16 %v4873_v30  ;;  %v4885_v12 = vunpack.i.h.bf16 %v4883_v2  ;;  %v4884_v22 = vunpack.i.l.bf16 %v4883_v2  ;;  %4176 = vmatprep.subr.msk.bf16.mxu0 %vm5951_vm7, %v4175_v4 }
 0x333   : > { %4179 = vmatpush2.bf16.msk.msra.mxu0 %vm5966_vm12, %v4178_v55  ;;  %v1413_v30 = vsel %vm8272_vm4, %v4855_v15, %v4860_v16 }
 0x334   : > { %v1347_v18 = vsel %vm8242_vm6, %v4830_v33, %v4875_v61  ;;  %v1419_v0 = vsel %vm8270_vm14, %v4875_v61, %v4830_v33  ;;  %v1346_v40 = vsel %vm8271_vm10, %v4829_v14, %v4874_v32  ;;  %v1418_v27 = vsel %vm8272_vm4, %v4874_v32, %v4829_v14  ;;  %vm8279_vm6 = vmmov %vm8272_vm4 }
 0x335   : > { %v4878_v45 = vpop.permute.xlu1 %4877  ;;  %v4139_v56 = vpack.c.bf16 %v1347_v18, %v1346_v40  ;;  %v4142_v47 = vpack.c.bf16 %v1419_v0, %v1418_v27  ;;  %v1577_v33 = vsel %vm607_vm11, %v4884_v22, %v4885_v12  ;;  %v1673_v14 = vsel %vm607_vm11, %v4885_v12, %v4884_v22  ;;  %vm8280_vm14 = vmmov %vm8272_vm4  ;;  %v5478_v0 = vld [vmem:[%s8030_s4] ss:$20 sps:$4 sm:$0xff]  }
 0x336   : > { %v4880_v52 = vunpack.i.h.bf16 %v4878_v45  ;;  %v4879_v5 = vunpack.i.l.bf16 %v4878_v45  ;;  %v4893_v42 = vpop.permute.xlu0 %4892  ;;  %v1340_v17 = vsel %vm8279_vm6, %v4859_v23, %v4854_v62  ;;  %v1341_v3 = vsel %vm8280_vm14, %v4860_v16, %v4855_v15  ;;  %vm8281_vm10 = vmmov %vm8272_vm4  ;;  %v5481_v40 = vld [vmem:[%s8030_s4 + $0x2c] ss:$20 sps:$4 sm:$0xff]  }
 0x337   : > { %v4895_v31 = vunpack.i.h.bf16 %v4893_v42  ;;  %v4894_v9 = vunpack.i.l.bf16 %v4893_v42  ;;  %4140 = vmatprep.subr.msk.bf16.mxu1 %vm5808_vm0, %v4139_v56  ;;  %v1412_v34 = vsel %vm8281_vm10, %v4854_v62, %v4859_v23  ;;  %v4157_v61 = vpack.c.bf16 %v1341_v3, %v1340_v17 }
 0x338   : > { %v1576_v39 = vsel %vm607_vm11, %v4879_v5, %v4880_v52  ;;  %v1672_v63 = vsel %vm607_vm11, %v4880_v52, %v4879_v5  ;;  %4143 = vmatpush2.bf16.msk.msra.mxu1 %vm5826_vm2, %v4142_v47  ;;  %v4160_v18 = vpack.c.bf16 %v1413_v30, %v1412_v34 }
 0x339   : > { %v4184_v19 = vpack.c.bf16 %v1577_v33, %v1576_v39  ;;  %v4888_v60 = vpop.permute.xlu1 %4887  ;;  %4146 = vmatprep.subr.msk.bf16.mxu1 %vm5808_vm0, %v4145_v26  ;;  %v4181_v11 = vpack.c.bf16 %v1673_v14, %v1672_v63  ;;  %v1575_v48 = vsel %vm607_vm11, %v4894_v9, %v4895_v31  ;;  %v1671_v37 = vsel %vm607_vm11, %v4895_v31, %v4894_v9  ;;  %v5483_v9 = vld [vmem:[%s8030_s4 + $0x28] ss:$20 sps:$4 sm:$0xff]  }
 0x33a   : > { %v4890_v10 = vunpack.i.h.bf16 %v4888_v60  ;;  %v4889_v36 = vunpack.i.l.bf16 %v4888_v60  ;;  %v4903_v38 = vpop.permute.xlu0 %4902 }
 0x33b   : > { %v4905_v53 = vunpack.i.h.bf16 %v4903_v38  ;;  %v4904_v13 = vunpack.i.l.bf16 %v4903_v38  ;;  %4182 = vmatprep.subr.msk.bf16.mxu0 %vm5951_vm7, %v4181_v11 }
 0x33c   : > { %v1574_v59 = vsel %vm607_vm11, %v4889_v36, %v4890_v10  ;;  %v1670_v58 = vsel %vm607_vm11, %v4890_v10, %v4889_v36  ;;  %4149 = vmatpush2.bf16.msk.msra.mxu1 %vm5826_vm2, %v4148_v1  ;;  %4185 = vmatpush2.bf16.msk.msra.mxu0 %vm5966_vm12, %v4184_v19 }
 0x33d   : > { %v4190_v25 = vpack.c.bf16 %v1575_v48, %v1574_v59  ;;  %v4898_v29 = vpop.permute.xlu1 %4897  ;;  %4152 = vmatprep.subr.msk.bf16.mxu1 %vm5808_vm0, %v4151_v28  ;;  %v4187_v50 = vpack.c.bf16 %v1671_v37, %v1670_v58  ;;  %v1573_v55 = vsel %vm607_vm11, %v4904_v13, %v4905_v53  ;;  %v1669_v32 = vsel %vm607_vm11, %v4905_v53, %v4904_v13 }
 0x33e   : > { %v4900_v41 = vunpack.i.h.bf16 %v4898_v29  ;;  %v4899_v46 = vunpack.i.l.bf16 %v4898_v29  ;;  %v4923_v20 = vpop.permute.xlu0 %4922 }
 0x33f   : > { %4188 = vmatprep.subr.msk.bf16.mxu0 %vm5951_vm7, %v4187_v50  ;;  %v4925_v54 = vunpack.i.h.bf16 %v4923_v20  ;;  %v4924_v45 = vunpack.i.l.bf16 %v4923_v20 }
 0x340   : > { %v1572_v2 = vsel %vm607_vm11, %v4899_v46, %v4900_v41  ;;  %v1668_v4 = vsel %vm607_vm11, %v4900_v41, %v4899_v46  ;;  %4155 = vmatpush2.bf16.msk.msra.mxu1 %vm5826_vm2, %v4154_v21  ;;  %4191 = vmatpush2.bf16.msk.msra.mxu0 %vm5966_vm12, %v4190_v25 }
 0x341   : > { %v4196_v12 = vpack.c.bf16 %v1573_v55, %v1572_v2  ;;  %v4908_v22 = vpop.permute.xlu1 %4907  ;;  %4158 = vmatprep.subr.msk.bf16.mxu1 %vm5808_vm0, %v4157_v61  ;;  %v4193_v26 = vpack.c.bf16 %v1669_v32, %v1668_v4  ;;  %v1569_v42 = vsel %vm607_vm11, %v4924_v45, %v4925_v54  ;;  %v1665_v15 = vsel %vm607_vm11, %v4925_v54, %v4924_v45 }
 0x342   : > { %v6690_v1 = vpop.permute.xlu0 %4932  ;;  %v4910_v56 = vunpack.i.h.bf16 %v4908_v22  ;;  %v4909_v47 = vunpack.i.l.bf16 %v4908_v22 }
 0x343   : > { %4194 = vmatprep.subr.msk.bf16.mxu0 %vm5951_vm7, %v4193_v26  ;;  %v4935_v14 = vunpack.i.h.bf16 %v6690_v1  ;;  %v4934_v48 = vunpack.i.l.bf16 %v6690_v1 }
 0x344   : > { %4161 = vmatpush2.bf16.msk.msra.mxu1 %vm5826_vm2, %v4160_v18  ;;  %4197 = vmatpush2.bf16.msk.msra.mxu0 %vm5966_vm12, %v4196_v12  ;;  %v1570_v33 = vsel %vm607_vm11, %v4909_v47, %v4910_v56  ;;  %v1666_v44 = vsel %vm607_vm11, %v4910_v56, %v4909_v47  ;;  %v5486_v12 = vld [vmem:[%s8030_s4 + $0x50] ss:$20 sps:$4 sm:$0xff]  }
 0x345   : > { %v4913_v27 = vpop.permute.xlu1 %4912  ;;  %v1681_v2 = vsel %vm607_vm11, %v4935_v14, %v4934_v48 }
 0x346   : > { %v6704_v24 = vpop.permute.xlu0 %4942  ;;  %v4915_v39 = vunpack.i.h.bf16 %v4913_v27  ;;  %v4914_v63 = vunpack.i.l.bf16 %v4913_v27 }
 0x347   : > { %2022 = vmatmul.mubr.bf16.vlgmr.msra.gmra.mxu1 %v5478_v0  ;;  %v4945_v53 = vunpack.i.h.bf16 %v6704_v24  ;;  %v4944_v58 = vunpack.i.l.bf16 %v6704_v24  ;;  %v5487_v0 = vld [vmem:[%s8030_s4 + $0x7c] ss:$20 sps:$4 sm:$0xff]  }
 0x348   : > { %2031 = vmatprep.mubr.bf16.mxu1 %v5481_v40  ;;  %v1586_v59 = vsel %vm607_vm11, %v4914_v63, %v4915_v39  ;;  %v1682_v50 = vsel %vm607_vm11, %v4915_v39, %v4914_v63  ;;  %v1585_v40 = vsel %vm607_vm11, %v4934_v48, %v4935_v14 }
 0x349   : > { %v4918_v62 = vpop.permute.xlu1 %4917  ;;  %v1663_v27 = vsel %vm607_vm11, %v4945_v53, %v4944_v58  ;;  %v1567_v56 = vsel %vm607_vm11, %v4944_v58, %v4945_v53 }
 0x34a   : > { %v4920_v23 = vunpack.i.h.bf16 %v4918_v62  ;;  %v4919_v52 = vunpack.i.l.bf16 %v4918_v62  ;;  %v4953_v5 = vpop.permute.xlu0 %4952 }
 0x34b   : > { %v4955_v16 = vunpack.i.h.bf16 %v4953_v5  ;;  %v4954_v31 = vunpack.i.l.bf16 %v4953_v5 }
 0x34c   : > { %v1664_v19 = vsel %vm607_vm11, %v4920_v23, %v4919_v52  ;;  %v1568_v25 = vsel %vm607_vm11, %v4919_v52, %v4920_v23 }
 0x34d   : > { %v1571_v60 = vsel %vm607_vm11, %v4954_v31, %v4955_v16  ;;  %v1667_v11 = vsel %vm607_vm11, %v4955_v16, %v4954_v31  ;;  %v4928_v17 = vpop.permute.xlu1 %4927  ;;  %v4205_v29 = vpack.c.bf16 %v1665_v15, %v1664_v19  ;;  %v4208_v4 = vpack.c.bf16 %v1569_v42, %v1568_v25  ;;  %v5490_v25 = vld [vmem:[%s8030_s4 + $0x8] ss:$20 sps:$4 sm:$0xff]  }
 0x34e   : > { %v4202_v10 = vpack.c.bf16 %v1571_v60, %v1570_v33  ;;  %v4930_v36 = vunpack.i.h.bf16 %v4928_v17  ;;  %v4929_v38 = vunpack.i.l.bf16 %v4928_v17  ;;  %v4958_v28 = vpop.permute.xlu0 %4957  ;;  %v4199_v3 = vpack.c.bf16 %v1667_v11, %v1666_v44 }
 0x34f   : > { %v4960_v13 = vunpack.i.h.bf16 %v4958_v28  ;;  %v4959_v37 = vunpack.i.l.bf16 %v4958_v28  ;;  %2032 = vmatmul.mubr.bf16.gmra.mxu1 %v5483_v9 }
 0x350   : > { %4200 = vmatprep.subr.msk.bf16.mxu0 %vm5951_vm7, %v4199_v3  ;;  %2041 = vmatprep.mubr.bf16.mxu1 %v5484_v7  ;;  %v1680_v41 = vsel %vm607_vm11, %v4930_v36, %v4929_v38  ;;  %v1584_v22 = vsel %vm607_vm11, %v4929_v38, %v4930_v36 }
 0x351   : > { %v1587_v46 = vsel %vm607_vm11, %v4959_v37, %v4960_v13  ;;  %v1683_v20 = vsel %vm607_vm11, %v4960_v13, %v4959_v37  ;;  %v4938_v21 = vpop.permute.xlu1 %4937  ;;  %4203 = vmatpush2.bf16.msk.msra.mxu0 %vm5966_vm12, %v4202_v10  ;;  %v4229_v18 = vpack.c.bf16 %v1681_v2, %v1680_v41  ;;  %v4232_v5 = vpack.c.bf16 %v1585_v40, %v1584_v22  ;;  %v5489_v10 = vld [vmem:[%s8030_s4 + $0x78] ss:$20 sps:$4 sm:$0xff]   ;;  %v5504_v22 = vld [vmem:[%s8030_s4 + $0x80] ss:$20 sps:$4 sm:$0xff]  }
 0x352   : > { %v4226_v34 = vpack.c.bf16 %v1587_v46, %v1586_v59  ;;  %v4940_v30 = vunpack.i.h.bf16 %v4938_v21  ;;  %v4939_v55 = vunpack.i.l.bf16 %v4938_v21  ;;  %v4963_v61 = vpop.permute.xlu0 %4962  ;;  %4206 = vmatprep.subr.msk.bf16.mxu0 %vm5951_vm7, %v4205_v29  ;;  %v4223_v32 = vpack.c.bf16 %v1683_v20, %v1682_v50  ;;  %v5494_v20 = vld [vmem:[%s8030_s4 + $0x34] ss:$20 sps:$4 sm:$0xff]   ;;  %v5500_v2 = vld [vmem:[%s8030_s4 + $0x58] ss:$20 sps:$4 sm:$0xff]  }
 0x353   : > { %v4965_v24 = vunpack.i.h.bf16 %v4963_v61  ;;  %v4964_v54 = vunpack.i.l.bf16 %v4963_v61  ;;  %v8282_v46 = vmov 0   ;;  %v5498_v61 = vld [vmem:[%s8030_s4 + $0x5c] ss:$20 sps:$4 sm:$0xff]  }
 0x354   : > { %v1566_v26 = vsel %vm607_vm11, %v4939_v55, %v4940_v30  ;;  %v1662_v1 = vsel %vm607_vm11, %v4940_v30, %v4939_v55  ;;  %4224 = vmatprep.subr.msk.bf16.mxu1 %vm5951_vm7, %v4223_v32  ;;  %v5493_v30 = vld [vmem:[%s8030_s4 + $0x10] ss:$20 sps:$4 sm:$0xff]   ;;  %v5497_v32 = vld [vmem:[%s8030_s4 + $0x38] ss:$20 sps:$4 sm:$0xff]  }
 0x355   : > { %v4948_v45 = vpop.permute.xlu1 %4947  ;;  %4209 = vmatpush2.bf16.msk.msra.mxu0 %vm5966_vm12, %v4208_v4  ;;  %4227 = vmatpush1.bf16.msk.msra.mxu1 %vm5966_vm12, %v4226_v34  ;;  %v4211_v52 = vpack.c.bf16 %v1663_v27, %v1662_v1  ;;  %v4214_v42 = vpack.c.bf16 %v1567_v56, %v1566_v26  ;;  %v1679_v33 = vsel %vm607_vm11, %v4965_v24, %v4964_v54  ;;  %v5496_v55 = vld [vmem:[%s8030_s4 + $0x30] ss:$20 sps:$4 sm:$0xff]   ;;  %v5505_v26 = vld [vmem:[%s8030_s4 + $0x88] ss:$20 sps:$4 sm:$0xff]  }
 0x356   : > { %v4950_v47 = vunpack.i.h.bf16 %v4948_v45  ;;  %v4949_v62 = vunpack.i.l.bf16 %v4948_v45  ;;  %v4973_v23 = vpop.permute.xlu0 %4972  ;;  %4230 = vmatprep.subr.msk.bf16.mxu1 %vm5951_vm7, %v4229_v18  ;;  %v1583_v39 = vsel %vm607_vm11, %v4964_v54, %v4965_v24  ;;  %v5502_v4 = vld [vmem:[%s8030_s4 + $0x84] ss:$20 sps:$4 sm:$0xff]  }
 0x357   : > { %2042 = vmatmul.mubr.bf16.gmra.mxu1 %v5486_v12  ;;  %v4975_v31 = vunpack.i.h.bf16 %v4973_v23  ;;  %v4974_v9 = vunpack.i.l.bf16 %v4973_v23  ;;  %4212 = vmatprep.subr.msk.bf16.mxu0 %vm5951_vm7, %v4211_v52  ;;  %v5501_v12 = vld [vmem:[%s8030_s4 + $0x60] ss:$20 sps:$4 sm:$0xff]  }
 0x358   : > { %v1582_v15 = vsel %vm607_vm11, %v4949_v62, %v4950_v47  ;;  %v1678_v16 = vsel %vm607_vm11, %v4950_v47, %v4949_v62  ;;  %2051 = vmatprep.mubr.bf16.mxu1 %v5487_v0 }
 0x359   : > { %v4968_v14 = vpop.permute.xlu1 %4967  ;;  %4215 = vmatpush2.bf16.msk.msra.mxu0 %vm5966_vm12, %v4214_v42  ;;  %4233 = vmatpush1.bf16.msk.msra.mxu1 %vm5966_vm12, %v4232_v5  ;;  %v4235_v19 = vpack.c.bf16 %v1679_v33, %v1678_v16  ;;  %v4238_v60 = vpack.c.bf16 %v1583_v39, %v1582_v15  ;;  %v1565_v36 = vsel %vm607_vm11, %v4974_v9, %v4975_v31 }
 0x35a   : > { %v4970_v63 = vunpack.i.h.bf16 %v4968_v14  ;;  %v4969_v7 = vunpack.i.l.bf16 %v4968_v14  ;;  %v4983_v44 = vpop.permute.xlu0 %4982  ;;  %v1661_v38 = vsel %vm607_vm11, %v4975_v31, %v4974_v9 }
 0x35b   : > { %v4985_v11 = vunpack.i.h.bf16 %v4983_v44  ;;  %v4984_v17 = vunpack.i.l.bf16 %v4983_v44  ;;  %4236 = vmatprep.subr.msk.bf16.mxu1 %vm5951_vm7, %v4235_v19 }
 0x35c   : > { %v1564_v28 = vsel %vm607_vm11, %v4969_v7, %v4970_v63  ;;  %v1660_v3 = vsel %vm607_vm11, %v4970_v63, %v4969_v7 }
 0x35d   : > { %v4220_v48 = vpack.c.bf16 %v1565_v36, %v1564_v28  ;;  %v4978_v53 = vpop.permute.xlu1 %4977  ;;  %4239 = vmatpush1.bf16.msk.msra.mxu1 %vm5966_vm12, %v4238_v60  ;;  %v4217_v13 = vpack.c.bf16 %v1661_v38, %v1660_v3  ;;  %v1581_v58 = vsel %vm607_vm11, %v4984_v17, %v4985_v11  ;;  %v1677_v29 = vsel %vm607_vm11, %v4985_v11, %v4984_v17 }
 0x35e   : > { %v4980_v37 = vunpack.i.h.bf16 %v4978_v53  ;;  %v4979_v59 = vunpack.i.l.bf16 %v4978_v53 }
 0x35f   : > { %2052 = vmatmul.mubr.bf16.gmra.mxu1 %v5489_v10  ;;  %4218 = vmatprep.subr.msk.bf16.mxu0 %vm5951_vm7, %v4217_v13 }
 0x360   : > { %v1580_v50 = vsel %vm607_vm11, %v4979_v59, %v4980_v37  ;;  %v1676_v41 = vsel %vm607_vm11, %v4980_v37, %v4979_v59  ;;  %4221 = vmatpush2.bf16.msk.msra.mxu0 %vm5966_vm12, %v4220_v48  ;;  %2167 = vmatprep.mubr.bf16.mxu1 %v8282_v46 }
 0x361   : > { %v4244_v21 = vpack.c.bf16 %v1581_v58, %v1580_v50  ;;  %v4241_v34 = vpack.c.bf16 %v1677_v29, %v1676_v41 }
 0x363   : > { %2095 = vmatmul.mubr.bf16.vlgmr.msra.gmra.mxu0 %v5490_v25  ;;  %4242 = vmatprep.subr.msk.bf16.mxu1 %vm5951_vm7, %v4241_v34 }
 0x364   : > { %4245 = vmatpush1.bf16.msk.msra.mxu1 %vm5966_vm12, %v4244_v21  ;;  %2104 = vmatprep.mubr.bf16.mxu0 %v5494_v20 }
 0x367   : > { %4246 = vmatmul.mubr.msk.bf16.vlgmr.msra.gmra.mxu1 %vm1976_vm8, %v5493_v30  ;;  %v6832_v47 = vpop.permute.xlu0 %1873 }
 0x368   : > { %2177 = vmatprep.mubr.bf16.mxu1 %v8282_v46 }
 0x36a   : > { %v6830_v24 = vpop.permute.xlu1 %1868 }
 0x36b   : > { %2105 = vmatmul.mubr.bf16.gmra.mxu0 %v5496_v55  ;;  %v6842_v42 = vpop.permute.xlu0 %1863 }
 0x36c   : > { %2114 = vmatprep.mubr.bf16.mxu0 %v5498_v61 }
 0x36e   : > { %v6834_v62 = vpop.permute.xlu1 %1858 }
 0x36f   : > { %4247 = vmatmul.mubr.msk.bf16.gmra.mxu1 %vm1976_vm8, %v5497_v32  ;;  %v1854_v33 = vpop.permute.xlu0 %1853 }
 0x370   : > { %2187 = vmatprep.mubr.bf16.mxu1 %v8282_v46 }
 0x372   : > { %v1849_v15 = vpop.permute.xlu1 %1848 }
 0x373   : > { %2115 = vmatmul.mubr.bf16.gmra.mxu0 %v5500_v2  ;;  %v1844_v36 = vpop.permute.xlu0 %1843 }
 0x374   : > { %2124 = vmatprep.mubr.bf16.mxu0 %v5502_v4 }
 0x376   : > { %v1839_v14 = vpop.permute.xlu1 %1838 }
 0x377   : > { %4248 = vmatmul.mubr.msk.bf16.gmra.mxu1 %vm1976_vm8, %v5501_v12 }
 0x378   : > { %2197 = vmatprep.mubr.bf16.mxu1 %v8282_v46 }
 0x37b   : > { %2125 = vmatmul.mubr.bf16.gmra.mxu0 %v5504_v22 }
 0x37f   : > { %4249 = vmatmul.mubr.msk.bf16.gmra.mxu1 %vm1976_vm8, %v5505_v26 }
 0x407   : > { %v2023_v1 = vpop.f32.mrf.mxu1 }
 0x408   : > { %v2024_v7 = vadd.f32 %v2023_v1, %v1839_v14 }
 0x409   : > { %v2025_v18 = vpop.f32.mrf.mxu1 }
 0x40a   : > { %v2026_v60 = vadd.f32 %v2025_v18, %v1839_v14 }
 0x40b   : > { %v2027_v0 = vpop.f32.mrf.mxu1 }
 0x40c   : > { %v2028_v3 = vadd.f32 %v2027_v0, %v1844_v36 }
 0x40d   : > { %v2029_v40 = vpop.f32.mrf.mxu1 }
 0x40e   : > { %v2030_v13 = vadd.f32 %v2029_v40, %v1844_v36 }
 0x40f   : > { %v2033_v27 = vpop.f32.mrf.mxu1 }
 0x410   : > { %v2034_v50 = vadd.f32 %v2033_v27, %v1849_v15 }
 0x411   : > { %v2035_v54 = vpop.f32.mrf.mxu1 }
 0x412   : > { %v2036_v4 = vadd.f32 %v2035_v54, %v1849_v15 }
 0x413   : > { %v2037_v45 = vpop.f32.mrf.mxu1 }
 0x414   : > { %v2038_v18 = vadd.f32 %v2037_v45, %v1854_v33 }
 0x415   : > { %v2039_v56 = vpop.f32.mrf.mxu1 }
 0x417   : > { %v6836_v23 = vpop.f32.mrf.mxu1 }
 0x418   : > { %v2044_v36 = vadd.f32 %v6836_v23, %v6834_v62 }
 0x419   : > { %v6838_v52 = vpop.f32.mrf.mxu1 }
 0x41b   : > { %v6840_v5 = vpop.f32.mrf.mxu1 }
 0x41d   : > { %v6844_v16 = vpop.f32.mrf.mxu1 }
 0x41f   : > { %v6846_v31 = vpop.f32.mrf.mxu1 }
 0x421   : > { %v6848_v9 = vpop.f32.mrf.mxu1 }
 0x423   : > { %v6850_v39 = vpop.f32.mrf.mxu1  ;;  %v2096_v63 = vpop.f32.mrf.mxu0 }
 0x424   : > { %v2097_v11 = vadd.f32 %v2096_v63, %v2024_v7 }
 0x425   : > { %v6852_v44 = vpop.f32.mrf.mxu1  ;;  %v2098_v19 = vpop.f32.mrf.mxu0 }
 0x426   : > { %v2099_v38 = vadd.f32 %v2098_v19, %v2026_v60  ;;  %v2040_v19 = vadd.f32 %v2039_v56, %v1854_v33  ;;  %v2046_v33 = vadd.f32 %v6838_v52, %v6834_v62 }
 0x427   : > { %v2100_v17 = vpop.f32.mrf.mxu0  ;;  %v2169_v10 = vpop.f32.mrf.mxu1 }
 0x428   : > { %v2170_v28 = vadd.f32 %v2169_v10, %v2097_v11  ;;  %v2101_v58 = vadd.f32 %v2100_v17, %v2028_v3  ;;  %v2048_v3 = vadd.f32 %v6840_v5, %v6842_v42 }
 0x429   : > { %v2102_v48 = vpop.f32.mrf.mxu0  ;;  %v2171_v53 = vpop.f32.mrf.mxu1 }
 0x42a   : > { %v2224_v37 = vmul.f32 0.01, %v2170_v28  ;;  %v2172_v59 = vadd.f32 %v2171_v53, %v2099_v38  ;;  %vm2208_vm13 = vcmp.ge.f32.partialorder %v2170_v28, 0.0  ;;  %v2103_v41 = vadd.f32 %v2102_v48, %v2030_v13 }
 0x42b   : > { %v2106_v25 = vpop.f32.mrf.mxu0  ;;  %v2173_v29 = vpop.f32.mrf.mxu1 }
 0x42c   : > { %vm2209_vm9 = vcmp.ge.f32.partialorder %v2172_v59, 0.0  ;;  %v2225_v20 = vmul.f32 0.01, %v2172_v59  ;;  %v2174_v21 = vadd.f32 %v2173_v29, %v2101_v58  ;;  %v6854_v55 = vsel %vm2208_vm13, %v2170_v28, %v2224_v37 }
 0x42d   : > { %v2108_v34 = vpop.f32.mrf.mxu0  ;;  %v2175_v30 = vpop.f32.mrf.mxu1  ;;  %8283 = vst [vmem:[#allocation21_spill] sm:$0xff] %v6854_v55  ;;  %v2107_v32 = vadd.f32 %v2106_v25, %v2034_v50 }
 0x42e   : > { %v6856_v61 = vsel %vm2209_vm9, %v2172_v59, %v2225_v20  ;;  %v2176_v2 = vadd.f32 %v2175_v30, %v2103_v41  ;;  %vm2210_vm15 = vcmp.ge.f32.partialorder %v2174_v21, 0.0  ;;  %v2226_v12 = vmul.f32 0.01, %v2174_v21 }
 0x42f   : > { %8284 = vst [vmem:[#allocation13_spill] sm:$0xff] %v6856_v61  ;;  %v2110_v22 = vpop.f32.mrf.mxu0  ;;  %v2179_v26 = vpop.f32.mrf.mxu1  ;;  %v6860_v1 = vpack.i.bf16 %v6856_v61, %v6854_v55  ;;  %v2109_v14 = vadd.f32 %v2108_v34, %v2036_v4 }
 0x430   : > { %vm2211_vm6 = vcmp.ge.f32.partialorder %v2176_v2, 0.0  ;;  %v2227_v0 = vmul.f32 0.01, %v2176_v2  ;;  %v2180_v40 = vadd.f32 %v2179_v26, %v2107_v32  ;;  %v6862_v27 = vsel %vm2210_vm15, %v2174_v21, %v2226_v12 }
 0x431   : > { %8285 = vst [vmem:[#allocation10_spill] sm:$0xff] %v6862_v27  ;;  %v2112_v63 = vpop.f32.mrf.mxu0  ;;  %v2181_v7 = vpop.f32.mrf.mxu1  ;;  %v2111_v54 = vadd.f32 %v2110_v22, %v2038_v18  ;;  %v6868_v10 = vpack.i.bf16 %v6862_v27, %v6854_v55  ;;  %v2050_v22 = vadd.f32 %v6844_v16, %v6842_v42 }
 0x432   : > { %v6864_v60 = vsel %vm2211_vm6, %v2176_v2, %v2227_v0  ;;  %v2182_v15 = vadd.f32 %v2181_v7, %v2109_v14  ;;  %v2228_v38 = vmul.f32 0.01, %v2180_v40  ;;  %v2113_v28 = vadd.f32 %v2112_v63, %v2040_v19 }
 0x433   : > { %v2116_v11 = vpop.f32.mrf.mxu0  ;;  %v2183_v17 = vpop.f32.mrf.mxu1  ;;  %v6872_v45 = vpack.i.bf16 %v6864_v60, %v6856_v61  ;;  %vm2212_vm14 = vcmp.ge.f32.partialorder %v2180_v40, 0.0  ;;  %4987 = vrot.lane.b32.xlu0 %v6868_v10, %s5550_s21  ;;  %v6886_v23 = vpack.i.bf16 %v6864_v60, %v6862_v27  ;;  %v2054_v14 = vadd.f32 %v6846_v31, %v6830_v24  ;;  %v5520_v27 = vld [vmem:[%s8034_s8] ss:$12 sps:$4 sm:$0x3f]  }
 0x434   : > { %v2184_v56 = vadd.f32 %v2183_v17, %v2111_v54  ;;  %v2229_v13 = vmul.f32 0.01, %v2182_v15  ;;  %vm2213_vm4 = vcmp.ge.f32.partialorder %v2182_v15, 0.0  ;;  %v2117_v52 = vadd.f32 %v2116_v11, %v2044_v36 }
 0x435   : > { %v2118_v48 = vpop.f32.mrf.mxu0  ;;  %v2185_v53 = vpop.f32.mrf.mxu1  ;;  %4992 = vrot.lane.b32.xlu1 %v6872_v45, %s5550_s21  ;;  %v6893_v29 = vsel %vm2212_vm14, %v2180_v40, %v2228_v38  ;;  %v2056_v19 = vadd.f32 %v6848_v9, %v6830_v24  ;;  %v2058_v11 = vadd.f32 %v6850_v39, %v6832_v47  ;;  %v2060_v39 = vadd.f32 %v6852_v44, %v6832_v47 }
 0x436   : > { %vm2214_vm10 = vcmp.ge.f32.partialorder %v2184_v56, 0.0  ;;  %v2230_v37 = vmul.f32 0.01, %v2184_v56  ;;  %v2186_v62 = vadd.f32 %v2185_v53, %v2113_v28  ;;  %v2119_v20 = vadd.f32 %v2118_v48, %v2046_v33 }
 0x437   : > { %v2120_v5 = vpop.f32.mrf.mxu0  ;;  %v2189_v59 = vpop.f32.mrf.mxu1  ;;  %v6901_v2 = vsel %vm2213_vm4, %v2182_v15, %v2229_v13 }
 0x438   : > { %v6895_v50 = vsel %vm2214_vm10, %v2184_v56, %v2230_v37  ;;  %vm2215_vm13 = vcmp.ge.f32.partialorder %v2186_v62, 0.0  ;;  %v2231_v41 = vmul.f32 0.01, %v2186_v62  ;;  %v2190_v21 = vadd.f32 %v2189_v59, %v2117_v52 }
 0x439   : > { %v2122_v34 = vpop.f32.mrf.mxu0  ;;  %v2191_v30 = vpop.f32.mrf.mxu1  ;;  %v6899_v32 = vpack.i.bf16 %v6895_v50, %v6893_v29  ;;  %v2121_v12 = vadd.f32 %v2120_v5, %v2048_v3 }
 0x43a   : > { %v6903_v4 = vsel %vm2215_vm13, %v2186_v62, %v2231_v41  ;;  %v2192_v26 = vadd.f32 %v2191_v30, %v2119_v20  ;;  %v2232_v63 = vmul.f32 0.01, %v2190_v21  ;;  %vm2216_vm9 = vcmp.ge.f32.partialorder %v2190_v21, 0.0 }
 0x43b   : > { %v2126_v18 = vpop.f32.mrf.mxu0  ;;  %v2193_v0 = vpop.f32.mrf.mxu1  ;;  %4997 = vrot.lane.b32.xlu0 %v6899_v32, %s5550_s21  ;;  %v6911_v40 = vpack.i.bf16 %v6903_v4, %v6901_v2  ;;  %v2123_v42 = vadd.f32 %v2122_v34, %v2050_v22 }
 0x43c   : > { %v2194_v7 = vadd.f32 %v2193_v0, %v2121_v12  ;;  %v2127_v17 = vadd.f32 %v2126_v18, %v2054_v14  ;;  %vm2217_vm6 = vcmp.ge.f32.partialorder %v2192_v26, 0.0  ;;  %v2233_v36 = vmul.f32 0.01, %v2192_v26 }
 0x43d   : > { %v2128_v16 = vpop.f32.mrf.mxu0  ;;  %v2195_v54 = vpop.f32.mrf.mxu1  ;;  %5002 = vrot.lane.b32.xlu1 %v6911_v40, %s5550_s21  ;;  %v6926_v56 = vsel %vm2216_vm9, %v2190_v21, %v2232_v63 }
 0x43e   : > { %vm2218_vm15 = vcmp.ge.f32.partialorder %v2194_v7, 0.0  ;;  %v2234_v31 = vmul.f32 0.01, %v2194_v7  ;;  %v2196_v38 = vadd.f32 %v2195_v54, %v2123_v42  ;;  %v2129_v3 = vadd.f32 %v2128_v16, %v2056_v19 }
 0x43f   : > { %v2130_v24 = vpop.f32.mrf.mxu0  ;;  %v2199_v9 = vpop.f32.mrf.mxu1  ;;  %v6935_v41 = vsel %vm2217_vm6, %v2192_v26, %v2233_v36 }
 0x440   : > { %v6928_v33 = vsel %vm2218_vm15, %v2194_v7, %v2234_v31  ;;  %v2200_v48 = vadd.f32 %v2199_v9, %v2127_v17  ;;  %vm2219_vm14 = vcmp.ge.f32.partialorder %v2196_v38, 0.0  ;;  %v2235_v53 = vmul.f32 0.01, %v2196_v38 }
 0x441   : > { %v2132_v13 = vpop.f32.mrf.mxu0  ;;  %v2201_v37 = vpop.f32.mrf.mxu1  ;;  %v5006_v62 = vpack.i.bf16 %v6928_v33, %v6926_v56  ;;  %v2131_v52 = vadd.f32 %v2130_v24, %v2058_v11  ;;  %v5046_v24 = vpack.i.bf16 %v6903_v4, %v6895_v50  ;;  %v5041_v9 = vpack.i.bf16 %v6901_v2, %v6893_v29 }
 0x442   : > { %vm2220_vm10 = vcmp.ge.f32.partialorder %v2200_v48, 0.0  ;;  %v2236_v5 = vmul.f32 0.01, %v2200_v48  ;;  %v2202_v59 = vadd.f32 %v2201_v37, %v2129_v3  ;;  %v6937_v20 = vsel %vm2219_vm14, %v2196_v38, %v2235_v53 }
 0x443   : > { %v2203_v21 = vpop.f32.mrf.mxu1  ;;  %5007 = vrot.lane.b32.xlu0 %v5006_v62, %s5550_s21  ;;  %v2133_v44 = vadd.f32 %v2132_v13, %v2060_v39  ;;  %v5011_v18 = vpack.i.bf16 %v6937_v20, %v6935_v41  ;;  %v5036_v36 = vpack.i.bf16 %v6937_v20, %v6928_v33  ;;  %v5031_v38 = vpack.i.bf16 %v6935_v41, %v6926_v56 }
 0x444   : > { %vm2221_vm4 = vcmp.ge.f32.partialorder %v2202_v59, 0.0  ;;  %v2237_v34 = vmul.f32 0.01, %v2202_v59  ;;  %v2204_v30 = vadd.f32 %v2203_v21, %v2131_v52  ;;  %v6942_v12 = vsel %vm2220_vm10, %v2200_v48, %v2236_v5 }
 0x445   : > { %v2205_v22 = vpop.f32.mrf.mxu1  ;;  %5012 = vrot.lane.b32.xlu1 %v5011_v18, %s5550_s21  ;;  %vm8290_vm15 = vcmp.ge.s32.totalorder %v8246_v35, 16 }
 0x446   : > { %v6946_v26 = vsel %vm2221_vm4, %v2202_v59, %v2237_v34  ;;  %vm2222_vm13 = vcmp.ge.f32.partialorder %v2204_v30, 0.0  ;;  %v2238_v0 = vmul.f32 0.01, %v2204_v30  ;;  %v2206_v14 = vadd.f32 %v2205_v22, %v2133_v44  ;;  %vm8291_vm6 = vmmov %vm8290_vm15 }
 0x447   : > { %v5016_v63 = vpack.i.bf16 %v6946_v26, %v6942_v12  ;;  %vm8296_vm14 = vmmov %vm8291_vm6 }
 0x448   : > { %v6953_v19 = vsel %vm2222_vm13, %v2204_v30, %v2238_v0  ;;  %vm2223_vm9 = vcmp.ge.f32.partialorder %v2206_v14, 0.0  ;;  %v2239_v42 = vmul.f32 0.01, %v2206_v14  ;;  %vm8297_vm10 = vmmov %vm8291_vm6 }
 0x449   : > { %v5021_v16 = vpack.i.bf16 %v6953_v19, %v6942_v12  ;;  %5017 = vrot.lane.b32.xlu1 %v5016_v63, %s5551_s22  ;;  %vm8302_vm4 = vmmov %vm8291_vm6 }
 0x44a   : > { %v6959_v11 = vsel %vm2223_vm9, %v2206_v14, %v2239_v42  ;;  %vm8303_vm13 = vmmov %vm8302_vm4 }
 0x44b   : > { %5022 = vrot.lane.b32.xlu0 %v5021_v16, %s5550_s21  ;;  %v5026_v17 = vpack.i.bf16 %v6959_v11, %v6946_v26  ;;  %v5116_v3 = vpack.i.bf16 %v6959_v11, %v6953_v19  ;;  %vm8308_vm9 = vmmov %vm8302_vm4 }
 0x44d   : > { %5027 = vrot.lane.b32.xlu1 %v5026_v17, %s5550_s21 }
 0x44f   : > { %5037 = vrot.lane.b32.xlu0 %v5036_v36, %s5551_s22 }
 0x451   : > { %5032 = vrot.lane.b32.xlu1 %v5031_v38, %s5551_s22 }
 0x453   : > { %5047 = vrot.lane.b32.xlu0 %v5046_v24, %s5551_s22 }
 0x455   : > { %5042 = vrot.lane.b32.xlu1 %v5041_v9, %s5551_s22 }
 0x457   : > { %5057 = vrot.lane.b32.xlu0 %v6886_v23, %s5551_s22 }
 0x459   : > { %5052 = vrot.lane.b32.xlu1 %v6860_v1, %s5551_s22 }
 0x45b   : > { %5062 = vrot.lane.b32.xlu0 %v5021_v16, %s5554_s24 }
 0x45d   : > { %5067 = vrot.lane.b32.xlu1 %v5011_v18, %s5554_s24 }
 0x45f   : > { %5072 = vrot.lane.b32.xlu0 %v5006_v62, %s5554_s24 }
 0x461   : > { %5077 = vrot.lane.b32.xlu1 %v6911_v40, %s5554_s24 }
 0x463   : > { %5082 = vrot.lane.b32.xlu0 %v6899_v32, %s5554_s24 }
 0x465   : > { %5087 = vrot.lane.b32.xlu1 %v6872_v45, %s5554_s24 }
 0x467   : > { %5092 = vrot.lane.b32.xlu0 %v6868_v10, %s5554_s24 }
 0x469   : > { %5097 = vrot.lane.b32.xlu1 %v5016_v63, %s5553_s23 }
 0x46b   : > { %5107 = vrot.lane.b32.xlu0 %v5036_v36, %s5553_s23 }
 0x46d   : > { %5102 = vrot.lane.b32.xlu1 %v5031_v38, %s5553_s23 }
 0x46f   : > { %5117 = vrot.lane.b32.xlu0 %v5116_v3, %s5551_s22 }
 0x471   : > { %5112 = vrot.lane.b32.xlu1 %v5041_v9, %s5553_s23 }
 0x473   : > { %5122 = vrot.lane.b32.xlu0 %v5046_v24, %s5553_s23 }
 0x475   : > { %5127 = vrot.lane.b32.xlu1 %v6860_v1, %s5553_s23 }
 0x477   : > { %5132 = vrot.lane.b32.xlu0 %v6886_v23, %s5553_s23 }
 0x479   : > { %5137 = vrot.lane.b32.xlu1 %v5026_v17, %s5554_s24 }
 0x47b   : > { %5142 = vrot.lane.b32.xlu0 %v5116_v3, %s5553_s23 }
 0x4a5   : > { %v4988_v10 = vpop.permute.xlu0 %4987 }
 0x4a6   : > { %v4990_v32 = vunpack.i.h.bf16 %v4988_v10  ;;  %v4989_v40 = vunpack.i.l.bf16 %v4988_v10 }
 0x4a7   : > { %v4993_v45 = vpop.permute.xlu1 %4992 }
 0x4a8   : > { %v4995_v48 = vunpack.i.h.bf16 %v4993_v45  ;;  %v4994_v39 = vunpack.i.l.bf16 %v4993_v45 }
 0x4aa   : > { %v7010_v53 = vsel %vm8107_vm3, %v4989_v40, %v4994_v39  ;;  %v7013_v13 = vsel %vm8107_vm3, %v4990_v32, %v4995_v48  ;;  %v7016_v1 = vsel %vm8107_vm3, %v4994_v39, %v4989_v40  ;;  %v7019_v23 = vsel %vm8107_vm3, %v4995_v48, %v4990_v32 }
 0x4ab   : > { %8286 = vst [vmem:[#allocation26_spill] sm:$0xff] %v7010_v53  ;;  %8287 = vst [vmem:[#allocation24_spill] sm:$0xff] %v7013_v13  ;;  %v5146_v62 = vpack.i.bf16 %v7013_v13, %v7010_v53  ;;  %v7028_v52 = vsel %vm8290_vm15, %v7016_v1, 0.0  ;;  %v7033_v5 = vsel %vm8291_vm6, %v7019_v23, 0.0  ;;  %vm8310_vm6 = vcmask 916480  }
 0x4ac   : > { %8288 = vst [vmem:[#allocation25_spill] sm:$0xff] %v7016_v1  ;;  %8289 = vst [vmem:[#allocation23_spill] sm:$0xff] %v7019_v23  ;;  %v5151_v59 = vpack.i.bf16 %v7033_v5, %v7028_v52 }
 0x4ad   : > { %v4998_v44 = vpop.permute.xlu0 %4997  ;;  %5147 = vrot.lane.b32.xlu1 %v5146_v62, %s5554_s24  ;;  %vm8309_vm15 = vmmov %vm8302_vm4 }
 0x4ae   : > { %5152 = vrot.lane.b32.xlu0 %v5151_v59, %s5554_s24  ;;  %v5000_v30 = vunpack.i.h.bf16 %v4998_v44  ;;  %v4999_v22 = vunpack.i.l.bf16 %v4998_v44 }
 0x4af   : > { %v5003_v34 = vpop.permute.xlu1 %5002 }
 0x4b0   : > { %v5005_v18 = vunpack.i.h.bf16 %v5003_v34  ;;  %v5004_v0 = vunpack.i.l.bf16 %v5003_v34 }
 0x4b2   : > { %v7042_v14 = vsel %vm8107_vm3, %v4999_v22, %v5004_v0  ;;  %v7045_v63 = vsel %vm8107_vm3, %v5000_v30, %v5005_v18  ;;  %v7048_v42 = vsel %vm8107_vm3, %v5004_v0, %v4999_v22  ;;  %v7051_v16 = vsel %vm8107_vm3, %v5005_v18, %v5000_v30 }
 0x4b3   : > { %8292 = vst [vmem:[#allocation19_spill] sm:$0xff] %v7042_v14  ;;  %8293 = vst [vmem:[#allocation15_spill] sm:$0xff] %v7045_v63  ;;  %v5156_v36 = vpack.i.bf16 %v7045_v63, %v7042_v14  ;;  %v7060_v38 = vsel %vm8296_vm14, %v7048_v42, 0.0  ;;  %v2350_v24 = vsel %vm8297_vm10, %v7051_v16, 0.0  ;;  %vm8312_vm10 = vcmp.lt.s32.totalorder %v5645_v6, 240 }
 0x4b4   : > { %8294 = vst [vmem:[#allocation18_spill] sm:$0xff] %v7048_v42  ;;  %8295 = vst [vmem:[#allocation14_spill] sm:$0xff] %v7051_v16  ;;  %v5161_v9 = vpack.i.bf16 %v2350_v24, %v7060_v38 }
 0x4b5   : > { %5157 = vrot.lane.b32.xlu1 %v5156_v36, %s5554_s24  ;;  %v5008_v10 = vpop.permute.xlu0 %5007  ;;  %vm8311_vm14 = vmmov %vm8310_vm6 }
 0x4b6   : > { %5162 = vrot.lane.b32.xlu0 %v5161_v9, %s5554_s24  ;;  %v5010_v32 = vunpack.i.h.bf16 %v5008_v10  ;;  %v5009_v40 = vunpack.i.l.bf16 %v5008_v10 }
 0x4b7   : > { %v5013_v45 = vpop.permute.xlu1 %5012 }
 0x4b8   : > { %v5015_v48 = vunpack.i.h.bf16 %v5013_v45  ;;  %v5014_v39 = vunpack.i.l.bf16 %v5013_v45 }
 0x4ba   : > { %v7071_v62 = vsel %vm8107_vm3, %v5009_v40, %v5014_v39  ;;  %v7074_v59 = vsel %vm8107_vm3, %v5010_v32, %v5015_v48  ;;  %v7077_v44 = vsel %vm8107_vm3, %v5014_v39, %v5009_v40  ;;  %v7080_v34 = vsel %vm8107_vm3, %v5015_v48, %v5010_v32 }
 0x4bb   : > { %8298 = vst [vmem:[#allocation27_spill] sm:$0xff] %v7071_v62  ;;  %8299 = vst [vmem:[#allocation29_spill] sm:$0xff] %v7074_v59  ;;  %v2352_v30 = vsel %vm8302_vm4, %v7077_v44, 0.0  ;;  %v2354_v22 = vsel %vm8303_vm13, %v7080_v34, 0.0  ;;  %v7090_v0 = vpop.permute.xlu1 %5017  ;;  %v5166_v9 = vpack.i.bf16 %v7074_v59, %v7071_v62 }
 0x4bc   : > { %8300 = vst [vmem:[#allocation28_spill] sm:$0xff] %v7077_v44  ;;  %8301 = vst [vmem:[#allocation7_spill] sm:$0xff] %v7080_v34  ;;  %v5171_v10 = vpack.i.bf16 %v2354_v22, %v2352_v30 }
 0x4bd   : > { %v5023_v36 = vpop.permute.xlu0 %5022  ;;  %5167 = vrot.lane.b32.xlu1 %v5166_v9, %s5554_s24  ;;  %vm8313_vm4 = vmmov %vm8310_vm6 }
 0x4be   : > { %5172 = vrot.lane.b32.xlu0 %v5171_v10, %s5554_s24  ;;  %v5025_v48 = vunpack.i.h.bf16 %v5023_v36  ;;  %v5024_v39 = vunpack.i.l.bf16 %v5023_v36  ;;  %vm8314_vm13 = vmmov %vm8312_vm10 }
 0x4bf   : > { %v5028_v32 = vpop.permute.xlu1 %5027 }
 0x4c0   : > { %v5030_v37 = vunpack.i.h.bf16 %v5028_v32  ;;  %v5029_v21 = vunpack.i.l.bf16 %v5028_v32  ;;  %v5196_v32 = vpack.i.bf16 %v7074_v59, %v2354_v22 }
 0x4c1   : > { %v7098_v40 = vpop.permute.xlu0 %5037 }
 0x4c2   : > { %v7101_v17 = vsel %vm8107_vm3, %v5024_v39, %v5029_v21  ;;  %v7104_v3 = vsel %vm8107_vm3, %v5025_v48, %v5030_v37  ;;  %v7107_v9 = vsel %vm8107_vm3, %v5029_v21, %v5024_v39  ;;  %v7110_v18 = vsel %vm8107_vm3, %v5030_v37, %v5025_v48 }
 0x4c3   : > { %8304 = vst [vmem:[#allocation6_spill] sm:$0xff] %v7101_v17  ;;  %8305 = vst [vmem:[#allocation9_spill] sm:$0xff] %v7104_v3  ;;  %v2356_v10 = vsel %vm8308_vm9, %v7107_v9, 0.0  ;;  %v7118_v36 = vsel %vm8309_vm15, %v7110_v18, 0.0  ;;  %v7122_v45 = vpop.permute.xlu1 %5032  ;;  %v5176_v37 = vpack.i.bf16 %v7104_v3, %v7101_v17 }
 0x4c4   : > { %8306 = vst [vmem:[#allocation8_spill] sm:$0xff] %v7107_v9  ;;  %8307 = vst [vmem:[#allocation12_spill] sm:$0xff] %v7110_v18  ;;  %v5191_v21 = vpack.i.bf16 %v7118_v36, %v2356_v10  ;;  %v5181_v58 = vpack.i.bf16 %v7101_v17, %v2356_v10  ;;  %v5035_v47 = vunpack.i.h.bf16 %v7122_v45  ;;  %v5034_v7 = vunpack.i.l.bf16 %v7122_v45 }
 0x4c5   : > { %v7124_v25 = vpop.permute.xlu0 %5047  ;;  %5177 = vrot.lane.b32.xlu1 %v5176_v37, %s5554_s24  ;;  %v5186_v37 = vpack.i.bf16 %v7071_v62, %v2352_v30  ;;  %v5040_v10 = vunpack.i.h.bf16 %v7098_v40  ;;  %v5201_v30 = vpack.i.bf16 %v7042_v14, %v7060_v38  ;;  %v5020_v45 = vunpack.i.h.bf16 %v7090_v0  ;;  %vm8315_vm9 = vmmov %vm8313_vm4 }
 0x4c6   : > { %5192 = vrot.lane.b32.xlu0 %v5191_v21, %s5554_s24  ;;  %v5206_v21 = vpack.i.bf16 %v7045_v63, %v2350_v24  ;;  %v5216_v38 = vpack.i.bf16 %v7010_v53, %v7028_v52  ;;  %v5050_v52 = vunpack.i.h.bf16 %v7124_v25  ;;  %v5049_v53 = vunpack.i.l.bf16 %v7124_v25  ;;  %vm8316_vm15 = vmmov %vm8312_vm10 }
 0x4c7   : > { %v7131_v48 = vpop.permute.xlu1 %5042 }
 0x4c8   : > { %v5044_v46 = vunpack.i.l.bf16 %v7131_v48 }
 0x4c9   : > { %v7133_v39 = vpop.permute.xlu0 %5057  ;;  %5182 = vrot.lane.b32.xlu1 %v5181_v58, %s5553_s23 }
 0x4ca   : > { %5197 = vrot.lane.b32.xlu0 %v5196_v32, %s5553_s23  ;;  %v5039_v32 = vunpack.i.l.bf16 %v7098_v40  ;;  %v5060_v8 = vunpack.i.h.bf16 %v7133_v39  ;;  %v5059_v57 = vunpack.i.l.bf16 %v7133_v39 }
 0x4cb   : > { %v7139_v28 = vpop.permute.xlu1 %5052 }
 0x4cc   : > { %v2429_v40 = vsel %vm8311_vm14, %v5040_v10, %v5039_v32  ;;  %vm8319_vm14 = vmmov %vm8313_vm4  ;;  %v5055_v9 = vunpack.i.h.bf16 %v7139_v28  ;;  %v5054_v18 = vunpack.i.l.bf16 %v7139_v28 }
 0x4cd   : > { %v7141_v15 = vpop.permute.xlu0 %5062  ;;  %5187 = vrot.lane.b32.xlu1 %v5186_v37, %s5553_s23  ;;  %v5019_v37 = vunpack.i.l.bf16 %v7090_v0  ;;  %v5045_v0 = vunpack.i.h.bf16 %v7131_v48  ;;  %v7184_v23 = vsel %vm8314_vm13, %v2429_v40, 0.0  ;;  %v2427_v44 = vsel %vm8319_vm14, %v5050_v52, %v5049_v53 }
 0x4ce   : > { %5207 = vrot.lane.b32.xlu0 %v5206_v21, %s5553_s23  ;;  %v2428_v21 = vsel %vm8310_vm6, %v5035_v47, %v5034_v7  ;;  %vm8317_vm6 = vmmov %vm8313_vm4 }
 0x4cf   : > { %v7149_v22 = vpop.permute.xlu1 %5067  ;;  %v7172_v24 = vsel %vm8312_vm10, %v2428_v21, 0.0  ;;  %v2430_v35 = vsel %vm8313_vm4, %v5020_v45, %v5019_v37  ;;  %v2398_v16 = vsel %vm8315_vm9, %v5019_v37, %v5020_v45  ;;  %vm8320_vm4 = vmmov %vm8312_vm10  ;;  %v7232_v28 = vsel %vm8317_vm6, %v5034_v7, %v5035_v47 }
 0x4d0   : > { %v5226_v42 = vpack.i.bf16 %v7184_v23, %v7172_v24  ;;  %v2445_v48 = vsel %vm8316_vm15, %v2430_v35, 0.0  ;;  %vm8322_vm13 = vmmov %vm8317_vm6 }
 0x4d1   : > { %v7151_v58 = vpop.permute.xlu0 %5072  ;;  %5202 = vrot.lane.b32.xlu1 %v5201_v30, %s5553_s23  ;;  %v5241_v25 = vpack.i.bf16 %v2445_v48, %v2398_v16  ;;  %vm8323_vm9 = vmmov %vm8317_vm6 }
 0x4d2   : > { %vm8324_vm15 = vmmov %vm8320_vm4 }
 0x4d3   : > { %v7163_v54 = vpop.permute.xlu1 %5077  ;;  %vm8326_vm14 = vmmov %vm8317_vm6 }
 0x4d4   : > { %v2424_v61 = vsel %vm8326_vm14, %v5055_v9, %v5054_v18 }
 0x4d5   : > { %v7165_v31 = vpop.permute.xlu0 %5082  ;;  %5217 = vrot.lane.b32.xlu1 %v5216_v38, %s5553_s23  ;;  %v7194_v38 = vsel %vm8317_vm6, %v5045_v0, %v5044_v46 }
 0x4d6   : > { %v7205_v34 = vsel %vm8312_vm10, %v7194_v38, 0.0  ;;  %vm8327_vm10 = vmmov %vm8317_vm6 }
 0x4d7   : > { %v7178_v30 = vpop.permute.xlu1 %5087 }
 0x4d9   : > { %v7180_v1 = vpop.permute.xlu0 %5092  ;;  %5227 = vrot.lane.b32.xlu1 %v5226_v42, %s5554_s24  ;;  %v7212_v42 = vsel %vm8320_vm4, %v2427_v44, 0.0  ;;  %vm8328_vm4 = vmmov %vm8317_vm6 }
 0x4da   : > { %8321 = vst [vmem:[#allocation17_spill] sm:$0xff] %v7212_v42  ;;  %v5246_v49 = vpack.i.bf16 %v7212_v42, %v7205_v34  ;;  %v2425_v47 = vsel %vm8328_vm4, %v5060_v8, %v5059_v57  ;;  %vm8331_vm6 = vmmov %vm8324_vm15 }
 0x4db   : > { %v7197_v14 = vpop.permute.xlu1 %5097  ;;  %vm8332_vm14 = vmmov %vm8328_vm4 }
 0x4dd   : > { %v7199_v63 = vpop.permute.xlu0 %5107  ;;  %5242 = vrot.lane.b32.xlu1 %v5241_v25, %s5553_s23 }
 0x4de   : > { %8318 = vst [vmem:[#allocation11_spill] sm:$0xff] %v7199_v63  ;;  %v4348_v63 = vpack.c.bf16 %v2429_v40, %v2428_v21 }
 0x4df   : > { %v7208_v45 = vpop.permute.xlu1 %5102 }
 0x4e1   : > { %v5118_v37 = vpop.permute.xlu0 %5117  ;;  %5247 = vrot.lane.b32.xlu1 %v5246_v49, %s5554_s24  ;;  %v7243_v49 = vsel %vm8327_vm10, %v5039_v32, %v5040_v10  ;;  %v7264_v10 = vsel %vm8324_vm15, %v2424_v61, 0.0  ;;  %v4351_v32 = vpack.c.bf16 %v2427_v44, %v7194_v38  ;;  %vm8333_vm10 = vcmask 7168  }
 0x4e2   : > { %v5120_v62 = vunpack.i.h.bf16 %v5118_v37  ;;  %v5119_v59 = vunpack.i.l.bf16 %v5118_v37 }
 0x4e3   : > { %v7229_v42 = vpop.permute.xlu1 %5112 }
 0x4e4   : > { %v7219_v17 = vsel %vm8322_vm13, %v5119_v59, %v5120_v62  ;;  %v2431_v25 = vsel %vm8323_vm9, %v5120_v62, %v5119_v59  ;;  %vm8329_vm13 = vmmov %vm8328_vm4 }
 0x4e5   : > { %v7226_v55 = vsel %vm8324_vm15, %v2431_v25, 0.0  ;;  %v4345_v37 = vpack.c.bf16 %v2431_v25, %v2430_v35  ;;  %v5211_v62 = vpack.i.bf16 %v7219_v17, %v2398_v16  ;;  %v3066_v59 = vpack.c.bf16 %v7219_v17, %v2398_v16  ;;  %vm8330_vm9 = vmmov %vm8328_vm4 }
 0x4e6   : > { %v5256_v39 = vpack.i.bf16 %v7226_v55, %v2445_v48  ;;  %v5221_v35 = vpack.i.bf16 %v7013_v13, %v7033_v5  ;;  %v5231_v16 = vpack.i.bf16 %v7104_v3, %v7118_v36  ;;  %v7252_v21 = vsel %vm8329_vm13, %v5049_v53, %v5050_v52  ;;  %vm8334_vm4 = vmmov %vm8333_vm10 }
 0x4e7   : > { %4346 = vmatprep.subr.msk.bf16.mxu0 %vm6287_vm5, %v4345_v37  ;;  %v7246_v7 = vpop.permute.xlu1 %5127  ;;  %5212 = vrot.lane.b32.xlu0 %v5211_v62, %s5554_s24  ;;  %v7255_v40 = vsel %vm8330_vm9, %v5044_v46, %v5045_v0  ;;  %v3064_v5 = vpack.c.bf16 %v7243_v49, %v7232_v28  ;;  %v5075_v36 = vunpack.i.h.bf16 %v7151_v58  ;;  %v5074_v53 = vunpack.i.l.bf16 %v7151_v58  ;;  %vm8335_vm13 = vmmov %vm8334_vm4 }
 0x4e8   : > { %3226 = vmatpush1.bf16.msra.mxu0 %v3066_v59  ;;  %5257 = vrot.lane.b32.xlu1 %v5256_v39, %s5554_s24  ;;  %v5261_v46 = vpack.i.bf16 %v7172_v24, %v7232_v28  ;;  %v7273_v0 = vsel %vm8331_vm6, %v2425_v47, 0.0  ;;  %v5236_v52 = vpack.i.bf16 %v7243_v49, %v7232_v28  ;;  %v5064_v48 = vunpack.i.l.bf16 %v7141_v15  ;;  %vm8336_vm9 = vmmov %vm8334_vm4 }
 0x4e9   : > { %4349 = vmatprep.subr.msk.bf16.mxu0 %vm6287_vm5, %v4348_v63  ;;  %v5065_v63 = vunpack.i.h.bf16 %v7141_v15  ;;  %v5070_v25 = vunpack.i.h.bf16 %v7149_v22  ;;  %v5069_v58 = vunpack.i.l.bf16 %v7149_v22  ;;  %v3062_v44 = vpack.c.bf16 %v7252_v21, %v7255_v40  ;;  %vm8337_vm15 = vmmov %vm8334_vm4 }
 0x4ea   : > { %v7285_v24 = vsel %vm8332_vm14, %v5054_v18, %v5055_v9  ;;  %v5271_v15 = vpack.i.bf16 %v7273_v0, %v7264_v10  ;;  %v5085_v59 = vunpack.i.h.bf16 %v7165_v31  ;;  %v5084_v39 = vunpack.i.l.bf16 %v7165_v31  ;;  %v7296_v18 = vpop.permute.xlu0 %5122  ;;  %vm8338_vm6 = vmmov %vm8334_vm4 }
 0x4eb   : > { %v5138_v37 = vpop.permute.xlu1 %5137  ;;  %5222 = vrot.lane.b32.xlu0 %v5221_v35, %s5553_s23  ;;  %v2613_v22 = vsel %vm8333_vm10, %v5075_v36, %v5070_v25  ;;  %v2612_v28 = vsel %vm8334_vm4, %v5074_v53, %v5069_v58  ;;  %v5080_v31 = vunpack.i.h.bf16 %v7163_v54  ;;  %v5079_v3 = vunpack.i.l.bf16 %v7163_v54  ;;  %vm8339_vm10 = vmmov %vm8334_vm4 }
 0x4ec   : > { %3228 = vmatpush1.bf16.msra.mxu0 %v3064_v5  ;;  %v5140_v38 = vunpack.i.h.bf16 %v5138_v37  ;;  %v5139_v62 = vunpack.i.l.bf16 %v5138_v37  ;;  %5262 = vrot.lane.b32.xlu1 %v5261_v46, %s5553_s23  ;;  %v4354_v37 = vpack.c.bf16 %v2425_v47, %v2424_v61  ;;  %v4267_v61 = vpack.c.bf16 %v2613_v22, %v2612_v28  ;;  %vm8368_vm3 = vmmov %vm8334_vm4 }
 0x4ed   : > { %4352 = vmatprep.subr.msk.bf16.mxu0 %vm6287_vm5, %v4351_v32  ;;  %v7303_v32 = vsel %vm8332_vm14, %v5059_v57, %v5060_v8  ;;  %v2685_v57 = vsel %vm8339_vm10, %v5070_v25, %v5075_v36  ;;  %v2684_v8 = vsel %vm8334_vm4, %v5069_v58, %v5074_v53  ;;  %v5090_v36 = vunpack.i.h.bf16 %v7178_v30  ;;  %vm8345_vm14 = vmmov %vm8334_vm4 }
 0x4ee   : > { %v2614_v9 = vsel %vm8335_vm13, %v5064_v48, %v5139_v62  ;;  %v2615_v35 = vsel %vm8336_vm9, %v5065_v63, %v5140_v38  ;;  %v2686_v5 = vsel %vm8337_vm15, %v5139_v62, %v5064_v48  ;;  %v2687_v46 = vsel %vm8338_vm6, %v5140_v38, %v5065_v63  ;;  %vm8340_vm13 = vmmov %vm8334_vm4 }
 0x4ef   : > { %v4261_v6 = vpack.c.bf16 %v2615_v35, %v2614_v9  ;;  %v4264_v13 = vpack.c.bf16 %v2687_v46, %v2686_v5  ;;  %5232 = vrot.lane.b32.xlu0 %v5231_v16, %s5553_s23  ;;  %v3060_v48 = vpack.c.bf16 %v7303_v32, %v7285_v24  ;;  %v5286_v63 = vpack.i.bf16 %v7205_v34, %v7255_v40  ;;  %vm8341_vm9 = vmmov %vm8334_vm4  ;;  %v7325_v34 = vpop.permute.xlu0 %5132  ;;  %v3092_v9 = vld [vmem:[%s8033_s7] sm:$0xff] }
 0x4f0   : > { %3230 = vmatpush1.bf16.msra.mxu0 %v3062_v44  ;;  %5272 = vrot.lane.b32.xlu1 %v5271_v15, %s5554_s24  ;;  %v2611_v54 = vsel %vm8340_vm13, %v5085_v59, %v5080_v31  ;;  %v2610_v47 = vsel %vm8341_vm9, %v5084_v39, %v5079_v3  ;;  %v5095_v16 = vunpack.i.h.bf16 %v7180_v1  ;;  %v5094_v44 = vunpack.i.l.bf16 %v7180_v1  ;;  %vm8342_vm15 = vmmov %vm8334_vm4  ;;  %v5511_v46 = vld [vmem:[%s8032_s6 + $0x4] ss:$20 sps:$4 sm:$0xff]  }
 0x4f1   : > { %4262 = vmatprep.subr.msk.bf16.mxu1 %vm5808_vm0, %v4261_v6  ;;  %4355 = vmatprep.subr.msk.bf16.mxu0 %vm6287_vm5, %v4354_v37  ;;  %v4270_v6 = vpack.c.bf16 %v2685_v57, %v2684_v8  ;;  %v5089_v53 = vunpack.i.l.bf16 %v7178_v30  ;;  %v2683_v1 = vsel %vm8342_vm15, %v5080_v31, %v5085_v59  ;;  %vm8343_vm6 = vmmov %vm8334_vm4  ;;  %v8344_v58 = vpack.c.bf16 %v6959_v11, %v6946_v26  ;;  %v8355_v37 = vld [vmem:[#allocation11_spill] sm:$0xff]  ;;  %v8356_v57 = vld [vmem:[#allocation10_spill] sm:$0xff] }
 0x4f2   : > { %4265 = vmatpush1.bf16.msk.msra.mxu1 %vm5826_vm2, %v4264_v13  ;;  %v2682_v25 = vsel %vm8343_vm6, %v5079_v3, %v5084_v39  ;;  %v4273_v13 = vpack.c.bf16 %v2611_v54, %v2610_v47  ;;  %v2609_v38 = vsel %vm8345_vm14, %v5095_v16, %v5090_v36  ;;  %vm8346_vm10 = vmmov %vm8334_vm4  ;;  %v5296_v30 = vpack.i.bf16 %v7264_v10, %v7285_v24  ;;  %v8357_v8 = vld [vmem:[#allocation21_spill] sm:$0xff] }
 0x4f3   : > { %4268 = vmatprep.subr.msk.bf16.mxu1 %vm5808_vm0, %v4267_v61  ;;  %5237 = vrot.lane.b32.xlu0 %v5236_v52, %s5554_s24  ;;  %v5251_v52 = vpack.i.bf16 %v7252_v21, %v7255_v40  ;;  %v2608_v62 = vsel %vm8346_vm10, %v5094_v44, %v5089_v53  ;;  %v4276_v26 = vpack.c.bf16 %v2683_v1, %v2682_v25  ;;  %vm8348_vm13 = vmmov %vm8334_vm4  ;;  %v5143_v22 = vpop.permute.xlu0 %5142  ;;  %v5100_v35 = vunpack.i.h.bf16 %v7197_v14 }
 0x4f4   : > { %3232 = vmatpush1.bf16.msra.mxu0 %v3060_v48  ;;  %5287 = vrot.lane.b32.xlu1 %v5286_v63, %s5553_s23  ;;  %v8347_v11 = vpack.c.bf16 %v6953_v19, %v6942_v12  ;;  %v2681_v3 = vsel %vm8334_vm4, %v5090_v36, %v5095_v16  ;;  %v2680_v40 = vsel %vm8348_vm13, %v5089_v53, %v5094_v44  ;;  %v3094_v12 = vld [vmem:[%s8033_s7 + $0x10] sm:$0xff]  ;;  %v5508_v19 = vld [vmem:[%s8032_s6 + $0xc] ss:$20 sps:$4 sm:$0xff]   ;;  %v5144_v59 = vunpack.i.l.bf16 %v5143_v22  ;;  %v8360_v16 = vld [vmem:[#allocation17_spill] sm:$0xff] }
 0x4f5   : > { %3233 = vmatprep.subr.bf16.mxu0 %v8344_v58  ;;  %v4279_v15 = vpack.c.bf16 %v2609_v38, %v2608_v62  ;;  %v8349_v10 = vpack.c.bf16 %v6937_v20, %v6935_v41  ;;  %v5266_v28 = vpack.i.bf16 %v7184_v23, %v7243_v49  ;;  %v4282_v41 = vpack.c.bf16 %v2681_v3, %v2680_v40  ;;  %vm8362_vm9 = vmmov %vm8334_vm4 }
 0x4f6   : > { %4271 = vmatpush1.bf16.msk.msra.mxu1 %vm5826_vm2, %v4270_v6  ;;  %v5145_v20 = vunpack.i.h.bf16 %v5143_v22  ;;  %v8350_v23 = vpack.c.bf16 %v6928_v33, %v6926_v56  ;;  %v8351_v49 = vpack.c.bf16 %v6903_v4, %v6901_v2  ;;  %v5276_v39 = vpack.i.bf16 %v7226_v55, %v7219_v17  ;;  %3257 = vmatprep.mubr.bf16.mxu0 %v5508_v19  ;;  %v8353_v33 = vld [vmem:[#allocation13_spill] sm:$0xff]  ;;  %vm8363_vm15 = vmmov %vm8334_vm4 }
 0x4f7   : > { %4274 = vmatprep.subr.msk.bf16.mxu1 %vm5808_vm0, %v4273_v13  ;;  %5252 = vrot.lane.b32.xlu0 %v5251_v52, %s5554_s24  ;;  %v5099_v5 = vunpack.i.l.bf16 %v7197_v14  ;;  %v5105_v2 = vunpack.i.h.bf16 %v7208_v45  ;;  %v5104_v4 = vunpack.i.l.bf16 %v7208_v45  ;;  %v8352_v56 = vpack.c.bf16 %v6895_v50, %v6893_v29  ;;  %vm8364_vm6 = vmmov %vm8334_vm4 }
 0x4f8   : > { %3234 = vmatpush1.bf16.msra.mxu0 %v8347_v11  ;;  %5297 = vrot.lane.b32.xlu1 %v5296_v30, %s5553_s23  ;;  %v2951_v55 = vsel %vm607_vm11, %v5145_v20, %v5144_v59  ;;  %v8354_v17 = vpack.c.bf16 %v6864_v60, %v8353_v33  ;;  %v5281_v14 = vpack.i.bf16 %v7303_v32, %v7285_v24  ;;  %v5110_v31 = vunpack.i.h.bf16 %v8355_v37  ;;  %vm8365_vm14 = vmmov %vm8334_vm4 }
 0x4f9   : > { %3235 = vmatprep.subr.bf16.mxu0 %v8349_v10  ;;  %v2950_v45 = vsel %vm607_vm11, %v5100_v35, %v5099_v5  ;;  %v5109_v48 = vunpack.i.l.bf16 %v8355_v37  ;;  %v2855_v29 = vsel %vm607_vm11, %v5144_v59, %v5145_v20  ;;  %3204 = vmatprep.mubr.bf16.mxu1 %v5511_v46  ;;  %v2948_v60 = vsel %vm607_vm11, %v5105_v2, %v5104_v4  ;;  %vm8366_vm10 = vmmov %vm8334_vm4 }
 0x4fa   : > { %4277 = vmatpush1.bf16.msk.msra.mxu1 %vm5826_vm2, %v4276_v26  ;;  %v4357_v50 = vpack.c.bf16 %v2951_v55, %v2950_v45  ;;  %v5125_v24 = vunpack.i.h.bf16 %v7296_v18  ;;  %v5124_v63 = vunpack.i.l.bf16 %v7296_v18  ;;  %v8358_v61 = vpack.c.bf16 %v8356_v57, %v8357_v8  ;;  %vm8367_vm13 = vmmov %vm8334_vm4 }
 0x4fb   : > { %4280 = vmatprep.subr.msk.bf16.mxu1 %vm5808_vm0, %v4279_v15  ;;  %5267 = vrot.lane.b32.xlu0 %v5266_v28, %s5553_s23  ;;  %v2854_v54 = vsel %vm607_vm11, %v5099_v5, %v5100_v35  ;;  %v5291_v44 = vpack.i.bf16 %v8360_v16, %v7252_v21  ;;  %v2949_v6 = vsel %vm607_vm11, %v5110_v31, %v5109_v48  ;;  %v5115_v36 = vunpack.i.h.bf16 %v7229_v42  ;;  %v3093_v28 = vld [vmem:[%s8033_s7 + $0x8] sm:$0xff] }
 0x4fc   : > { %3236 = vmatpush1.bf16.msra.mxu0 %v8350_v23  ;;  %3108 = vperm.xlu1 %4665, %v3094_v12   ;;  %v5114_v53 = vunpack.i.l.bf16 %v7229_v42  ;;  %v4360_v1 = vpack.c.bf16 %v2855_v29, %v2854_v54  ;;  %v2852_v18 = vsel %vm607_vm11, %v5104_v4, %v5105_v2  ;;  %v4363_v25 = vpack.c.bf16 %v2949_v6, %v2948_v60 }
 0x4fd   : > { %3237 = vmatprep.subr.bf16.mxu0 %v8351_v49  ;;  %v2947_v13 = vsel %vm607_vm11, %v5125_v24, %v5124_v63  ;;  %v5135_v58 = vunpack.i.h.bf16 %v7325_v34  ;;  %v5134_v52 = vunpack.i.l.bf16 %v7325_v34  ;;  %v2853_v21 = vsel %vm607_vm11, %v5109_v48, %v5110_v31 }
 0x4fe   : > { %4283 = vmatpush1.bf16.msk.msra.mxu1 %vm5826_vm2, %v4282_v41  ;;  %v5301_v42 = vpack.i.bf16 %v7273_v0, %v7303_v32  ;;  %v4366_v62 = vpack.c.bf16 %v2853_v21, %v2852_v18  ;;  %v2946_v30 = vsel %vm607_vm11, %v5115_v36, %v5114_v53  ;;  %v5130_v26 = vunpack.i.h.bf16 %v7246_v7  ;;  %v3095_v0 = vld [vmem:[%s8033_s7 + $0x18] sm:$0xff] }
 0x4ff   : > { %5277 = vrot.lane.b32.xlu0 %v5276_v39, %s5553_s23  ;;  %v5129_v11 = vunpack.i.l.bf16 %v7246_v7  ;;  %v2851_v34 = vsel %vm607_vm11, %v5124_v63, %v5125_v24  ;;  %v4369_v3 = vpack.c.bf16 %v2947_v13, %v2946_v30  ;;  %v2945_v40 = vsel %vm607_vm11, %v5135_v58, %v5134_v52 }
 0x500   : > { %3238 = vmatpush1.bf16.msra.mxu0 %v8352_v56  ;;  %3098 = vperm.xlu1 %4665, %v3092_v9   ;;  %v2850_v32 = vsel %vm607_vm11, %v5114_v53, %v5115_v36  ;;  %v2849_v22 = vsel %vm607_vm11, %v5134_v52, %v5135_v58 }
 0x501   : > { %3239 = vmatprep.subr.bf16.mxu0 %v8354_v17  ;;  %v4372_v7 = vpack.c.bf16 %v2851_v34, %v2850_v32  ;;  %v2944_v15 = vsel %vm607_vm11, %v5130_v26, %v5129_v11  ;;  %v2848_v12 = vsel %vm607_vm11, %v5129_v11, %v5130_v26 }
 0x502   : > { %v4375_v10 = vpack.c.bf16 %v2945_v40, %v2944_v15  ;;  %v4378_v19 = vpack.c.bf16 %v2849_v22, %v2848_v12  ;;  %v8376_v15 = vld [vmem:[#allocation9_spill] sm:$0xff]  ;;  %v8377_v22 = vld [vmem:[#allocation6_spill] sm:$0xff]  ;;  %v8379_v12 = vld [vmem:[#allocation12_spill] sm:$0xff] }
 0x503   : > { %5282 = vrot.lane.b32.xlu0 %v5281_v14, %s5554_s24 }
 0x504   : > { %3240 = vmatpush1.bf16.msra.mxu0 %v8358_v61 }
 0x505   : > { %4358 = vmatprep.subr.msk.bf16.mxu0 %vm5951_vm7, %v4357_v50 }
 0x507   : > { %5292 = vrot.lane.b32.xlu0 %v5291_v44, %s5553_s23 }
 0x508   : > { %4361 = vmatpush2.bf16.msk.msra.mxu0 %vm5966_vm12, %v4360_v1 }
 0x509   : > { %4364 = vmatprep.subr.msk.bf16.mxu0 %vm5951_vm7, %v4363_v25 }
 0x50b   : > { %5302 = vrot.lane.b32.xlu0 %v5301_v42, %s5553_s23 }
 0x50c   : > { %4367 = vmatpush2.bf16.msk.msra.mxu0 %vm5966_vm12, %v4366_v62 }
 0x50d   : > { %4370 = vmatprep.subr.msk.bf16.mxu0 %vm5951_vm7, %v4369_v3 }
 0x50f   : > { %3113 = vperm.xlu0 %4664, %v3095_v0  }
 0x510   : > { %4373 = vmatpush2.bf16.msk.msra.mxu0 %vm5966_vm12, %v4372_v7 }
 0x511   : > { %4376 = vmatprep.subr.msk.bf16.mxu0 %vm5951_vm7, %v4375_v10  ;;  %v8378_v10 = vpack.c.bf16 %v8376_v15, %v8377_v22 }
 0x513   : > { %3103 = vperm.xlu0 %4664, %v3093_v28  }
 0x514   : > { %4379 = vmatpush2.bf16.msk.msra.mxu0 %vm5966_vm12, %v4378_v19  ;;  %v8380_v19 = vld [vmem:[#allocation8_spill] sm:$0xff] }
 0x51f   : > { %v5148_v41 = vpop.permute.xlu1 %5147 }
 0x520   : > { %v5153_v20 = vpop.permute.xlu0 %5152  ;;  %v5150_v54 = vunpack.i.h.bf16 %v5148_v41  ;;  %v5149_v16 = vunpack.i.l.bf16 %v5148_v41  ;;  %v8381_v41 = vpack.c.bf16 %v8379_v12, %v8380_v19 }
 0x521   : > { %v5155_v53 = vunpack.i.h.bf16 %v5153_v20  ;;  %v5154_v1 = vunpack.i.l.bf16 %v5153_v20 }
 0x527   : > { %v5158_v59 = vpop.permute.xlu1 %5157 }
 0x528   : > { %v5163_v23 = vpop.permute.xlu0 %5162  ;;  %v5160_v4 = vunpack.i.h.bf16 %v5158_v59  ;;  %v5159_v55 = vunpack.i.l.bf16 %v5158_v59 }
 0x529   : > { %v5165_v37 = vunpack.i.h.bf16 %v5163_v23  ;;  %v5164_v31 = vunpack.i.l.bf16 %v5163_v23  ;;  %v8383_v23 = vld [vmem:[#allocation29_spill] sm:$0xff] }
 0x52b   : > { %v2674_v52 = vsel %vm8368_vm3, %v5159_v55, %v5164_v31 }
 0x52f   : > { %v5168_v49 = vpop.permute.xlu1 %5167 }
 0x530   : > { %v5173_v39 = vpop.permute.xlu0 %5172  ;;  %v5170_v9 = vunpack.i.h.bf16 %v5168_v49  ;;  %v5169_v35 = vunpack.i.l.bf16 %v5168_v49  ;;  %v8384_v49 = vld [vmem:[#allocation27_spill] sm:$0xff] }
 0x531   : > { %v5175_v5 = vunpack.i.h.bf16 %v5173_v39  ;;  %v5174_v2 = vunpack.i.l.bf16 %v5173_v39  ;;  %v8385_v39 = vpack.c.bf16 %v8383_v23, %v8384_v49 }
 0x533   : > { %v2604_v48 = vsel %vm8362_vm9, %v5174_v2, %v5169_v35  ;;  %v2605_v29 = vsel %vm8363_vm15, %v5175_v5, %v5170_v9  ;;  %v2676_v44 = vsel %vm8367_vm13, %v5169_v35, %v5174_v2  ;;  %v2677_v6 = vsel %vm8368_vm3, %v5170_v9, %v5175_v5  ;;  %vm8369_vm9 = vmmov %vm8368_vm3  ;;  %v8386_v9 = vld [vmem:[#allocation7_spill] sm:$0xff]  ;;  %v8387_v35 = vld [vmem:[#allocation28_spill] sm:$0xff] }
 0x534   : > { %v4291_v36 = vpack.c.bf16 %v2605_v29, %v2604_v48  ;;  %v2602_v18 = vsel %vm8369_vm9, %v5164_v31, %v5159_v55  ;;  %vm8370_vm15 = vmmov %vm8368_vm3  ;;  %v4294_v58 = vpack.c.bf16 %v2677_v6, %v2676_v44  ;;  %v8388_v5 = vpack.c.bf16 %v8386_v9, %v8387_v35  ;;  %v8390_v55 = vld [vmem:[#allocation19_spill] sm:$0xff] }
 0x535   : > { %v2603_v25 = vsel %vm8370_vm15, %v5165_v37, %v5160_v4  ;;  %vm8375_vm13 = vmmov %vm8368_vm3 }
 0x536   : > { %v4297_v42 = vpack.c.bf16 %v2603_v25, %v2602_v18  ;;  %v2673_v3 = vsel %vm8375_vm13, %v5150_v54, %v5155_v53  ;;  %vm8401_vm9 = vmmov %vm8368_vm3 }
 0x537   : > { %v5178_v56 = vpop.permute.xlu1 %5177  ;;  %vm8402_vm15 = vmmov %vm8368_vm3 }
 0x538   : > { %v5193_v33 = vpop.permute.xlu0 %5192  ;;  %v5180_v17 = vunpack.i.h.bf16 %v5178_v56  ;;  %v5179_v14 = vunpack.i.l.bf16 %v5178_v56  ;;  %vm8407_vm13 = vmmov %vm8368_vm3 }
 0x539   : > { %v5195_v46 = vunpack.i.h.bf16 %v5193_v33  ;;  %v5194_v45 = vunpack.i.l.bf16 %v5193_v33 }
 0x53b   : > { %v2606_v50 = vsel %vm8364_vm6, %v5194_v45, %v5179_v14  ;;  %v2607_v60 = vsel %vm8365_vm14, %v5195_v46, %v5180_v17  ;;  %v2678_v24 = vsel %vm8366_vm10, %v5179_v14, %v5194_v45  ;;  %v2679_v63 = vsel %vm8334_vm4, %v5180_v17, %v5195_v46  ;;  %v7464_v61 = vpop.permute.xlu1 %5182  ;;  %vm8371_vm6 = vmmov %vm8368_vm3  ;;  %v8392_v17 = vld [vmem:[#allocation14_spill] sm:$0xff]  ;;  %v8395_v45 = vld [vmem:[#allocation24_spill] sm:$0xff] }
 0x53c   : > { %v4285_v57 = vpack.c.bf16 %v2607_v60, %v2606_v50  ;;  %v4288_v8 = vpack.c.bf16 %v2679_v63, %v2678_v24  ;;  %v2675_v21 = vsel %vm8371_vm6, %v5160_v4, %v5165_v37  ;;  %vm8372_vm14 = vmmov %vm8368_vm3  ;;  %v5198_v28 = vpop.permute.xlu0 %5197  ;;  %v8389_v4 = vld [vmem:[#allocation15_spill] sm:$0xff]  ;;  %v8393_v14 = vld [vmem:[#allocation18_spill] sm:$0xff]  ;;  %v5184_v18 = vunpack.i.l.bf16 %v7464_v61 }
 0x53d   : > { %v2600_v62 = vsel %vm8372_vm14, %v5154_v1, %v5149_v16  ;;  %vm8373_vm10 = vmmov %vm8368_vm3  ;;  %v4300_v11 = vpack.c.bf16 %v2675_v21, %v2674_v52  ;;  %v8391_v56 = vpack.c.bf16 %v8389_v4, %v8390_v55  ;;  %v8394_v46 = vpack.c.bf16 %v8392_v17, %v8393_v14  ;;  %v8396_v37 = vld [vmem:[#allocation26_spill] sm:$0xff] }
 0x53e   : > { %4286 = vmatprep.subr.msk.bf16.mxu1 %vm5808_vm0, %v4285_v57  ;;  %v2601_v30 = vsel %vm8373_vm10, %v5155_v53, %v5150_v54  ;;  %vm8374_vm4 = vmmov %vm8368_vm3  ;;  %v8397_v31 = vpack.c.bf16 %v8395_v45, %v8396_v37  ;;  %v8398_v57 = vld [vmem:[#allocation23_spill] sm:$0xff] }
 0x53f   : > { %4289 = vmatpush1.bf16.msk.msra.mxu1 %vm5826_vm2, %v4288_v8  ;;  %v7474_v13 = vpop.permute.xlu1 %5187  ;;  %v2672_v34 = vsel %vm8374_vm4, %v5149_v16, %v5154_v1  ;;  %v4303_v40 = vpack.c.bf16 %v2601_v30, %v2600_v62  ;;  %v8399_v8 = vld [vmem:[#allocation25_spill] sm:$0xff]  ;;  %vm8403_vm6 = vmmov %vm8368_vm3  ;;  %v5185_v1 = vunpack.i.h.bf16 %v7464_v61  ;;  %v5199_v62 = vunpack.i.l.bf16 %v5198_v28 }
 0x540   : > { %4292 = vmatprep.subr.msk.bf16.mxu1 %vm5808_vm0, %v4291_v36  ;;  %v4306_v32 = vpack.c.bf16 %v2673_v3, %v2672_v34  ;;  %v7518_v2 = vpop.permute.xlu0 %5207  ;;  %v8400_v54 = vpack.c.bf16 %v8398_v57, %v8399_v8  ;;  %v5190_v52 = vunpack.i.h.bf16 %v7474_v13  ;;  %v5189_v21 = vunpack.i.l.bf16 %v7474_v13  ;;  %vm8404_vm14 = vmmov %vm8368_vm3 }
 0x541   : > { %v2942_v34 = vsel %vm607_vm11, %v5185_v1, %v5184_v18  ;;  %vm8405_vm10 = vmmov %vm8368_vm3 }
 0x542   : > { %v2844_v22 = vsel %vm607_vm11, %v5189_v21, %v5190_v52  ;;  %vm8406_vm4 = vmmov %vm8368_vm3 }
 0x543   : > { %4295 = vmatpush1.bf16.msk.msra.mxu1 %vm5826_vm2, %v4294_v58  ;;  %v7484_v26 = vpop.permute.xlu1 %5202 }
 0x544   : > { %4298 = vmatprep.subr.msk.bf16.mxu1 %vm5808_vm0, %v4297_v42  ;;  %v5200_v42 = vunpack.i.h.bf16 %v5198_v28  ;;  %v5205_v13 = vunpack.i.h.bf16 %v7484_v26  ;;  %v5204_v15 = vunpack.i.l.bf16 %v7484_v26 }
 0x546   : > { %v2845_v19 = vsel %vm607_vm11, %v5199_v62, %v5200_v42  ;;  %v2938_v17 = vsel %vm607_vm11, %v5205_v13, %v5204_v15  ;;  %v2842_v8 = vsel %vm607_vm11, %v5204_v15, %v5205_v13 }
 0x547   : > { %4301 = vmatpush1.bf16.msk.msra.mxu1 %vm5826_vm2, %v4300_v11  ;;  %v7492_v0 = vpop.permute.xlu1 %5217  ;;  %v2846_v11 = vsel %vm607_vm11, %v5184_v18, %v5185_v1  ;;  %v4390_v55 = vpack.c.bf16 %v2845_v19, %v2844_v22 }
 0x548   : > { %4304 = vmatprep.subr.msk.bf16.mxu1 %vm5808_vm0, %v4303_v40  ;;  %v5210_v40 = vunpack.i.h.bf16 %v7518_v2 }
 0x54b   : > { %4307 = vmatpush1.bf16.msk.msra.mxu1 %vm5826_vm2, %v4306_v32  ;;  %v7498_v7 = vpop.permute.xlu1 %5227  ;;  %v5209_v32 = vunpack.i.l.bf16 %v7518_v2 }
 0x54c   : > { %3188 = vmatprep.subr.bf16.mxu1 %v8378_v10  ;;  %v2940_v10 = vsel %vm607_vm11, %v5190_v52, %v5189_v21  ;;  %v5230_v9 = vunpack.i.h.bf16 %v7498_v7  ;;  %v5229_v35 = vunpack.i.l.bf16 %v7498_v7 }
 0x54d   : > { %v2843_v52 = vsel %vm607_vm11, %v5209_v32, %v5210_v40 }
 0x54e   : > { %v4396_v21 = vpack.c.bf16 %v2843_v52, %v2842_v8 }
 0x54f   : > { %4310 = vmatpush2.bf16.msk.msra.mxu1 %vm6577_vm1, %v8381_v41  ;;  %v7508_v59 = vpop.permute.xlu1 %5242  ;;  %v2941_v41 = vsel %vm607_vm11, %v5200_v42, %v5199_v62 }
 0x550   : > { %3190 = vmatprep.subr.bf16.mxu1 %v8385_v39  ;;  %v4387_v4 = vpack.c.bf16 %v2941_v41, %v2940_v10  ;;  %v5245_v62 = vunpack.i.h.bf16 %v7508_v59 }
 0x553   : > { %4313 = vmatpush2.bf16.msk.msra.mxu1 %vm6577_vm1, %v8388_v5  ;;  %v7523_v33 = vpop.permute.xlu1 %5247 }
 0x554   : > { %3192 = vmatprep.subr.bf16.mxu1 %v8391_v56  ;;  %v2939_v56 = vsel %vm607_vm11, %v5210_v40, %v5209_v32 }
 0x557   : > { %4316 = vmatpush2.bf16.msk.msra.mxu1 %vm6577_vm1, %v8394_v46 }
 0x558   : > { %3194 = vmatprep.subr.bf16.mxu1 %v8397_v31 }
 0x559   : > { %v5213_v48 = vpop.permute.xlu0 %5212 }
 0x55a   : > { %v5215_v29 = vunpack.i.h.bf16 %v5213_v48  ;;  %v5214_v50 = vunpack.i.l.bf16 %v5213_v48  ;;  %v5258_v60 = vpop.permute.xlu1 %5257 }
 0x55b   : > { %v5260_v24 = vunpack.i.h.bf16 %v5258_v60  ;;  %v5259_v63 = vunpack.i.l.bf16 %v5258_v60  ;;  %4319 = vmatpush2.bf16.msk.msra.mxu1 %vm6577_vm1, %v8400_v54  ;;  %v5250_v60 = vunpack.i.h.bf16 %v7523_v33  ;;  %v4393_v54 = vpack.c.bf16 %v2939_v56, %v2938_v17 }
 0x55d   : > { %v2623_v16 = vsel %vm8401_vm9, %v5215_v29, %v5260_v24  ;;  %v2695_v44 = vsel %vm8402_vm15, %v5260_v24, %v5215_v29  ;;  %v2622_v6 = vsel %vm8368_vm3, %v5214_v50, %v5259_v63  ;;  %v2694_v36 = vsel %vm8403_vm6, %v5259_v63, %v5214_v50  ;;  %v7542_v53 = vpop.permute.xlu0 %5222  ;;  %vm8408_vm9 = vmmov %vm8368_vm3 }
 0x55e   : > { %v4321_v25 = vpack.c.bf16 %v2623_v16, %v2622_v6  ;;  %v4324_v58 = vpack.c.bf16 %v2695_v44, %v2694_v36  ;;  %v7566_v26 = vpop.permute.xlu1 %5262  ;;  %v5225_v37 = vunpack.i.h.bf16 %v7542_v53  ;;  %v5224_v31 = vunpack.i.l.bf16 %v7542_v53  ;;  %vm8409_vm15 = vmmov %vm8368_vm3 }
 0x55f   : > { %v5249_v24 = vunpack.i.l.bf16 %v7523_v33  ;;  %v5220_v16 = vunpack.i.h.bf16 %v7492_v0  ;;  %v5219_v44 = vunpack.i.l.bf16 %v7492_v0  ;;  %vm8410_vm6 = vmmov %vm8368_vm3  ;;  %v5265_v40 = vunpack.i.h.bf16 %v7566_v26 }
 0x560   : > { %4322 = vmatprep.subr.msk.bf16.mxu1 %vm5808_vm0, %v4321_v25  ;;  %v2937_v18 = vsel %vm607_vm11, %v5225_v37, %v5224_v31  ;;  %v5264_v32 = vunpack.i.l.bf16 %v7566_v26 }
 0x561   : > { %v5233_v30 = vpop.permute.xlu0 %5232  ;;  %4325 = vmatpush2.bf16.msk.msra.mxu1 %vm5826_vm2, %v4324_v58  ;;  %v2936_v42 = vsel %vm607_vm11, %v5220_v16, %v5219_v44 }
 0x562   : > { %v5235_v61 = vunpack.i.h.bf16 %v5233_v30  ;;  %v5234_v3 = vunpack.i.l.bf16 %v5233_v30  ;;  %v5273_v6 = vpop.permute.xlu1 %5272  ;;  %v5244_v30 = vunpack.i.l.bf16 %v7508_v59  ;;  %v2840_v59 = vsel %vm607_vm11, %v5219_v44, %v5220_v16 }
 0x564   : > { %v2847_v28 = vsel %vm607_vm11, %v5234_v3, %v5235_v61  ;;  %v2943_v12 = vsel %vm607_vm11, %v5235_v61, %v5234_v3  ;;  %v2958_v19 = vsel %vm607_vm11, %v5245_v62, %v5244_v30 }
 0x565   : > { %v4381_v23 = vpack.c.bf16 %v2943_v12, %v2942_v34  ;;  %v4384_v49 = vpack.c.bf16 %v2847_v28, %v2846_v11  ;;  %v5238_v39 = vpop.permute.xlu0 %5237  ;;  %v2841_v11 = vsel %vm607_vm11, %v5224_v31, %v5225_v37  ;;  %v4399_v34 = vpack.c.bf16 %v2937_v18, %v2936_v42 }
 0x566   : > { %v5240_v5 = vunpack.i.h.bf16 %v5238_v39  ;;  %v5239_v2 = vunpack.i.l.bf16 %v5238_v39  ;;  %v5288_v15 = vpop.permute.xlu1 %5287  ;;  %v2862_v28 = vsel %vm607_vm11, %v5244_v30, %v5245_v62  ;;  %v4402_v12 = vpack.c.bf16 %v2841_v11, %v2840_v59  ;;  %v5506_v39 = vld [vmem:[%s8032_s6 + $0x8] ss:$20 sps:$4 sm:$0xff]   ;;  %v5518_v59 = vld [vmem:[%s8032_s6 + $0x10] ss:$20 sps:$4 sm:$0xff]  }
 0x567   : > { %4382 = vmatprep.subr.msk.bf16.mxu0 %vm5951_vm7, %v4381_v23 }
 0x568   : > { %v2620_v14 = vsel %vm8404_vm14, %v5239_v2, %v5229_v35  ;;  %v2621_v46 = vsel %vm8405_vm10, %v5240_v5, %v5230_v9  ;;  %v2692_v45 = vsel %vm8406_vm4, %v5229_v35, %v5239_v2  ;;  %v2693_v7 = vsel %vm8407_vm13, %v5230_v9, %v5240_v5  ;;  %4385 = vmatpush2.bf16.msk.msra.mxu0 %vm5966_vm12, %v4384_v49  ;;  %v5512_v2 = vld [vmem:[%s8032_s6 + $0x34] ss:$20 sps:$4 sm:$0xff]   ;;  %vm8411_vm14 = vmmov %vm8368_vm3 }
 0x569   : > { %v4327_v48 = vpack.c.bf16 %v2621_v46, %v2620_v14  ;;  %v4330_v29 = vpack.c.bf16 %v2693_v7, %v2692_v45  ;;  %v5253_v50 = vpop.permute.xlu0 %5252  ;;  %4388 = vmatprep.subr.msk.bf16.mxu0 %vm5951_vm7, %v4387_v4  ;;  %v2956_v9 = vsel %vm607_vm11, %v5265_v40, %v5264_v32  ;;  %v5275_v4 = vunpack.i.h.bf16 %v5273_v6  ;;  %vm8412_vm10 = vmmov %vm8368_vm3 }
 0x56a   : > { %v5255_v63 = vunpack.i.h.bf16 %v5253_v50  ;;  %v5254_v57 = vunpack.i.l.bf16 %v5253_v50  ;;  %v5290_v14 = vunpack.i.h.bf16 %v5288_v15  ;;  %v5289_v46 = vunpack.i.l.bf16 %v5288_v15  ;;  %v5298_v37 = vpop.permute.xlu1 %5297  ;;  %vm8413_vm4 = vmmov %vm8368_vm3  ;;  %v5519_v15 = vld [vmem:[%s8032_s6 + $0x38] ss:$20 sps:$4 sm:$0xff]  }
 0x56b   : > { %4328 = vmatprep.subr.msk.bf16.mxu1 %vm5808_vm0, %v4327_v48  ;;  %vm8414_vm13 = vmmov %vm8368_vm3  ;;  %v5300_v16 = vunpack.i.h.bf16 %v5298_v37  ;;  %v5299_v44 = vunpack.i.l.bf16 %v5298_v37 }
 0x56c   : > { %v2618_v36 = vsel %vm8408_vm9, %v5254_v57, %v5249_v24  ;;  %v2619_v53 = vsel %vm8409_vm15, %v5255_v63, %v5250_v60  ;;  %v2690_v1 = vsel %vm8368_vm3, %v5249_v24, %v5254_v57  ;;  %v2691_v33 = vsel %vm8410_vm6, %v5250_v60, %v5255_v63  ;;  %4331 = vmatpush2.bf16.msk.msra.mxu1 %vm5826_vm2, %v4330_v29 }
 0x56d   : > { %v4333_v25 = vpack.c.bf16 %v2619_v53, %v2618_v36  ;;  %v4336_v58 = vpack.c.bf16 %v2691_v33, %v2690_v1  ;;  %4391 = vmatpush2.bf16.msk.msra.mxu0 %vm5966_vm12, %v4390_v55  ;;  %v5268_v0 = vpop.permute.xlu0 %5267  ;;  %v5274_v55 = vunpack.i.l.bf16 %v5273_v6  ;;  %v2860_v57 = vsel %vm607_vm11, %v5264_v32, %v5265_v40  ;;  %v5509_v36 = vld [vmem:[%s8032_s6] ss:$20 sps:$4 sm:$0xff]  }
 0x56e   : > { %4394 = vmatprep.subr.msk.bf16.mxu0 %vm5951_vm7, %v4393_v54  ;;  %v5270_v61 = vunpack.i.h.bf16 %v5268_v0  ;;  %v5269_v3 = vunpack.i.l.bf16 %v5268_v0  ;;  %v2858_v53 = vsel %vm607_vm11, %v5289_v46, %v5290_v14  ;;  %v2954_v1 = vsel %vm607_vm11, %v5290_v14, %v5289_v46 }
 0x56f   : > { %4334 = vmatprep.subr.msk.bf16.mxu1 %vm5808_vm0, %v4333_v25  ;;  %v5514_v25 = vld [vmem:[%s8032_s6 + $0x30] ss:$20 sps:$4 sm:$0xff]   ;;  %v2856_v30 = vsel %vm607_vm11, %v5299_v44, %v5300_v16  ;;  %v2952_v11 = vsel %vm607_vm11, %v5300_v16, %v5299_v44  ;;  %v8415_v32 = vmov 0  }
 0x570   : > { %4337 = vmatpush2.bf16.msk.msra.mxu1 %vm5826_vm2, %v4336_v58  ;;  %v2957_v41 = vsel %vm607_vm11, %v5270_v61, %v5269_v3  ;;  %v2861_v45 = vsel %vm607_vm11, %v5269_v3, %v5270_v61  ;;  %v5515_v58 = vld [vmem:[%s8032_s6 + $0x2c] ss:$20 sps:$4 sm:$0xff]  }
 0x571   : > { %4397 = vmatpush2.bf16.msk.msra.mxu0 %vm5966_vm12, %v4396_v21  ;;  %v5278_v13 = vpop.permute.xlu0 %5277  ;;  %v4411_v7 = vpack.c.bf16 %v2957_v41, %v2956_v9  ;;  %v4414_v6 = vpack.c.bf16 %v2861_v45, %v2860_v57 }
 0x572   : > { %v5280_v22 = vunpack.i.h.bf16 %v5278_v13  ;;  %v5279_v10 = vunpack.i.l.bf16 %v5278_v13  ;;  %4400 = vmatprep.subr.msk.bf16.mxu0 %vm5951_vm7, %v4399_v34  ;;  %v5517_v13 = vld [vmem:[%s8032_s6 + $0x28] ss:$20 sps:$4 sm:$0xff]  }
 0x574   : > { %v2863_v23 = vsel %vm607_vm11, %v5279_v10, %v5280_v22  ;;  %v2959_v49 = vsel %vm607_vm11, %v5280_v22, %v5279_v10 }
 0x575   : > { %v4405_v35 = vpack.c.bf16 %v2959_v49, %v2958_v19  ;;  %v4408_v26 = vpack.c.bf16 %v2863_v23, %v2862_v28  ;;  %4403 = vmatpush2.bf16.msk.msra.mxu0 %vm5966_vm12, %v4402_v12  ;;  %v5283_v5 = vpop.permute.xlu0 %5282 }
 0x576   : > { %v5285_v56 = vunpack.i.h.bf16 %v5283_v5  ;;  %v5284_v17 = vunpack.i.l.bf16 %v5283_v5 }
 0x577   : > { %4406 = vmatprep.subr.msk.bf16.mxu0 %vm5951_vm7, %v4405_v35  ;;  %v3109_v28 = vpop.permute.xlu1 %3108 }
 0x578   : > { %v2616_v31 = vsel %vm8411_vm14, %v5284_v17, %v5274_v55  ;;  %v2617_v48 = vsel %vm8412_vm10, %v5285_v56, %v5275_v4  ;;  %v2688_v29 = vsel %vm8413_vm4, %v5274_v55, %v5284_v17  ;;  %v2689_v50 = vsel %vm8414_vm13, %v5275_v4, %v5285_v56  ;;  %3258 = vmatmul.mubr.bf16.vlgmr.msra.gmra.mxu0 %v5506_v39 }
 0x579   : > { %v4339_v60 = vpack.c.bf16 %v2617_v48, %v2616_v31  ;;  %v4342_v24 = vpack.c.bf16 %v2689_v50, %v2688_v29  ;;  %4409 = vmatpush1.bf16.msk.msra.mxu0 %vm5966_vm12, %v4408_v26  ;;  %v5293_v63 = vpop.permute.xlu0 %5292  ;;  %3267 = vmatprep.mubr.bf16.mxu0 %v5512_v2  ;;  %vm8416_vm13 = vcmask 916480  }
 0x57a   : > { %v5295_v8 = vunpack.i.h.bf16 %v5293_v63  ;;  %v5294_v54 = vunpack.i.l.bf16 %v5293_v63  ;;  %4412 = vmatprep.subr.msk.bf16.mxu0 %vm5951_vm7, %v4411_v7 }
 0x57b   : > { %4340 = vmatprep.subr.msk.bf16.mxu1 %vm5808_vm0, %v4339_v60  ;;  %v3099_v9 = vpop.permute.xlu1 %3098 }
 0x57c   : > { %v2859_v33 = vsel %vm607_vm11, %v5294_v54, %v5295_v8  ;;  %v2955_v18 = vsel %vm607_vm11, %v5295_v8, %v5294_v54  ;;  %4343 = vmatpush2.bf16.msk.msra.mxu1 %vm5826_vm2, %v4342_v24 }
 0x57d   : > { %v4417_v0 = vpack.c.bf16 %v2955_v18, %v2954_v1  ;;  %v4420_v52 = vpack.c.bf16 %v2859_v33, %v2858_v53  ;;  %4415 = vmatpush1.bf16.msk.msra.mxu0 %vm5966_vm12, %v4414_v6  ;;  %v5303_v21 = vpop.permute.xlu0 %5302 }
 0x57e   : > { %v5305_v42 = vunpack.i.h.bf16 %v5303_v21  ;;  %v5304_v62 = vunpack.i.l.bf16 %v5303_v21 }
 0x57f   : > { %3205 = vmatmul.mubr.bf16.vlgmr.msra.gmra.mxu1 %v5509_v36  ;;  %4418 = vmatprep.subr.msk.bf16.mxu0 %vm5951_vm7, %v4417_v0 }
 0x580   : > { %v2857_v34 = vsel %vm607_vm11, %v5304_v62, %v5305_v42  ;;  %v2953_v61 = vsel %vm607_vm11, %v5305_v42, %v5304_v62  ;;  %3268 = vmatmul.mubr.bf16.gmra.mxu0 %v5514_v25  ;;  %3214 = vmatprep.mubr.bf16.mxu1 %v5515_v58 }
 0x581   : > { %v4423_v3 = vpack.c.bf16 %v2953_v61, %v2952_v11  ;;  %v4426_v40 = vpack.c.bf16 %v2857_v34, %v2856_v30  ;;  %4421 = vmatpush1.bf16.msk.msra.mxu0 %vm5966_vm12, %v4420_v52  ;;  %3310 = vmatprep.mubr.bf16.mxu0 %v8415_v32 }
 0x583   : > { %4424 = vmatprep.subr.msk.bf16.mxu0 %vm5951_vm7, %v4423_v3 }
 0x585   : > { %4427 = vmatpush1.bf16.msk.msra.mxu0 %vm5966_vm12, %v4426_v40 }
 0x587   : > { %3215 = vmatmul.mubr.bf16.gmra.mxu1 %v5517_v13 }
 0x588   : > { %4428 = vmatmul.mubr.msk.bf16.vlgmr.msra.gmra.mxu0 %vm1976_vm8, %v5518_v59 }
 0x589   : > { %3320 = vmatprep.mubr.bf16.mxu0 %v8415_v32 }
 0x58a   : > { %v3114_v23 = vpop.permute.xlu0 %3113 }
 0x58e   : > { %v3104_v56 = vpop.permute.xlu0 %3103 }
 0x590   : > { %4429 = vmatmul.mubr.msk.bf16.gmra.mxu0 %vm1976_vm8, %v5519_v15 }
 0x591   : > { %3876 = vmatprep.mubr.bf16.mxu0 %v8415_v32 }
 0x638   : > { %v3259_v22 = vpop.f32.mrf.mxu0 }
 0x63a   : > { %v3261_v10 = vpop.f32.mrf.mxu0 }
 0x63c   : > { %v3263_v12 = vpop.f32.mrf.mxu0 }
 0x63e   : > { %v3265_v19 = vpop.f32.mrf.mxu0 }
 0x63f   : > { %v3206_v41 = vpop.f32.mrf.mxu1 }
 0x640   : > { %v3269_v49 = vpop.f32.mrf.mxu0  ;;  %v3207_v26 = vadd.f32 %v3206_v41, %v3099_v9 }
 0x641   : > { %v3208_v39 = vpop.f32.mrf.mxu1 }
 0x642   : > { %v3271_v35 = vpop.f32.mrf.mxu0  ;;  %v3209_v4 = vadd.f32 %v3208_v39, %v3099_v9  ;;  %v3260_v45 = vadd.f32 %v3259_v22, %v3207_v26 }
 0x643   : > { %v3210_v5 = vpop.f32.mrf.mxu1 }
 0x644   : > { %v3273_v2 = vpop.f32.mrf.mxu0  ;;  %v3211_v14 = vadd.f32 %v3210_v5, %v3104_v56  ;;  %v3262_v29 = vadd.f32 %v3261_v10, %v3209_v4 }
 0x645   : > { %v3212_v55 = vpop.f32.mrf.mxu1 }
 0x646   : > { %v3275_v17 = vpop.f32.mrf.mxu0  ;;  %v3213_v37 = vadd.f32 %v3212_v55, %v3104_v56  ;;  %v3264_v8 = vadd.f32 %v3263_v12, %v3211_v14 }
 0x647   : > { %v3216_v46 = vpop.f32.mrf.mxu1 }
 0x648   : > { %v3312_v7 = vpop.f32.mrf.mxu0  ;;  %v3217_v50 = vadd.f32 %v3216_v46, %v3109_v28  ;;  %v3266_v53 = vadd.f32 %v3265_v19, %v3213_v37 }
 0x649   : > { %v3313_v31 = vadd.f32 %v3312_v7, %v3260_v45  ;;  %v3218_v48 = vpop.f32.mrf.mxu1 }
 0x64a   : > { %v3314_v60 = vpop.f32.mrf.mxu0  ;;  %v3219_v54 = vadd.f32 %v3218_v48, %v3109_v28  ;;  %v3270_v25 = vadd.f32 %v3269_v49, %v3217_v50 }
 0x64b   : > { %vm3331_vm8 = vcmp.ge.f32.partialorder %v3313_v31, 0.0  ;;  %v3339_v24 = vmul.f32 0.01, %v3313_v31  ;;  %v3315_v63 = vadd.f32 %v3314_v60, %v3262_v29  ;;  %v3220_v57 = vpop.f32.mrf.mxu1 }
 0x64c   : > { %v3316_v16 = vpop.f32.mrf.mxu0  ;;  %v3221_v33 = vadd.f32 %v3220_v57, %v3114_v23  ;;  %v3272_v62 = vadd.f32 %v3271_v35, %v3219_v54 }
 0x64d   : > { %vm3332_vm9 = vcmp.ge.f32.partialorder %v3315_v63, 0.0  ;;  %v3340_v44 = vmul.f32 0.01, %v3315_v63  ;;  %v3317_v6 = vadd.f32 %v3316_v16, %v3264_v8  ;;  %v3222_v36 = vpop.f32.mrf.mxu1  ;;  %v7687_v1 = vsel %vm3331_vm8, %v3313_v31, %v3339_v24  ;;  %vm8417_vm8 = vmmov %vm8416_vm13 }
 0x64e   : > { %v3318_v18 = vpop.f32.mrf.mxu0  ;;  %v3223_v21 = vadd.f32 %v3222_v36, %v3114_v23  ;;  %v3274_v40 = vadd.f32 %v3273_v2, %v3221_v33 }
 0x64f   : > { %v7689_v58 = vsel %vm3332_vm9, %v3315_v63, %v3340_v44  ;;  %vm3333_vm15 = vcmp.ge.f32.partialorder %v3317_v6, 0.0  ;;  %v3341_v0 = vmul.f32 0.01, %v3317_v6  ;;  %v3319_v52 = vadd.f32 %v3318_v18, %v3266_v53  ;;  %vm8418_vm9 = vmmov %vm8417_vm8 }
 0x650   : > { %v3322_v42 = vpop.f32.mrf.mxu0  ;;  %v7693_v30 = vpack.i.bf16 %v7689_v58, %v7687_v1  ;;  %v3276_v23 = vadd.f32 %v3275_v17, %v3223_v21 }
 0x651   : > { %v7695_v11 = vsel %vm3333_vm15, %v3317_v6, %v3341_v0  ;;  %vm3334_vm3 = vcmp.ge.f32.partialorder %v3319_v52, 0.0  ;;  %v3342_v34 = vmul.f32 0.01, %v3319_v52  ;;  %v3323_v61 = vadd.f32 %v3322_v42, %v3270_v25  ;;  %vm8419_vm15 = vmmov %vm8417_vm8  ;;  %v8420_v6 = vld [vmem:[#allocation3_spill] sm:$0xff] }
 0x652   : > { %v3324_v3 = vpop.f32.mrf.mxu0  ;;  %v7699_v32 = vpack.i.bf16 %v7695_v11, %v7687_v1  ;;  %v3751_v13 = vpack.c.bf16 %v7695_v11, %v7687_v1 }
 0x653   : > { %v7703_v59 = vsel %vm3334_vm3, %v3319_v52, %v3342_v34  ;;  %vm3335_vm6 = vcmp.ge.f32.partialorder %v3323_v61, 0.0  ;;  %v3343_v15 = vmul.f32 0.01, %v3323_v61  ;;  %v3325_v22 = vadd.f32 %v3324_v3, %v3272_v62 }
 0x654   : > { %v3326_v10 = vpop.f32.mrf.mxu0  ;;  %v7707_v28 = vpack.i.bf16 %v7703_v59, %v7689_v58  ;;  %v7711_v12 = vpack.i.bf16 %v7703_v59, %v7695_v11  ;;  %v3752_v9 = vpack.c.bf16 %v7703_v59, %v7689_v58  ;;  %vm8421_vm3 = vcmp.lt.s32.totalorder %v8420_v6, 240 }
 0x655   : > { %vm3336_vm14 = vcmp.ge.f32.partialorder %v3325_v22, 0.0  ;;  %v3344_v19 = vmul.f32 0.01, %v3325_v22  ;;  %v3327_v41 = vadd.f32 %v3326_v10, %v3274_v40  ;;  %v7713_v49 = vsel %vm3335_vm6, %v3323_v61, %v3343_v15  ;;  %vm8422_vm6 = vmmov %vm8417_vm8 }
 0x656   : > { %v3328_v39 = vpop.f32.mrf.mxu0 }
 0x657   : > { %v7717_v35 = vsel %vm3336_vm14, %v3325_v22, %v3344_v19  ;;  %vm3337_vm10 = vcmp.ge.f32.partialorder %v3327_v41, 0.0  ;;  %v3345_v26 = vmul.f32 0.01, %v3327_v41  ;;  %v3329_v5 = vadd.f32 %v3328_v39, %v3276_v23  ;;  %vm8423_vm14 = vmmov %vm8421_vm3 }
 0x658   : > { %v7721_v2 = vpack.i.bf16 %v7717_v35, %v7713_v49 }
 0x659   : > { %v7723_v4 = vsel %vm3337_vm10, %v3327_v41, %v3345_v26  ;;  %vm3338_vm4 = vcmp.ge.f32.partialorder %v3329_v5, 0.0  ;;  %v3346_v55 = vmul.f32 0.01, %v3329_v5  ;;  %vm8424_vm10 = vmmov %vm8422_vm6 }
 0x65a   : > { %5307 = vrot.lane.b32.xlu1 %v7721_v2, %s5551_s22  ;;  %v7729_v56 = vpack.i.bf16 %v7723_v4, %v7713_v49  ;;  %v3753_v17 = vpack.c.bf16 %v7723_v4, %v7713_v49 }
 0x65b   : > { %v7733_v14 = vsel %vm3338_vm4, %v3329_v5, %v3346_v55  ;;  %vm8425_vm4 = vmmov %vm8421_vm3 }
 0x65c   : > { %v7737_v46 = vpack.i.bf16 %v7733_v14, %v7723_v4  ;;  %v7741_v45 = vpack.i.bf16 %v7733_v14, %v7717_v35  ;;  %v3754_v7 = vpack.c.bf16 %v7733_v14, %v7717_v35 }
 0x65e   : > { %5317 = vrot.lane.b32.xlu0 %v7737_v46, %s5551_s22  ;;  %5312 = vrot.lane.b32.xlu1 %v7693_v30, %s5551_s22 }
 0x662   : > { %5322 = vrot.lane.b32.xlu0 %v7711_v12, %s5551_s22  ;;  %5332 = vrot.lane.b32.xlu1 %v7741_v45, %s5550_s21 }
 0x666   : > { %5327 = vrot.lane.b32.xlu0 %v7729_v56, %s5550_s21  ;;  %5337 = vrot.lane.b32.xlu1 %v7707_v28, %s5550_s21 }
 0x66a   : > { %5342 = vrot.lane.b32.xlu0 %v7699_v32, %s5550_s21 }
 0x6cc   : > { %v5308_v37 = vpop.permute.xlu1 %5307 }
 0x6cd   : > { %v5310_v31 = vunpack.i.h.bf16 %v5308_v37  ;;  %v5309_v48 = vunpack.i.l.bf16 %v5308_v37 }
 0x6cf   : > { %v7760_v8 = vsel %vm8416_vm13, %v5310_v31, %v5309_v48  ;;  %v7763_v54 = vsel %vm8417_vm8, %v5309_v48, %v5310_v31  ;;  %vm8426_vm13 = vmmov %vm8422_vm6 }
 0x6d0   : > { %v5318_v29 = vpop.permute.xlu0 %5317  ;;  %v5313_v50 = vpop.permute.xlu1 %5312  ;;  %v7786_v52 = vsel %vm8423_vm14, %v7760_v8, 0.0  ;;  %vm8427_vm8 = vmmov %vm8422_vm6 }
 0x6d1   : > { %v5320_v60 = vunpack.i.h.bf16 %v5318_v29  ;;  %v5319_v24 = vunpack.i.l.bf16 %v5318_v29  ;;  %v5315_v63 = vunpack.i.h.bf16 %v5313_v50  ;;  %v5314_v57 = vunpack.i.l.bf16 %v5313_v50 }
 0x6d3   : > { %v7766_v16 = vsel %vm8418_vm9, %v5319_v24, %v5320_v60  ;;  %v7769_v44 = vsel %vm8419_vm15, %v5320_v60, %v5319_v24  ;;  %v7779_v33 = vsel %vm8422_vm6, %v5315_v63, %v5314_v57  ;;  %v7794_v61 = vsel %vm8424_vm10, %v5314_v57, %v5315_v63  ;;  %vm8428_vm9 = vmmov %vm8421_vm3 }
 0x6d4   : > { %v7774_v36 = vsel %vm8421_vm3, %v7769_v44, 0.0  ;;  %v4500_v53 = vpack.c.bf16 %v7769_v44, %v7760_v8  ;;  %v5323_v18 = vpop.permute.xlu0 %5322  ;;  %v5333_v25 = vpop.permute.xlu1 %5332  ;;  %v5346_v0 = vpack.i.bf16 %v7766_v16, %v7763_v54  ;;  %v3757_v34 = vpack.c.bf16 %v7766_v16, %v7763_v54 }
 0x6d5   : > { %v5325_v21 = vunpack.i.h.bf16 %v5323_v18  ;;  %v5324_v42 = vunpack.i.l.bf16 %v5323_v18  ;;  %v5351_v62 = vpack.i.bf16 %v7774_v36, %v7786_v52  ;;  %v7799_v3 = vsel %vm8425_vm4, %v7779_v33, 0.0 }
 0x6d6   : > { %5347 = vrot.lane.b32.xlu0 %v5346_v0, %s5554_s24  ;;  %v5335_v39 = vunpack.i.h.bf16 %v5333_v25  ;;  %v5334_v26 = vunpack.i.l.bf16 %v5333_v25  ;;  %vm8429_vm15 = vcmask 130048  }
 0x6d7   : > { %v7802_v40 = vsel %vm8426_vm13, %v5324_v42, %v5325_v21  ;;  %v7805_v15 = vsel %vm8427_vm8, %v5325_v21, %v5324_v42  ;;  %5352 = vrot.lane.b32.xlu1 %v5351_v62, %s5554_s24  ;;  %vm8430_vm3 = vmmov %vm8429_vm15 }
 0x6d8   : > { %v7810_v22 = vsel %vm8428_vm9, %v7805_v15, 0.0  ;;  %v4503_v10 = vpack.c.bf16 %v7805_v15, %v7779_v33  ;;  %v5328_v19 = vpop.permute.xlu0 %5327  ;;  %v5361_v41 = vpack.i.bf16 %v7802_v40, %v7794_v61  ;;  %v3755_v23 = vpack.c.bf16 %v7802_v40, %v7794_v61  ;;  %v5338_v37 = vpop.permute.xlu1 %5337  ;;  %vm8431_vm6 = vmmov %vm8430_vm3 }
 0x6d9   : > { %v5330_v5 = vunpack.i.h.bf16 %v5328_v19  ;;  %v5329_v55 = vunpack.i.l.bf16 %v5328_v19  ;;  %v5356_v31 = vpack.i.bf16 %v7810_v22, %v7799_v3  ;;  %vm8432_vm14 = vmmov %vm8430_vm3  ;;  %v5340_v6 = vunpack.i.h.bf16 %v5338_v37 }
 0x6da   : > { %5362 = vrot.lane.b32.xlu0 %v5361_v41, %s5554_s24  ;;  %v5339_v18 = vunpack.i.l.bf16 %v5338_v37  ;;  %vm8433_vm10 = vmmov %vm8430_vm3 }
 0x6db   : > { %v3397_v48 = vsel %vm8429_vm15, %v5334_v26, %v5329_v55  ;;  %v3398_v29 = vsel %vm8430_vm3, %v5335_v39, %v5330_v5  ;;  %v3385_v50 = vsel %vm8431_vm6, %v5329_v55, %v5334_v26  ;;  %v3386_v60 = vsel %vm8432_vm14, %v5330_v5, %v5335_v39  ;;  %5357 = vrot.lane.b32.xlu1 %v5356_v31, %s5554_s24  ;;  %vm8434_vm4 = vmmov %vm8430_vm3  ;;  %v8437_v26 = vld [vmem:[#allocation2_spill] sm:$0xff] }
 0x6dc   : > { %v4434_v24 = vpack.c.bf16 %v3398_v29, %v3397_v48  ;;  %v5343_v63 = vpop.permute.xlu0 %5342  ;;  %v3750_v57 = vpack.c.bf16 %v3386_v60, %v3385_v50  ;;  %vm8435_vm13 = vmmov %vm8430_vm3  ;;  %vm8438_vm9 = vcmp.ge.s32.totalorder %v8437_v26, 16  ;;  %v5386_v31 = vpack.i.bf16 %v3386_v60, %v3385_v50 }
 0x6dd   : > { %v5345_v25 = vunpack.i.h.bf16 %v5343_v63  ;;  %v5344_v0 = vunpack.i.l.bf16 %v5343_v63  ;;  %vm8436_vm8 = vmmov %vm8430_vm3  ;;  %v3403_v5 = vsel %vm8438_vm9, %v3397_v48, 0.0 }
 0x6de   : > { %3801 = vmatprep.subr.bf16.mxu1 %v3750_v57  ;;  %5372 = vrot.lane.b32.xlu0 %v7729_v56, %s5554_s24  ;;  %vm8439_vm15 = vmmov %vm8438_vm9 }
 0x6df   : > { %v3395_v21 = vsel %vm8433_vm10, %v5339_v18, %v5344_v0  ;;  %v3396_v42 = vsel %vm8434_vm4, %v5340_v6, %v5345_v25  ;;  %4435 = vmatpush1.bf16.msk.msra.mxu1 %vm6577_vm1, %v4434_v24  ;;  %v3383_v62 = vsel %vm8435_vm13, %v5344_v0, %v5339_v18  ;;  %v3384_v19 = vsel %vm8436_vm8, %v5345_v25, %v5340_v6  ;;  %vm8440_vm3 = vmmov %vm8438_vm9 }
 0x6e0   : > { %v4437_v41 = vpack.c.bf16 %v3396_v42, %v3395_v21  ;;  %5367 = vrot.lane.b32.xlu1 %v7741_v45, %s5554_s24  ;;  %v3748_v39 = vpack.c.bf16 %v3384_v19, %v3383_v62  ;;  %v3405_v56 = vsel %vm8439_vm15, %v3398_v29, 0.0  ;;  %v3399_v45 = vsel %vm8440_vm3, %v3395_v21, 0.0  ;;  %vm8441_vm6 = vmmov %vm8440_vm3 }
 0x6e1   : > { %v5396_v55 = vpack.i.bf16 %v3405_v56, %v3403_v5  ;;  %v3401_v37 = vsel %vm8441_vm6, %v3396_v42, 0.0  ;;  %v5391_v20 = vpack.i.bf16 %v3384_v19, %v3383_v62  ;;  %v5431_v24 = vpack.i.bf16 %v3383_v62, %v3399_v45 }
 0x6e2   : > { %3803 = vmatprep.subr.bf16.mxu1 %v3748_v39  ;;  %5382 = vrot.lane.b32.xlu0 %v7699_v32, %s5554_s24  ;;  %v5401_v48 = vpack.i.bf16 %v3401_v37, %v3399_v45  ;;  %v5436_v32 = vpack.i.bf16 %v3386_v60, %v3405_v56  ;;  %v5441_v29 = vpack.i.bf16 %v3384_v19, %v3401_v37 }
 0x6e3   : > { %4438 = vmatpush1.bf16.msk.msra.mxu1 %vm6577_vm1, %v4437_v41  ;;  %vm8442_vm1 = vcmask 7168  }
 0x6e4   : > { %5377 = vrot.lane.b32.xlu1 %v7707_v28, %s5554_s24  ;;  %v5426_v28 = vpack.i.bf16 %v3385_v50, %v3403_v5  ;;  %v3772_v50 = vld [vmem:[%s8035_s9 + $0x8] sm:$0xf]  ;;  %vm8443_vm14 = vmmov %vm8442_vm1 }
 0x6e5   : > { %vm8444_vm10 = vmmov %vm8442_vm1 }
 0x6e6   : > { %5397 = vrot.lane.b32.xlu0 %v5396_v55, %s5554_s24  ;;  %vm8445_vm4 = vmmov %vm8442_vm1 }
 0x6e7   : > { %vm8446_vm13 = vmmov %vm8442_vm1 }
 0x6e8   : > { %5387 = vrot.lane.b32.xlu1 %v5386_v31, %s5554_s24  ;;  %vm8447_vm8 = vmmov %vm8442_vm1 }
 0x6e9   : > { %vm8448_vm9 = vmmov %vm8442_vm1 }
 0x6ea   : > { %5402 = vrot.lane.b32.xlu0 %v5401_v48, %s5554_s24  ;;  %vm8449_vm15 = vmmov %vm8442_vm1 }
 0x6eb   : > { %vm8450_vm3 = vmmov %vm8442_vm1 }
 0x6ec   : > { %5392 = vrot.lane.b32.xlu1 %v5391_v20, %s5554_s24  ;;  %vm8451_vm6 = vmmov %vm8442_vm1 }
 0x6ee   : > { %5412 = vrot.lane.b32.xlu0 %v7737_v46, %s5553_s23  ;;  %v5451_v46 = vpack.i.bf16 %v7799_v3, %v7794_v61 }
 0x6f0   : > { %5407 = vrot.lane.b32.xlu1 %v7721_v2, %s5553_s23  ;;  %v5456_v2 = vpack.i.bf16 %v7774_v36, %v7766_v16  ;;  %v3771_v36 = vld [vmem:[%s8035_s9] sm:$0xff] }
 0x6f2   : > { %5422 = vrot.lane.b32.xlu0 %v7711_v12, %s5553_s23  ;;  %v5461_v12 = vpack.i.bf16 %v7810_v22, %v7802_v40 }
 0x6f4   : > { %5417 = vrot.lane.b32.xlu1 %v7693_v30, %s5553_s23  ;;  %v5446_v30 = vpack.i.bf16 %v7786_v52, %v7763_v54  ;;  %v5522_v52 = vld [vmem:[%s8034_s8 + $0x4] ss:$12 sps:$4 sm:$0x3f]  }
 0x6f5   : > { %3833 = vmatprep.mubr.bf16.mxu1 %v5522_v52 }
 0x6f6   : > { %5437 = vrot.lane.b32.xlu0 %v5436_v32, %s5553_s23 }
 0x6f8   : > { %5427 = vrot.lane.b32.xlu1 %v5426_v28, %s5553_s23 }
 0x6fa   : > { %5442 = vrot.lane.b32.xlu0 %v5441_v29, %s5553_s23 }
 0x6fc   : > { %5432 = vrot.lane.b32.xlu1 %v5431_v24, %s5553_s23 }
 0x6fe   : > { %5457 = vrot.lane.b32.xlu0 %v5456_v2, %s5553_s23 }
 0x700   : > { %5447 = vrot.lane.b32.xlu1 %v5446_v30, %s5553_s23 }
 0x702   : > { %5462 = vrot.lane.b32.xlu0 %v5461_v12, %s5553_s23 }
 0x704   : > { %5452 = vrot.lane.b32.xlu1 %v5451_v46, %s5553_s23 }
 0x706   : > { %3780 = vperm.xlu0 %4664, %v3772_v50  }
 0x708   : > { %3775 = vperm.xlu1 %4665, %v3771_v36  }
 0x748   : > { %v5348_v22 = vpop.permute.xlu0 %5347 }
 0x749   : > { %v5350_v60 = vunpack.i.h.bf16 %v5348_v22  ;;  %v5349_v3 = vunpack.i.l.bf16 %v5348_v22  ;;  %v5353_v63 = vpop.permute.xlu1 %5352 }
 0x74a   : > { %v5355_v57 = vunpack.i.h.bf16 %v5353_v63  ;;  %v5354_v6 = vunpack.i.l.bf16 %v5353_v63 }
 0x74c   : > { %v5363_v18 = vpop.permute.xlu0 %5362  ;;  %v3538_v25 = vsel %vm8442_vm1, %v5350_v60, %v5355_v57  ;;  %v3574_v0 = vsel %vm8443_vm14, %v5355_v57, %v5350_v60  ;;  %v3537_v21 = vsel %vm8444_vm10, %v5349_v3, %v5354_v6  ;;  %v3573_v42 = vsel %vm8445_vm4, %v5354_v6, %v5349_v3  ;;  %vm8452_vm14 = vmmov %vm8442_vm1 }
 0x74d   : > { %v4440_v62 = vpack.c.bf16 %v3538_v25, %v3537_v21  ;;  %v4443_v19 = vpack.c.bf16 %v3574_v0, %v3573_v42  ;;  %v5365_v41 = vunpack.i.h.bf16 %v5363_v18  ;;  %v5364_v39 = vunpack.i.l.bf16 %v5363_v18  ;;  %v5358_v26 = vpop.permute.xlu1 %5357  ;;  %vm8453_vm10 = vmmov %vm8442_vm1 }
 0x74e   : > { %v5360_v5 = vunpack.i.h.bf16 %v5358_v26  ;;  %v5359_v56 = vunpack.i.l.bf16 %v5358_v26  ;;  %vm8454_vm4 = vmmov %vm8442_vm1 }
 0x74f   : > { %4441 = vmatprep.subr.msk.bf16.mxu1 %vm5808_vm0, %v4440_v62 }
 0x750   : > { %v5373_v55 = vpop.permute.xlu0 %5372  ;;  %v3535_v45 = vsel %vm8446_vm13, %v5364_v39, %v5359_v56  ;;  %v3536_v37 = vsel %vm8447_vm8, %v5365_v41, %v5360_v5  ;;  %v3571_v31 = vsel %vm8448_vm9, %v5359_v56, %v5364_v39  ;;  %v3572_v48 = vsel %vm8449_vm15, %v5360_v5, %v5365_v41  ;;  %4444 = vmatpush1.bf16.msk.msra.mxu1 %vm5826_vm2, %v4443_v19  ;;  %vm8455_vm13 = vmmov %vm8442_vm1 }
 0x751   : > { %v4446_v20 = vpack.c.bf16 %v3536_v37, %v3535_v45  ;;  %v4449_v32 = vpack.c.bf16 %v3572_v48, %v3571_v31  ;;  %v5375_v28 = vunpack.i.h.bf16 %v5373_v55  ;;  %v5374_v29 = vunpack.i.l.bf16 %v5373_v55  ;;  %vm8456_vm8 = vmmov %vm8442_vm1 }
 0x752   : > { %v5368_v24 = vpop.permute.xlu1 %5367  ;;  %vm8457_vm9 = vmmov %vm8442_vm1 }
 0x753   : > { %v5370_v2 = vunpack.i.h.bf16 %v5368_v24  ;;  %v5369_v30 = vunpack.i.l.bf16 %v5368_v24  ;;  %4447 = vmatprep.subr.msk.bf16.mxu1 %vm5808_vm0, %v4446_v20  ;;  %vm8458_vm15 = vmmov %vm8442_vm1 }
 0x754   : > { %v5383_v12 = vpop.permute.xlu0 %5382  ;;  %4450 = vmatpush1.bf16.msk.msra.mxu1 %vm5826_vm2, %v4449_v32 }
 0x755   : > { %v3533_v46 = vsel %vm8450_vm3, %v5374_v29, %v5369_v30  ;;  %v3534_v50 = vsel %vm8451_vm6, %v5375_v28, %v5370_v2  ;;  %v3569_v36 = vsel %vm8442_vm1, %v5369_v30, %v5374_v29  ;;  %v3570_v52 = vsel %vm8452_vm14, %v5370_v2, %v5375_v28  ;;  %vm8459_vm3 = vmmov %vm8442_vm1 }
 0x756   : > { %v4452_v22 = vpack.c.bf16 %v3534_v50, %v3533_v46  ;;  %v4455_v60 = vpack.c.bf16 %v3570_v52, %v3569_v36  ;;  %v5385_v3 = vunpack.i.h.bf16 %v5383_v12  ;;  %v5384_v63 = vunpack.i.l.bf16 %v5383_v12  ;;  %v5378_v57 = vpop.permute.xlu1 %5377  ;;  %vm8460_vm6 = vmmov %vm8442_vm1 }
 0x757   : > { %v5380_v6 = vunpack.i.h.bf16 %v5378_v57  ;;  %v5379_v18 = vunpack.i.l.bf16 %v5378_v57  ;;  %vm8461_vm14 = vmmov %vm8442_vm1 }
 0x758   : > { %4453 = vmatprep.subr.msk.bf16.mxu1 %vm5808_vm0, %v4452_v22  ;;  %v5398_v25 = vpop.permute.xlu0 %5397 }
 0x759   : > { %v3531_v0 = vsel %vm8453_vm10, %v5384_v63, %v5379_v18  ;;  %v3532_v21 = vsel %vm8454_vm4, %v5385_v3, %v5380_v6  ;;  %v3567_v42 = vsel %vm8455_vm13, %v5379_v18, %v5384_v63  ;;  %v3568_v62 = vsel %vm8456_vm8, %v5380_v6, %v5385_v3  ;;  %4456 = vmatpush1.bf16.msk.msra.mxu1 %vm5826_vm2, %v4455_v60  ;;  %vm8462_vm10 = vmmov %vm8442_vm1 }
 0x75a   : > { %v4458_v19 = vpack.c.bf16 %v3532_v21, %v3531_v0  ;;  %v4461_v41 = vpack.c.bf16 %v3568_v62, %v3567_v42  ;;  %v5400_v39 = vunpack.i.h.bf16 %v5398_v25  ;;  %v5399_v26 = vunpack.i.l.bf16 %v5398_v25  ;;  %v5388_v5 = vpop.permute.xlu1 %5387  ;;  %vm8463_vm4 = vmmov %vm8442_vm1 }
 0x75b   : > { %v5390_v56 = vunpack.i.h.bf16 %v5388_v5  ;;  %v5389_v55 = vunpack.i.l.bf16 %v5388_v5 }
 0x75c   : > { %4459 = vmatprep.subr.msk.bf16.mxu1 %vm5808_vm0, %v4458_v19  ;;  %v5403_v45 = vpop.permute.xlu0 %5402 }
 0x75d   : > { %v3529_v37 = vsel %vm8457_vm9, %v5399_v26, %v5389_v55  ;;  %v3530_v31 = vsel %vm8458_vm15, %v5400_v39, %v5390_v56  ;;  %v3565_v48 = vsel %vm8459_vm3, %v5389_v55, %v5399_v26  ;;  %v3566_v20 = vsel %vm8460_vm6, %v5390_v56, %v5400_v39  ;;  %4462 = vmatpush1.bf16.msk.msra.mxu1 %vm5826_vm2, %v4461_v41 }
 0x75e   : > { %v4464_v32 = vpack.c.bf16 %v3530_v31, %v3529_v37  ;;  %v4467_v28 = vpack.c.bf16 %v3566_v20, %v3565_v48  ;;  %v5405_v29 = vunpack.i.h.bf16 %v5403_v45  ;;  %v5404_v24 = vunpack.i.l.bf16 %v5403_v45  ;;  %v5393_v2 = vpop.permute.xlu1 %5392 }
 0x75f   : > { %v5395_v30 = vunpack.i.h.bf16 %v5393_v2  ;;  %v5394_v12 = vunpack.i.l.bf16 %v5393_v2 }
 0x760   : > { %4465 = vmatprep.subr.msk.bf16.mxu1 %vm5808_vm0, %v4464_v32  ;;  %v5413_v46 = vpop.permute.xlu0 %5412 }
 0x761   : > { %v3527_v50 = vsel %vm8442_vm1, %v5404_v24, %v5394_v12  ;;  %v3528_v36 = vsel %vm8461_vm14, %v5405_v29, %v5395_v30  ;;  %v3563_v52 = vsel %vm8462_vm10, %v5394_v12, %v5404_v24  ;;  %v3564_v22 = vsel %vm8463_vm4, %v5395_v30, %v5405_v29  ;;  %4468 = vmatpush1.bf16.msk.msra.mxu1 %vm5826_vm2, %v4467_v28 }
 0x762   : > { %v4470_v60 = vpack.c.bf16 %v3528_v36, %v3527_v50  ;;  %v4473_v3 = vpack.c.bf16 %v3564_v22, %v3563_v52  ;;  %v5415_v63 = vunpack.i.h.bf16 %v5413_v46  ;;  %v5414_v57 = vunpack.i.l.bf16 %v5413_v46  ;;  %v5408_v6 = vpop.permute.xlu1 %5407 }
 0x763   : > { %v5410_v18 = vunpack.i.h.bf16 %v5408_v6  ;;  %v5409_v25 = vunpack.i.l.bf16 %v5408_v6 }
 0x764   : > { %v3654_v0 = vsel %vm607_vm11, %v5414_v57, %v5415_v63  ;;  %v3702_v21 = vsel %vm607_vm11, %v5415_v63, %v5414_v57  ;;  %4471 = vmatprep.subr.msk.bf16.mxu1 %vm5808_vm0, %v4470_v60  ;;  %v5423_v42 = vpop.permute.xlu0 %5422 }
 0x765   : > { %v3653_v62 = vsel %vm607_vm11, %v5409_v25, %v5410_v18  ;;  %v3701_v19 = vsel %vm607_vm11, %v5410_v18, %v5409_v25  ;;  %v5425_v41 = vunpack.i.h.bf16 %v5423_v42  ;;  %v5424_v39 = vunpack.i.l.bf16 %v5423_v42  ;;  %4474 = vmatpush1.bf16.msk.msra.mxu1 %vm5826_vm2, %v4473_v3 }
 0x766   : > { %v4476_v26 = vpack.c.bf16 %v3702_v21, %v3701_v19  ;;  %v4479_v5 = vpack.c.bf16 %v3654_v0, %v3653_v62  ;;  %v5418_v56 = vpop.permute.xlu1 %5417 }
 0x767   : > { %v3652_v55 = vsel %vm607_vm11, %v5424_v39, %v5425_v41  ;;  %v3700_v45 = vsel %vm607_vm11, %v5425_v41, %v5424_v39  ;;  %v5420_v37 = vunpack.i.h.bf16 %v5418_v56  ;;  %v5419_v43 = vunpack.i.l.bf16 %v5418_v56 }
 0x768   : > { %4477 = vmatprep.subr.msk.bf16.mxu1 %vm5951_vm7, %v4476_v26  ;;  %v5438_v31 = vpop.permute.xlu0 %5437 }
 0x769   : > { %v3651_v48 = vsel %vm607_vm11, %v5419_v43, %v5420_v37  ;;  %v3699_v20 = vsel %vm607_vm11, %v5420_v37, %v5419_v43  ;;  %v5440_v32 = vunpack.i.h.bf16 %v5438_v31  ;;  %v5439_v51 = vunpack.i.l.bf16 %v5438_v31  ;;  %4480 = vmatpush2.bf16.msk.msra.mxu1 %vm5966_vm12, %v4479_v5 }
 0x76a   : > { %v4482_v28 = vpack.c.bf16 %v3700_v45, %v3699_v20  ;;  %v4485_v29 = vpack.c.bf16 %v3652_v55, %v3651_v48  ;;  %v5428_v24 = vpop.permute.xlu1 %5427 }
 0x76b   : > { %v3650_v2 = vsel %vm607_vm11, %v5439_v51, %v5440_v32  ;;  %v3698_v30 = vsel %vm607_vm11, %v5440_v32, %v5439_v51  ;;  %v5430_v12 = vunpack.i.h.bf16 %v5428_v24  ;;  %v5429_v46 = vunpack.i.l.bf16 %v5428_v24 }
 0x76c   : > { %4483 = vmatprep.subr.msk.bf16.mxu1 %vm5951_vm7, %v4482_v28  ;;  %v5443_v50 = vpop.permute.xlu0 %5442 }
 0x76d   : > { %v3649_v36 = vsel %vm607_vm11, %v5429_v46, %v5430_v12  ;;  %v3697_v52 = vsel %vm607_vm11, %v5430_v12, %v5429_v46  ;;  %v5445_v22 = vunpack.i.h.bf16 %v5443_v50  ;;  %v5444_v60 = vunpack.i.l.bf16 %v5443_v50  ;;  %4486 = vmatpush2.bf16.msk.msra.mxu1 %vm5966_vm12, %v4485_v29 }
 0x76e   : > { %v4488_v3 = vpack.c.bf16 %v3698_v30, %v3697_v52  ;;  %v4491_v63 = vpack.c.bf16 %v3650_v2, %v3649_v36  ;;  %v5433_v57 = vpop.permute.xlu1 %5432 }
 0x76f   : > { %v3648_v6 = vsel %vm607_vm11, %v5444_v60, %v5445_v22  ;;  %v3696_v18 = vsel %vm607_vm11, %v5445_v22, %v5444_v60  ;;  %v5435_v25 = vunpack.i.h.bf16 %v5433_v57  ;;  %v5434_v0 = vunpack.i.l.bf16 %v5433_v57 }
 0x770   : > { %4489 = vmatprep.subr.msk.bf16.mxu1 %vm5951_vm7, %v4488_v3  ;;  %v5458_v21 = vpop.permute.xlu0 %5457 }
 0x771   : > { %v3647_v42 = vsel %vm607_vm11, %v5434_v0, %v5435_v25  ;;  %v3695_v62 = vsel %vm607_vm11, %v5435_v25, %v5434_v0  ;;  %v5460_v19 = vunpack.i.h.bf16 %v5458_v21  ;;  %v5459_v41 = vunpack.i.l.bf16 %v5458_v21  ;;  %4492 = vmatpush2.bf16.msk.msra.mxu1 %vm5966_vm12, %v4491_v63 }
 0x772   : > { %v4494_v39 = vpack.c.bf16 %v3696_v18, %v3695_v62  ;;  %v4497_v26 = vpack.c.bf16 %v3648_v6, %v3647_v42  ;;  %v5448_v5 = vpop.permute.xlu1 %5447 }
 0x773   : > { %v3658_v56 = vsel %vm607_vm11, %v5459_v41, %v5460_v19  ;;  %v3706_v55 = vsel %vm607_vm11, %v5460_v19, %v5459_v41  ;;  %v5450_v45 = vunpack.i.h.bf16 %v5448_v5  ;;  %v5449_v37 = vunpack.i.l.bf16 %v5448_v5 }
 0x774   : > { %4495 = vmatprep.subr.msk.bf16.mxu1 %vm5951_vm7, %v4494_v39  ;;  %v5463_v43 = vpop.permute.xlu0 %5462 }
 0x775   : > { %v3657_v31 = vsel %vm607_vm11, %v5449_v37, %v5450_v45  ;;  %v3705_v48 = vsel %vm607_vm11, %v5450_v45, %v5449_v37  ;;  %v5465_v20 = vunpack.i.h.bf16 %v5463_v43  ;;  %v5464_v32 = vunpack.i.l.bf16 %v5463_v43  ;;  %4498 = vmatpush2.bf16.msk.msra.mxu1 %vm5966_vm12, %v4497_v26 }
 0x776   : > { %v4506_v51 = vpack.c.bf16 %v3706_v55, %v3705_v48  ;;  %v4509_v28 = vpack.c.bf16 %v3658_v56, %v3657_v31  ;;  %v5453_v29 = vpop.permute.xlu1 %5452  ;;  %4501 = vmatprep.subr.msk.bf16.mxu1 %vm6287_vm5, %v4500_v53  ;;  %v5523_v53 = vld [vmem:[%s8034_s8 + $0x8] ss:$12 sps:$4 sm:$0x3f]  }
 0x777   : > { %v3656_v24 = vsel %vm607_vm11, %v5464_v32, %v5465_v20  ;;  %v3704_v2 = vsel %vm607_vm11, %v5465_v20, %v5464_v32  ;;  %v5455_v30 = vunpack.i.h.bf16 %v5453_v29  ;;  %v5454_v12 = vunpack.i.l.bf16 %v5453_v29 }
 0x778   : > { %4507 = vmatprep.subr.msk.bf16.mxu0 %vm5951_vm7, %v4506_v51 }
 0x779   : > { %v3655_v46 = vsel %vm607_vm11, %v5454_v12, %v5455_v30  ;;  %v3703_v50 = vsel %vm607_vm11, %v5455_v30, %v5454_v12  ;;  %3826 = vmatpush2.bf16.msra.mxu1 %v3757_v34  ;;  %4510 = vmatpush1.bf16.msk.msra.mxu0 %vm5966_vm12, %v4509_v28  ;;  %vm8464_vm11 = vcmask 261120  }
 0x77a   : > { %v4512_v8 = vpack.c.bf16 %v3704_v2, %v3703_v50  ;;  %v4515_v44 = vpack.c.bf16 %v3656_v24, %v3655_v46  ;;  %4504 = vmatprep.subr.msk.bf16.mxu1 %vm6287_vm5, %v4503_v10 }
 0x77c   : > { %4513 = vmatprep.subr.msk.bf16.mxu0 %vm5951_vm7, %v4512_v8 }
 0x77d   : > { %3828 = vmatpush2.bf16.msra.mxu1 %v3755_v23  ;;  %4516 = vmatpush1.bf16.msk.msra.mxu0 %vm5966_vm12, %v4515_v44 }
 0x77e   : > { %3829 = vmatprep.subr.bf16.mxu1 %v3754_v7 }
 0x780   : > { %4517 = vmatmul.mubr.msk.bf16.vlgmr.msra.gmra.mxu0 %vm8464_vm11, %v5523_v53 }
 0x781   : > { %3830 = vmatpush2.bf16.msra.mxu1 %v3753_v17  ;;  %v3781_v4 = vpop.permute.xlu0 %3780 }
 0x782   : > { %3831 = vmatprep.subr.bf16.mxu1 %v3752_v9 }
 0x783   : > { %v3776_v38 = vpop.permute.xlu1 %3775 }
 0x785   : > { %3832 = vmatpush2.bf16.msra.mxu1 %v3751_v13 }
 0x788   : > { %3834 = vmatmul.mubr.bf16.vlgmr.msra.gmra.mxu1 %v5520_v27 }
 0x840   : > { %v3878_v47 = vpop.f32.mrf.mxu0 }
 0x842   : > { %v3880_v14 = vpop.f32.mrf.mxu0 }
 0x844   : > { %v3882_v59 = vpop.f32.mrf.mxu0 }
 0x846   : > { %v3884_v13 = vpop.f32.mrf.mxu0 }
 0x848   : > { %v3835_v35 = vpop.f32.mrf.mxu1 }
 0x849   : > { %v3836_v7 = vadd.f32 %v3835_v35, %v3776_v38 }
 0x84a   : > { %v3837_v49 = vpop.f32.mrf.mxu1 }
 0x84b   : > { %v3838_v17 = vadd.f32 %v3837_v49, %v3776_v38  ;;  %v3879_v54 = vadd.f32 %v3878_v47, %v3836_v7 }
 0x84c   : > { %v3839_v58 = vpop.f32.mrf.mxu1 }
 0x84d   : > { %v4518_v9 = vmul.f32 -1.442695, %v3879_v54  ;;  %v3840_v16 = vadd.f32 %v3839_v58, %v3781_v4  ;;  %v3881_v33 = vadd.f32 %v3880_v14, %v3838_v17 }
 0x84e   : > { %v3841_v34 = vpop.f32.mrf.mxu1 }
 0x84f   : > { %5524 = vpow2.f32 %v4518_v9  ;;  %v4519_v61 = vmul.f32 -1.442695, %v3881_v33  ;;  %v3842_v1 = vadd.f32 %v3841_v34, %v3781_v4  ;;  %v3883_v11 = vadd.f32 %v3882_v59, %v3840_v16 }
 0x851   : > { %5526 = vpow2.f32 %v4519_v61  ;;  %v4520_v40 = vmul.f32 -1.442695, %v3883_v11  ;;  %v3885_v15 = vadd.f32 %v3884_v13, %v3842_v1 }
 0x853   : > { %5528 = vpow2.f32 %v4520_v40  ;;  %v4521_v10 = vmul.f32 -1.442695, %v3885_v15 }
 0x855   : > { %5530 = vpow2.f32 %v4521_v10 }
 0x85c   : > { %v5525_v23 = vpop.eup %5524 }
 0x85d   : > { %v3899_v36 = vadd.f32 1.0, %v5525_v23 }
 0x85e   : > { %v5527_v52 = vpop.eup %5526 }
 0x85f   : > { %5532 = vrcp.f32 %v3899_v36  ;;  %v3900_v22 = vadd.f32 1.0, %v5527_v52 }
 0x860   : > { %v5529_v60 = vpop.eup %5528 }
 0x861   : > { %5534 = vrcp.f32 %v3900_v22  ;;  %v3901_v3 = vadd.f32 1.0, %v5529_v60 }
 0x862   : > { %v5531_v63 = vpop.eup %5530 }
 0x863   : > { %5536 = vrcp.f32 %v3901_v3  ;;  %v3902_v57 = vadd.f32 1.0, %v5531_v63 }
 0x865   : > { %5538 = vrcp.f32 %v3902_v57 }
 0x86c   : > { %v5533_v6 = vpop.eup %5532 }
 0x86d   : > { %3911 = vst [vmem:[%s359_s28] sm:$0xff] %v5533_v6 }
 0x86e   : > { %v5535_v18 = vpop.eup %5534 }
 0x86f   : > { %3912 = vst [vmem:[%s359_s28 + $0x8] sm:$0xff] %v5535_v18 }
 0x870   : > { %v5537_v25 = vpop.eup %5536 }
 0x871   : > { %3913 = vst [vmem:[%s359_s28 + $0x10] sm:$0xf] %v5537_v25 }
 0x872   : > { %v5539_v0 = vpop.eup %5538 }
 0x873   : > { %3914 = vst [vmem:[%s359_s28 + $0x18] sm:$0xf] %v5539_v0 }
 0x874 PF: > { %s20_s13 = sadd.s32 1, %s5546_s13  }
 0x875   : > { %p17_p4 = scmp.ge.s32.totalorder %s20_s13, 4  }
 0x877   :  { %19 = sbr.rel (!%p17_p4) target bundleno = 1 (0x1), region = 90 }

</bundles_post_ra>
